<compile_context>
chip_gen: v6e
topology: v6e:2x2x1
jax: 0.10.0
libtpu: 0.0.40
codegen_flags: <defaults>
</compile_context>

<pallas_src>
import jax
import jax.numpy as jnp
from jax.experimental import pallas as pl
from jax.experimental.pallas import tpu as pltpu


TILE_N = 256  # output-feature tile: full MXU width on v6e/v7x, grid=(2,) for N=512


def linear_kernel(x_ref, w_ref, b_ref, o_ref):
    # x_ref: (rows, K) f32 (resident), w_ref: (K, TILE_N) bf16 (streamed),
    # b_ref: (1, TILE_N) f32, o_ref: (rows, TILE_N) f32.
    x_bf = x_ref[...].astype(jnp.bfloat16)          # VPU cast; keeps MXU on bf16 path
    acc = jnp.dot(x_bf, w_ref[...], preferred_element_type=jnp.float32)
    o_ref[...] = (acc + b_ref[...]).astype(o_ref.dtype)


def prepare_linear_params(weight_t, bias):
    """One-time (static parameter) prep.

    weight_t: (K, N) f32  ->  (N//TILE_N, K, TILE_N) bf16, each N-tile contiguous.
    bias:     (N,)   f32  ->  (1, N) f32.
    """
    K, N = weight_t.shape
    assert N % TILE_N == 0, (N, TILE_N)
    w_tiles = weight_t.reshape(K, N // TILE_N, TILE_N).transpose(1, 0, 2)
    w_tiles = w_tiles.astype(jnp.bfloat16)
    return w_tiles, bias.reshape(1, N)


def linear_pallas(x, w_tiles, b2d):
    """x: (..., K) f32, w_tiles: (N//TILE_N, K, TILE_N) bf16, b2d: (1, N) f32."""
    *lead, K = x.shape
    n_tiles, Kw, tn = w_tiles.shape
    assert Kw == K, (Kw, K)
    N = n_tiles * tn

    rows = 1
    for d in lead:
        rows *= d
    x2d = x.reshape(rows, K)   # (196, 2048); no padding — block dims use full extents

    out2d = pl.pallas_call(
        linear_kernel,
        out_shape=jax.ShapeDtypeStruct((rows, N), x.dtype),
        grid_spec=pltpu.PrefetchScalarGridSpec(
            num_scalar_prefetch=0,
            grid=(n_tiles,),
            in_specs=[
                # Activations resident across both N steps (constant block idx).
                pl.BlockSpec((rows, K), lambda j: (0, 0)),
                # One contiguous bf16 weight tile per step (leading dim squeezed).
                pl.BlockSpec((None, K, tn), lambda j: (j, 0, 0)),
                # Bias tile matching the output tile (tiny).
                pl.BlockSpec((1, tn), lambda j: (0, j)),
            ],
            out_specs=pl.BlockSpec((rows, tn), lambda j: (0, j)),
        ),
        compiler_params=pltpu.CompilerParams(
            dimension_semantics=("parallel",),   # v7x: one N tile per TensorCore
            vmem_limit_bytes=32 << 20,           # working set ~6 MiB incl. buffering
        ),
        cost_estimate=pl.CostEstimate(
            flops=2 * rows * K * N,
            bytes_accessed=rows * K * 4 + n_tiles * K * tn * 2 + rows * N * 4 + N * 4,
            transcendentals=0,
        ),
    )(x2d, w_tiles, b2d)

    return out2d.reshape(*lead, N)


if __name__ == "__main__":
    IN_FEATURES = 2048
    OUT_FEATURES = 512

    key = jax.random.PRNGKey(0)
    kx, kw, kb = jax.random.split(key, 3)

    # Input consistent with the module's forward: [1, 14, 14, 2048]
    x = jax.random.normal(kx, (1, 14, 14, IN_FEATURES), dtype=jnp.float32)

    # Deterministic parameter init (PyTorch Linear-style uniform bound).
    bound = 1.0 / (IN_FEATURES ** 0.5)
    # weight_t is (in_features, out_features): transpose of PyTorch's (out, in).
    weight_t = jax.random.uniform(
        kw, (IN_FEATURES, OUT_FEATURES), minval=-bound, maxval=bound,
        dtype=jnp.float32)
    bias = jax.random.uniform(
        kb, (OUT_FEATURES,), minval=-bound, maxval=bound, dtype=jnp.float32)

    # One-time static-parameter prep (tile + bf16 cast).
    w_tiles, b2d = prepare_linear_params(weight_t, bias)
    w_tiles = jax.block_until_ready(w_tiles)

    fwd = jax.jit(linear_pallas)
    out = fwd(x, w_tiles, b2d)
    out = jax.block_until_ready(out)

    # Reference check in plain JAX (f32). bf16 weights/activations in the
    # kernel => relaxed tolerance.
    ref = x.reshape(-1, IN_FEATURES) @ weight_t + bias
    ref = ref.reshape(1, 14, 14, OUT_FEATURES)
    assert out.shape == (1, 14, 14, OUT_FEATURES), out.shape
    assert jnp.allclose(out, ref, atol=3e-2, rtol=3e-2)

    print("KERNEL_OK")
</pallas_src>

<mosaic_0001>
module attributes {stable_mosaic.version = 11 : i64} {
  func.func @linear_kernel(%arg0: i32, %arg1: memref<196x2048xf32, #tpu.memory_space<vmem>>, %arg2: memref<1x2048x256xbf16, #tpu.memory_space<vmem>>, %arg3: memref<1x256xf32, #tpu.memory_space<vmem>>, %arg4: memref<196x256xf32, #tpu.memory_space<vmem>>) attributes {dimension_semantics = [#tpu.dimension_semantics<parallel>], iteration_bounds = array<i64: 2>, scalar_prefetch = 0 : i64, scratch_operands = 0 : i64, tpu.core_type = #tpu.core_type<tc>, window_params = [{pipeline_mode = #tpu.pipeline_mode<synchronous>, transform_indices = @transform_0, window_bounds = array<i64: 196, 2048>}, {transform_indices = @transform_1, window_bounds = array<i64: 1, 2048, 256>}, {transform_indices = @transform_2, window_bounds = array<i64: 1, 256>}, {transform_indices = @transform_3, window_bounds = array<i64: 196, 256>}]} {
    %c0 = arith.constant 0 : index
    %c0_0 = arith.constant 0 : index
    %0 = vector.load %arg1[%c0, %c0_0] : memref<196x2048xf32, #tpu.memory_space<vmem>>, vector<196x2048xf32>
    %1 = arith.truncf %0 : vector<196x2048xf32> to vector<196x2048xbf16>
    %c0_1 = arith.constant 0 : index
    %c0_2 = arith.constant 0 : index
    %c0_3 = arith.constant 0 : index
    %2 = vector.load %arg2[%c0_1, %c0_2, %c0_3] : memref<1x2048x256xbf16, #tpu.memory_space<vmem>>, vector<1x2048x256xbf16>
    %3 = vector.shape_cast %2 : vector<1x2048x256xbf16> to vector<2048x256xbf16>
    %cst = arith.constant dense<0.000000e+00> : vector<196x256xf32>
    %4 = tpu.matmul %1, %3, %cst {dimension_numbers = #tpu.dot_dimension_numbers<[1], [0], [0], [1], [0, 0, 1, 1], [], []>} : vector<196x2048xbf16>, vector<2048x256xbf16>, vector<196x256xf32> -> vector<196x256xf32>
    %c0_4 = arith.constant 0 : index
    %c0_5 = arith.constant 0 : index
    %5 = vector.load %arg3[%c0_4, %c0_5] : memref<1x256xf32, #tpu.memory_space<vmem>>, vector<1x256xf32>
    %6 = vector.broadcast %5 : vector<1x256xf32> to vector<196x256xf32>
    %7 = arith.addf %4, %6 : vector<196x256xf32>
    %c0_6 = arith.constant 0 : index
    %c0_7 = arith.constant 0 : index
    %8 = vector.load %arg4[%c0_6, %c0_7] : memref<196x256xf32, #tpu.memory_space<vmem>>, vector<196x256xf32>
    tpu.vector_store %arg4[%c0_6, %c0_7], %7 {strides = array<i32>} : memref<196x256xf32, #tpu.memory_space<vmem>>, vector<196x256xf32>,
    return
  }
  func.func @transform_0(%arg0: i32) -> (i32, i32) {
    %c0_i32 = arith.constant 0 : i32
    %c0_i32_0 = arith.constant 0 : i32
    %c0_i32_1 = arith.constant 0 : i32
    return %c0_i32, %c0_i32_0 : i32, i32
  }
  func.func @transform_1(%arg0: i32) -> (i32, i32, i32) {
    %c0_i32 = arith.constant 0 : i32
    %c0_i32_0 = arith.constant 0 : i32
    %c0_i32_1 = arith.constant 0 : i32
    return %arg0, %c0_i32, %c0_i32_0 : i32, i32, i32
  }
  func.func @transform_2(%arg0: i32) -> (i32, i32) {
    %c0_i32 = arith.constant 0 : i32
    %c0_i32_0 = arith.constant 0 : i32
    return %c0_i32, %arg0 : i32, i32
  }
  func.func @transform_3(%arg0: i32) -> (i32, i32) {
    %c0_i32 = arith.constant 0 : i32
    %c0_i32_0 = arith.constant 0 : i32
    return %c0_i32, %arg0 : i32, i32
  }
}

</mosaic_0001>

<bundles_post_ra>
// kernel: linear_pallas.1
= control target key start
LH: loop header
LB: loop body
LE: loop exit
PB: predicated region body
PF: predicated region fallthrough
CT: control target
= control target key end

     0   :  { %s4586_s12 = smov 0   ;;  %s4588_s13 = smov 0   ;;  %s6757_s0 = inlined_call_operand.vmem [shape: f32[196,2048], index: 0, kind: input, shape index: {}]   ;;  %s6758_s1 = inlined_call_operand.vmem [shape: bf16[2,2048,256], index: 1, kind: input, shape index: {}]   ;;  %s6759_s2 = inlined_call_operand.vmem [shape: f32[1,512], index: 2, kind: input, shape index: {}]   ;;  %s6760_s3 = inlined_call_operand.vmem [shape: f32[196,512], index: 3, kind: output, shape index: {}]  }
   0x1   :  { %s4590_s14 = smov 0  }
   0x2 LB: > { %s4599_s15 = sadd.s32 4294967295, %s4564_s14   ;;  %s4601_s16 = sadd.s32 1, %s4564_s14   ;;  %s4564_s14 = sphi %s4590_s14, %s6810_s14   ;;  %s4560_s13 = sphi %s4588_s13, %s6809_s13   ;;  %s4556_s12 = sphi %s4586_s12, %s6808_s12  }
   0x3   : > { %s90_s17 = ssub.s32 %s4564_s14, %s4601_s16  ;;  %s93_s18 = sadd.s32 1, %s4560_s13 }
   0x4   : > { %p91_p0 = scmp.eq.s32.totalorder %s90_s17, 0  ;;  %p103_p1 = scmp.ne.s32.totalorder %s4560_s13, %s4556_s12 }
   0x5   : > { %p104_p2 = scmp.eq.s32.totalorder %s4599_s15, 1  ;;  %p3867_p3 = scmp.ge.s32.totalorder %s4564_s14, 1 }
   0x6   : > { %s4609_s19 = scalar_select %p91_p0, %s4560_s13, %s93_s18  }
   0x7   : > { %p4611_p4 = por %p104_p2, %p103_p1  ;;  %p147_p5 = scmp.lt.s32.totalorder %s4564_s14, 3 }
   0x9   : > { %p148_p6 = pnand %p3867_p3, %p147_p5 }
   0xb   : > { %151 = sbr.rel (%p148_p6) target bundleno = 703 (0x2bf), region = 32 }
  0x10   : > { %p174_p7 = scmp.lt.s32.totalorder %s4599_s15, 1  ;;  %v186_v0 = vld [vmem:[%s6757_s0 + $0x8] sm:$0xff]  ;;  %v188_v2 = vld [vmem:[%s6757_s0 + $0x18] sm:$0xff]  ;;  %s3870_s7 = sshll.u32 %s4599_s15, 1 }
  0x11   : > { %v202_v1 = vld [vmem:[%s6757_s0 + $0x88] sm:$0xff]  ;;  %v204_v4 = vld [vmem:[%s6757_s0 + $0x98] sm:$0xff]  ;;  %p180_p8 = scmp.lt.s32.totalorder %s3870_s7, 3  ;;  %s171_s14 = sand.u32 1, %s4556_s12  }
  0x12   : > { %v586_v3 = vpack.c.bf16 %v202_v1, %v186_v0  ;;  %s175_s29 = scalar_select %p174_p7, %s4599_s15, 1  ;;  %v588_v5 = vpack.c.bf16 %v204_v4, %v188_v2  ;;  %v185_v4 = vld [vmem:[%s6757_s0] sm:$0xff] }
  0x13   : > { %s6812_s7 = smov (!%p180_p8, %s3870_s7), 3  ;;  %s4133_s17 = smul.u32 400, %s171_s14 }
  0x14   : > { %2373 = vmatprep.mubr.bf16.mxu0 %v586_v3  ;;  %s4131_s30 = sshll.u32 %s175_s29, 11  ;;  %2534 = vmatprep.mubr.bf16.mxu1 %v588_v5  ;;  %v201_v5 = vld [vmem:[%s6757_s0 + $0x80] sm:$0xff]  ;;  %s182_s5 = scalar_lea.vmem %s6759_s2, %s6812_s7 }
  0x15   : > { %s4632_s6 = scalar_lea.vmem %s6758_s1, %s4131_s30  ;;  %s6539_s7 = scalar_lea.vmem [#allocation2], %s4133_s17 }
  0x16   : > { %v4158_v6 = vld [vmem:[%s4632_s6 + $0x74] ss:$8 sps:$4 sm:$0xff]   ;;  %v4162_v8 = vld [vmem:[%s4632_s6 + $0x70] ss:$8 sps:$4 sm:$0xff]   ;;  %v4164_v10 = vld [vmem:[%s4632_s6 + $0x64] ss:$8 sps:$4 sm:$0xff]  }
  0x17   : > { %v4160_v7 = vld [vmem:[%s4632_s6 + $0x174] ss:$8 sps:$4 sm:$0xff]   ;;  %2341 = vmatprep.subr.bf16.mxu0 %v4158_v6  ;;  %v4163_v9 = vld [vmem:[%s4632_s6 + $0x170] ss:$8 sps:$4 sm:$0xff]   ;;  %v4166_v11 = vld [vmem:[%s4632_s6 + $0x164] ss:$8 sps:$4 sm:$0xff]  }
  0x18   : > { %2502 = vmatprep.subr.bf16.mxu1 %v4160_v7  ;;  %2342 = vmatpush1.bf16.msra.mxu0 %v4162_v8  ;;  %v4168_v12 = vld [vmem:[%s4632_s6 + $0x60] ss:$8 sps:$4 sm:$0xff]   ;;  %v4170_v14 = vld [vmem:[%s4632_s6 + $0x54] ss:$8 sps:$4 sm:$0xff]   ;;  %v4174_v16 = vld [vmem:[%s4632_s6 + $0x50] ss:$8 sps:$4 sm:$0xff]  }
  0x19   : > { %2503 = vmatpush1.bf16.msra.mxu1 %v4163_v9  ;;  %2343 = vmatprep.subr.bf16.mxu0 %v4164_v10  ;;  %v4169_v13 = vld [vmem:[%s4632_s6 + $0x160] ss:$8 sps:$4 sm:$0xff]   ;;  %v4172_v15 = vld [vmem:[%s4632_s6 + $0x154] ss:$8 sps:$4 sm:$0xff]   ;;  %v4175_v17 = vld [vmem:[%s4632_s6 + $0x150] ss:$8 sps:$4 sm:$0xff]  }
  0x1a   : > { %2504 = vmatprep.subr.bf16.mxu1 %v4166_v11  ;;  %v4176_v18 = vld [vmem:[%s4632_s6 + $0x44] ss:$8 sps:$4 sm:$0xff]   ;;  %v4180_v20 = vld [vmem:[%s4632_s6 + $0x40] ss:$8 sps:$4 sm:$0xff]   ;;  %v4182_v22 = vld [vmem:[%s4632_s6 + $0x34] ss:$8 sps:$4 sm:$0xff]  }
  0x1b   : > { %v4178_v19 = vld [vmem:[%s4632_s6 + $0x144] ss:$8 sps:$4 sm:$0xff]   ;;  %v4181_v21 = vld [vmem:[%s4632_s6 + $0x140] ss:$8 sps:$4 sm:$0xff]   ;;  %v4184_v23 = vld [vmem:[%s4632_s6 + $0x134] ss:$8 sps:$4 sm:$0xff]  }
  0x1c   : > { %2344 = vmatpush1.bf16.msra.mxu0 %v4168_v12  ;;  %v4186_v24 = vld [vmem:[%s4632_s6 + $0x30] ss:$8 sps:$4 sm:$0xff]   ;;  %v4188_v26 = vld [vmem:[%s4632_s6 + $0x24] ss:$8 sps:$4 sm:$0xff]   ;;  %v4192_v28 = vld [vmem:[%s4632_s6 + $0x20] ss:$8 sps:$4 sm:$0xff]  }
  0x1d   : > { %2505 = vmatpush1.bf16.msra.mxu1 %v4169_v13  ;;  %2345 = vmatprep.subr.bf16.mxu0 %v4170_v14  ;;  %v4187_v25 = vld [vmem:[%s4632_s6 + $0x130] ss:$8 sps:$4 sm:$0xff]   ;;  %v4190_v27 = vld [vmem:[%s4632_s6 + $0x124] ss:$8 sps:$4 sm:$0xff]   ;;  %v4193_v29 = vld [vmem:[%s4632_s6 + $0x120] ss:$8 sps:$4 sm:$0xff]  }
  0x1e   : > { %2506 = vmatprep.subr.bf16.mxu1 %v4172_v15  ;;  %v4194_v30 = vld [vmem:[%s4632_s6 + $0x14] ss:$8 sps:$4 sm:$0xff]   ;;  %v4198_v32 = vld [vmem:[%s4632_s6 + $0x10] ss:$8 sps:$4 sm:$0xff]   ;;  %v4200_v34 = vld [vmem:[%s4632_s6 + $0x4] ss:$8 sps:$4 sm:$0xff]  }
  0x1f   : > { %v4196_v31 = vld [vmem:[%s4632_s6 + $0x114] ss:$8 sps:$4 sm:$0xff]   ;;  %v4199_v33 = vld [vmem:[%s4632_s6 + $0x110] ss:$8 sps:$4 sm:$0xff]   ;;  %v4202_v35 = vld [vmem:[%s4632_s6 + $0x104] ss:$8 sps:$4 sm:$0xff]  }
  0x20   : > { %2346 = vmatpush1.bf16.msra.mxu0 %v4174_v16  ;;  %v4204_v36 = vld [vmem:[%s4632_s6] ss:$8 sps:$4 sm:$0xff]   ;;  %v4206_v38 = vld [vmem:[%s4632_s6 + $0xf4] ss:$8 sps:$4 sm:$0xff]   ;;  %v4210_v40 = vld [vmem:[%s4632_s6 + $0xf0] ss:$8 sps:$4 sm:$0xff]   ;;  %v585_v16 = vpack.c.bf16 %v201_v5, %v185_v4 }
  0x21   : > { %2507 = vmatpush1.bf16.msra.mxu1 %v4175_v17  ;;  %2347 = vmatprep.subr.bf16.mxu0 %v4176_v18  ;;  %v4205_v37 = vld [vmem:[%s4632_s6 + $0x100] ss:$8 sps:$4 sm:$0xff]   ;;  %v4208_v39 = vld [vmem:[%s4632_s6 + $0x1f4] ss:$8 sps:$4 sm:$0xff]   ;;  %v4211_v41 = vld [vmem:[%s4632_s6 + $0x1f0] ss:$8 sps:$4 sm:$0xff]  }
  0x22   : > { %2508 = vmatprep.subr.bf16.mxu1 %v4178_v19  ;;  %v4212_v42 = vld [vmem:[%s4632_s6 + $0xe4] ss:$8 sps:$4 sm:$0xff]   ;;  %v4216_v44 = vld [vmem:[%s4632_s6 + $0xe0] ss:$8 sps:$4 sm:$0xff]   ;;  %v4218_v46 = vld [vmem:[%s4632_s6 + $0xd4] ss:$8 sps:$4 sm:$0xff]  }
  0x23   : > { %v4214_v43 = vld [vmem:[%s4632_s6 + $0x1e4] ss:$8 sps:$4 sm:$0xff]   ;;  %v4217_v45 = vld [vmem:[%s4632_s6 + $0x1e0] ss:$8 sps:$4 sm:$0xff]   ;;  %v4220_v47 = vld [vmem:[%s4632_s6 + $0x1d4] ss:$8 sps:$4 sm:$0xff]  }
  0x24   : > { %2348 = vmatpush1.bf16.msra.mxu0 %v4180_v20  ;;  %v4222_v48 = vld [vmem:[%s4632_s6 + $0xd0] ss:$8 sps:$4 sm:$0xff]   ;;  %v4224_v50 = vld [vmem:[%s4632_s6 + $0xc4] ss:$8 sps:$4 sm:$0xff]   ;;  %v4228_v52 = vld [vmem:[%s4632_s6 + $0xc0] ss:$8 sps:$4 sm:$0xff]  }
  0x25   : > { %2509 = vmatpush1.bf16.msra.mxu1 %v4181_v21  ;;  %2349 = vmatprep.subr.bf16.mxu0 %v4182_v22  ;;  %v4223_v49 = vld [vmem:[%s4632_s6 + $0x1d0] ss:$8 sps:$4 sm:$0xff]   ;;  %v4226_v51 = vld [vmem:[%s4632_s6 + $0x1c4] ss:$8 sps:$4 sm:$0xff]   ;;  %v4229_v53 = vld [vmem:[%s4632_s6 + $0x1c0] ss:$8 sps:$4 sm:$0xff]  }
  0x26   : > { %2510 = vmatprep.subr.bf16.mxu1 %v4184_v23  ;;  %v4230_v54 = vld [vmem:[%s4632_s6 + $0xb4] ss:$8 sps:$4 sm:$0xff]   ;;  %v4234_v56 = vld [vmem:[%s4632_s6 + $0xb0] ss:$8 sps:$4 sm:$0xff]   ;;  %v4236_v58 = vld [vmem:[%s4632_s6 + $0xa4] ss:$8 sps:$4 sm:$0xff]  }
  0x27   : > { %v4232_v55 = vld [vmem:[%s4632_s6 + $0x1b4] ss:$8 sps:$4 sm:$0xff]   ;;  %v4235_v57 = vld [vmem:[%s4632_s6 + $0x1b0] ss:$8 sps:$4 sm:$0xff]   ;;  %v4238_v59 = vld [vmem:[%s4632_s6 + $0x1a4] ss:$8 sps:$4 sm:$0xff]  }
  0x28   : > { %2350 = vmatpush1.bf16.msra.mxu0 %v4186_v24  ;;  %v4240_v60 = vld [vmem:[%s4632_s6 + $0xa0] ss:$8 sps:$4 sm:$0xff]   ;;  %v4242_v62 = vld [vmem:[%s4632_s6 + $0x94] ss:$8 sps:$4 sm:$0xff]   ;;  %v4246_v0 = vld [vmem:[%s4632_s6 + $0x90] ss:$8 sps:$4 sm:$0xff]  }
  0x29   : > { %2511 = vmatpush1.bf16.msra.mxu1 %v4187_v25  ;;  %2351 = vmatprep.subr.bf16.mxu0 %v4188_v26  ;;  %v4241_v61 = vld [vmem:[%s4632_s6 + $0x1a0] ss:$8 sps:$4 sm:$0xff]   ;;  %v4244_v63 = vld [vmem:[%s4632_s6 + $0x194] ss:$8 sps:$4 sm:$0xff]   ;;  %v4247_v1 = vld [vmem:[%s4632_s6 + $0x190] ss:$8 sps:$4 sm:$0xff]  }
  0x2a   : > { %2512 = vmatprep.subr.bf16.mxu1 %v4190_v27  ;;  %v4248_v2 = vld [vmem:[%s4632_s6 + $0x84] ss:$8 sps:$4 sm:$0xff]   ;;  %v187_v6 = vld [vmem:[%s6757_s0 + $0x10] sm:$0xff]  ;;  %v4252_v7 = vld [vmem:[%s4632_s6 + $0x80] ss:$8 sps:$4 sm:$0xff]   ;;  %s4132_s12 = sshll.u32 (%p4611_p4), %s4599_s15, 4 }
  0x2b   : > { %v4250_v3 = vld [vmem:[%s4632_s6 + $0x184] ss:$8 sps:$4 sm:$0xff]   ;;  %v4253_v8 = vld [vmem:[%s4632_s6 + $0x180] ss:$8 sps:$4 sm:$0xff]   ;;  %v203_v9 = vld [vmem:[%s6757_s0 + $0x90] sm:$0xff]  ;;  %s6648_s21 = scalar_lea.vmem (%p4611_p4), %s6760_s3, %s4132_s12 }
  0x2c   : > { %2352 = vmatpush1.bf16.msra.mxu0 %v4192_v28  ;;  %v4256_v10 = vld [vmem:[%s4632_s6 + $0x274] ss:$8 sps:$4 sm:$0xff]   ;;  %v218_v12 = vld [vmem:[%s6757_s0 + $0x108] sm:$0xff]  ;;  %v587_v17 = vpack.c.bf16 %v203_v9, %v187_v6  ;;  %v4254_v18 = vld [vmem:[%s4632_s6 + $0x270] ss:$8 sps:$4 sm:$0xff]  }
  0x2d   : > { %2513 = vmatpush1.bf16.msra.mxu1 %v4193_v29  ;;  %2353 = vmatprep.subr.bf16.mxu0 %v4194_v30  ;;  %v4259_v11 = vld [vmem:[%s4632_s6 + $0x374] ss:$8 sps:$4 sm:$0xff]   ;;  %v234_v13 = vld [vmem:[%s6757_s0 + $0x188] sm:$0xff]  ;;  %v4257_v19 = vld [vmem:[%s4632_s6 + $0x370] ss:$8 sps:$4 sm:$0xff]  }
  0x2e   : > { %2514 = vmatprep.subr.bf16.mxu1 %v4196_v31  ;;  %v220_v14 = vld [vmem:[%s6757_s0 + $0x118] sm:$0xff]  ;;  %v602_v20 = vpack.c.bf16 %v234_v13, %v218_v12  ;;  %v4262_v22 = vld [vmem:[%s4632_s6 + $0x264] ss:$8 sps:$4 sm:$0xff]   ;;  %v219_v25 = vld [vmem:[%s6757_s0 + $0x110] sm:$0xff] }
  0x2f   : > { %v236_v15 = vld [vmem:[%s6757_s0 + $0x198] sm:$0xff]  ;;  %v217_v23 = vld [vmem:[%s6757_s0 + $0x100] sm:$0xff]  ;;  %v235_v26 = vld [vmem:[%s6757_s0 + $0x190] sm:$0xff] }
  0x30   : > { %2354 = vmatpush1.bf16.msra.mxu0 %v4198_v32  ;;  %v604_v21 = vpack.c.bf16 %v236_v15, %v220_v14  ;;  %v233_v24 = vld [vmem:[%s6757_s0 + $0x180] sm:$0xff]  ;;  %v250_v28 = vld [vmem:[%s6757_s0 + $0x208] sm:$0xff]  ;;  %v4268_v32 = vld [vmem:[%s4632_s6 + $0x254] ss:$8 sps:$4 sm:$0xff]  }
  0x31   : > { %2515 = vmatpush1.bf16.msra.mxu1 %v4199_v33  ;;  %2355 = vmatprep.subr.bf16.mxu0 %v4200_v34  ;;  %v4265_v27 = vld [vmem:[%s4632_s6 + $0x364] ss:$8 sps:$4 sm:$0xff]   ;;  %v4260_v29 = vld [vmem:[%s4632_s6 + $0x260] ss:$8 sps:$4 sm:$0xff]   ;;  %v4271_v33 = vld [vmem:[%s4632_s6 + $0x354] ss:$8 sps:$4 sm:$0xff]  }
  0x32   : > { %2516 = vmatprep.subr.bf16.mxu1 %v4202_v35  ;;  %v4263_v30 = vld [vmem:[%s4632_s6 + $0x360] ss:$8 sps:$4 sm:$0xff]   ;;  %v252_v34 = vld [vmem:[%s6757_s0 + $0x218] sm:$0xff] }
  0x33   : > { %v266_v31 = vld [vmem:[%s6757_s0 + $0x288] sm:$0xff]  ;;  %v268_v35 = vld [vmem:[%s6757_s0 + $0x298] sm:$0xff] }
  0x34   : > { %2356 = vmatpush1.bf16.msra.mxu0 %v4204_v36  ;;  %v601_v36 = vpack.c.bf16 %v233_v24, %v217_v23  ;;  %v314_v4 = vld [vmem:[%s6757_s0 + $0x408] sm:$0xff]  ;;  %v316_v6 = vld [vmem:[%s6757_s0 + $0x418] sm:$0xff] }
  0x35   : > { %2517 = vmatpush1.bf16.msra.mxu1 %v4205_v37  ;;  %2357 = vmatprep.subr.bf16.mxu0 %v4206_v38  ;;  %v603_v37 = vpack.c.bf16 %v235_v26, %v219_v25  ;;  %v4266_v38 = vld [vmem:[%s4632_s6 + $0x250] ss:$8 sps:$4 sm:$0xff]   ;;  %v330_v5 = vld [vmem:[%s6757_s0 + $0x488] sm:$0xff] }
  0x36   : > { %2518 = vmatprep.subr.bf16.mxu1 %v4208_v39  ;;  %v618_v39 = vpack.c.bf16 %v266_v31, %v250_v28  ;;  %v4287_v9 = vld [vmem:[%s4632_s6 + $0x320] ss:$8 sps:$4 sm:$0xff]   ;;  %v650_v14 = vpack.c.bf16 %v330_v5, %v314_v4  ;;  %v4301_v23 = vld [vmem:[%s4632_s6 + $0x304] ss:$8 sps:$4 sm:$0xff]   ;;  %v348_v26 = vld [vmem:[%s6757_s0 + $0x518] sm:$0xff] }
  0x37   : > { %v346_v24 = vld [vmem:[%s6757_s0 + $0x508] sm:$0xff]  ;;  %v4307_v31 = vld [vmem:[%s4632_s6 + $0x3f4] ss:$8 sps:$4 sm:$0xff]  }
  0x38   : > { %2358 = vmatpush2.bf16.msra.mxu0 %v4210_v40  ;;  %v4269_v40 = vld [vmem:[%s4632_s6 + $0x350] ss:$8 sps:$4 sm:$0xff]   ;;  %v362_v25 = vld [vmem:[%s6757_s0 + $0x588] sm:$0xff] }
  0x39   : > { %2519 = vmatpush2.bf16.msra.mxu1 %v4211_v41  ;;  %2359 = vmatprep.subr.bf16.mxu0 %v4212_v42  ;;  %v620_v41 = vpack.c.bf16 %v268_v35, %v252_v34  ;;  %v4274_v42 = vld [vmem:[%s4632_s6 + $0x244] ss:$8 sps:$4 sm:$0xff]   ;;  %v4296_v28 = vld [vmem:[%s4632_s6 + $0x200] ss:$8 sps:$4 sm:$0xff]   ;;  %v666_v34 = vpack.c.bf16 %v362_v25, %v346_v24 }
  0x3a   : > { %2520 = vmatprep.subr.bf16.mxu1 %v4214_v43  ;;  %v249_v43 = vld [vmem:[%s6757_s0 + $0x200] sm:$0xff] }
  0x3b   : > { %v4320_v4 = vld [vmem:[%s4632_s6 + $0x2c0] ss:$8 sps:$4 sm:$0xff]  }
  0x3c   : > { %2360 = vmatpush2.bf16.msra.mxu0 %v4216_v44  ;;  %v265_v44 = vld [vmem:[%s6757_s0 + $0x280] sm:$0xff] }
  0x3d   : > { %2521 = vmatpush2.bf16.msra.mxu1 %v4217_v45  ;;  %2361 = vmatprep.subr.bf16.mxu0 %v4218_v46  ;;  %v251_v45 = vld [vmem:[%s6757_s0 + $0x210] sm:$0xff]  ;;  %v4323_v5 = vld [vmem:[%s4632_s6 + $0x3c0] ss:$8 sps:$4 sm:$0xff]  }
  0x3e   : > { %2522 = vmatprep.subr.bf16.mxu1 %v4220_v47  ;;  %v267_v46 = vld [vmem:[%s6757_s0 + $0x290] sm:$0xff]  ;;  %v4277_v47 = vld [vmem:[%s4632_s6 + $0x344] ss:$8 sps:$4 sm:$0xff]   ;;  %v4332_v24 = vld [vmem:[%s4632_s6 + $0x2a0] ss:$8 sps:$4 sm:$0xff]  }
  0x3f   : > { %v4335_v25 = vld [vmem:[%s4632_s6 + $0x3a0] ss:$8 sps:$4 sm:$0xff]  }
  0x40   : > { %2362 = vmatpush2.bf16.msra.mxu0 %v4222_v48  ;;  %v4272_v48 = vld [vmem:[%s4632_s6 + $0x240] ss:$8 sps:$4 sm:$0xff]  }
  0x41   : > { %2523 = vmatpush2.bf16.msra.mxu1 %v4223_v49  ;;  %2363 = vmatprep.subr.bf16.mxu0 %v4224_v50  ;;  %v4275_v49 = vld [vmem:[%s4632_s6 + $0x340] ss:$8 sps:$4 sm:$0xff]  }
  0x42   : > { %2524 = vmatprep.subr.bf16.mxu1 %v4226_v51  ;;  %v282_v50 = vld [vmem:[%s6757_s0 + $0x308] sm:$0xff] }
  0x43   : > { %v298_v51 = vld [vmem:[%s6757_s0 + $0x388] sm:$0xff] }
  0x44   : > { %2364 = vmatpush2.bf16.msra.mxu0 %v4228_v52  ;;  %v284_v52 = vld [vmem:[%s6757_s0 + $0x318] sm:$0xff] }
  0x45   : > { %2525 = vmatpush2.bf16.msra.mxu1 %v4229_v53  ;;  %2365 = vmatprep.subr.bf16.mxu0 %v4230_v54  ;;  %v300_v53 = vld [vmem:[%s6757_s0 + $0x398] sm:$0xff] }
  0x46   : > { %2526 = vmatprep.subr.bf16.mxu1 %v4232_v55  ;;  %v4280_v54 = vld [vmem:[%s4632_s6 + $0x234] ss:$8 sps:$4 sm:$0xff]  }
  0x47   : > { %v4283_v55 = vld [vmem:[%s4632_s6 + $0x334] ss:$8 sps:$4 sm:$0xff]  }
  0x48   : > { %2366 = vmatpush2.bf16.msra.mxu0 %v4234_v56  ;;  %v617_v56 = vpack.c.bf16 %v265_v44, %v249_v43  ;;  %v4313_v43 = vld [vmem:[%s4632_s6 + $0x3e4] ss:$8 sps:$4 sm:$0xff]  }
  0x49   : > { %2527 = vmatpush2.bf16.msra.mxu1 %v4235_v57  ;;  %2367 = vmatprep.subr.bf16.mxu0 %v4236_v58  ;;  %v619_v57 = vpack.c.bf16 %v267_v46, %v251_v45  ;;  %v634_v58 = vpack.c.bf16 %v298_v51, %v282_v50  ;;  %v378_v44 = vld [vmem:[%s6757_s0 + $0x608] sm:$0xff]  ;;  %v380_v46 = vld [vmem:[%s6757_s0 + $0x618] sm:$0xff] }
  0x4a   : > { %2528 = vmatprep.subr.bf16.mxu1 %v4238_v59  ;;  %v636_v59 = vpack.c.bf16 %v300_v53, %v284_v52  ;;  %v394_v45 = vld [vmem:[%s6757_s0 + $0x688] sm:$0xff]  ;;  %v4316_v50 = vld [vmem:[%s4632_s6 + $0x2d4] ss:$8 sps:$4 sm:$0xff]  }
  0x4b   : > { %v4319_v51 = vld [vmem:[%s4632_s6 + $0x3d4] ss:$8 sps:$4 sm:$0xff]  }
  0x4c   : > { %2368 = vmatpush2.bf16.msra.mxu0 %v4240_v60  ;;  %v4278_v60 = vld [vmem:[%s4632_s6 + $0x230] ss:$8 sps:$4 sm:$0xff]  }
  0x4d   : > { %2529 = vmatpush2.bf16.msra.mxu1 %v4241_v61  ;;  %2369 = vmatprep.subr.bf16.mxu0 %v4242_v62  ;;  %v4281_v61 = vld [vmem:[%s4632_s6 + $0x330] ss:$8 sps:$4 sm:$0xff]   ;;  %v4286_v62 = vld [vmem:[%s4632_s6 + $0x224] ss:$8 sps:$4 sm:$0xff]  }
  0x4e   : > { %2530 = vmatprep.subr.bf16.mxu1 %v4244_v63  ;;  %v281_v63 = vld [vmem:[%s6757_s0 + $0x300] sm:$0xff] }
  0x50   : > { %2370 = vmatpush2.bf16.msra.mxu0 %v4246_v0  ;;  %v297_v0 = vld [vmem:[%s6757_s0 + $0x380] sm:$0xff] }
  0x51   : > { %2531 = vmatpush2.bf16.msra.mxu1 %v4247_v1  ;;  %2371 = vmatprep.subr.bf16.mxu0 %v4248_v2  ;;  %v283_v1 = vld [vmem:[%s6757_s0 + $0x310] sm:$0xff]  ;;  %v4289_v2 = vld [vmem:[%s4632_s6 + $0x324] ss:$8 sps:$4 sm:$0xff]   ;;  %v633_v12 = vpack.c.bf16 %v297_v0, %v281_v63 }
  0x52   : > { %2532 = vmatprep.subr.bf16.mxu1 %v4250_v3  ;;  %v299_v3 = vld [vmem:[%s6757_s0 + $0x390] sm:$0xff]  ;;  %v4325_v63 = vld [vmem:[%s4632_s6 + $0x3c4] ss:$8 sps:$4 sm:$0xff]  }
  0x53   : > { %v635_v13 = vpack.c.bf16 %v299_v3, %v283_v1  ;;  %v410_v0 = vld [vmem:[%s6757_s0 + $0x708] sm:$0xff]  ;;  %v428_v3 = vld [vmem:[%s6757_s0 + $0x798] sm:$0xff] }
  0x54   : > { %2372 = vmatpush2.bf16.msra.mxu0 %v4252_v7  ;;  %v332_v7 = vld [vmem:[%s6757_s0 + $0x498] sm:$0xff]  ;;  %v426_v1 = vld [vmem:[%s6757_s0 + $0x788] sm:$0xff] }
  0x55   : > { %2533 = vmatpush2.bf16.msra.mxu1 %v4253_v8  ;;  %2663 = vmatprep.subr.bf16.mxu0 %v4256_v10  ;;  %v4284_v8 = vld [vmem:[%s4632_s6 + $0x220] ss:$8 sps:$4 sm:$0xff]   ;;  %v4292_v10 = vld [vmem:[%s4632_s6 + $0x214] ss:$8 sps:$4 sm:$0xff]   ;;  %v652_v15 = vpack.c.bf16 %v332_v7, %v316_v6 }
  0x56   : > { %2824 = vmatprep.subr.bf16.mxu1 %v4259_v11  ;;  %v4295_v11 = vld [vmem:[%s4632_s6 + $0x314] ss:$8 sps:$4 sm:$0xff]  }
  0x57   : > { %2374 = vmatmul.mubr.bf16.vlgmr.msra.gmra.mxu0 %v585_v16  ;;  %v4290_v16 = vld [vmem:[%s4632_s6 + $0x210] ss:$8 sps:$4 sm:$0xff]   ;;  %v4328_v6 = vld [vmem:[%s4632_s6 + $0x2b4] ss:$8 sps:$4 sm:$0xff]  }
  0x58   : > { %2535 = vmatmul.mubr.bf16.vlgmr.msra.gmra.mxu1 %v587_v17  ;;  %2664 = vmatpush1.bf16.msra.mxu0 %v4254_v18  ;;  %v4293_v17 = vld [vmem:[%s4632_s6 + $0x310] ss:$8 sps:$4 sm:$0xff]   ;;  %v313_v18 = vld [vmem:[%s6757_s0 + $0x400] sm:$0xff]  ;;  %v4331_v7 = vld [vmem:[%s4632_s6 + $0x3b4] ss:$8 sps:$4 sm:$0xff]  }
  0x59   : > { %2825 = vmatpush1.bf16.msra.mxu1 %v4257_v19  ;;  %2383 = vmatprep.mubr.bf16.mxu0 %v602_v20  ;;  %v329_v19 = vld [vmem:[%s6757_s0 + $0x480] sm:$0xff]  ;;  %v315_v20 = vld [vmem:[%s6757_s0 + $0x410] sm:$0xff] }
  0x5a   : > { %2544 = vmatprep.mubr.bf16.mxu1 %v604_v21  ;;  %2665 = vmatprep.subr.bf16.mxu0 %v4262_v22  ;;  %v331_v21 = vld [vmem:[%s6757_s0 + $0x490] sm:$0xff]  ;;  %v4298_v22 = vld [vmem:[%s4632_s6 + $0x204] ss:$8 sps:$4 sm:$0xff]  }
  0x5b   : > { %2826 = vmatprep.subr.bf16.mxu1 %v4265_v27  ;;  %v364_v27 = vld [vmem:[%s6757_s0 + $0x598] sm:$0xff] }
  0x5c   : > { %2666 = vmatpush1.bf16.msra.mxu0 %v4260_v29  ;;  %v4299_v29 = vld [vmem:[%s4632_s6 + $0x300] ss:$8 sps:$4 sm:$0xff]   ;;  %v668_v35 = vpack.c.bf16 %v364_v27, %v348_v26  ;;  %v4340_v26 = vld [vmem:[%s4632_s6 + $0x294] ss:$8 sps:$4 sm:$0xff]  }
  0x5d   : > { %2827 = vmatpush1.bf16.msra.mxu1 %v4263_v30  ;;  %2667 = vmatprep.subr.bf16.mxu0 %v4268_v32  ;;  %v4304_v30 = vld [vmem:[%s4632_s6 + $0x2f4] ss:$8 sps:$4 sm:$0xff]   ;;  %v649_v32 = vpack.c.bf16 %v329_v19, %v313_v18  ;;  %v4334_v18 = vld [vmem:[%s4632_s6 + $0x2a4] ss:$8 sps:$4 sm:$0xff]  }
  0x5e   : > { %2828 = vmatprep.subr.bf16.mxu1 %v4271_v33  ;;  %v651_v33 = vpack.c.bf16 %v331_v21, %v315_v20  ;;  %v4337_v19 = vld [vmem:[%s4632_s6 + $0x3a4] ss:$8 sps:$4 sm:$0xff]   ;;  %v4343_v27 = vld [vmem:[%s4632_s6 + $0x394] ss:$8 sps:$4 sm:$0xff]  }
  0x5f   : > { %2384 = vmatmul.mubr.bf16.gmra.mxu0 %v601_v36  ;;  %v4302_v36 = vld [vmem:[%s4632_s6 + $0x2f0] ss:$8 sps:$4 sm:$0xff]   ;;  %v442_v20 = vld [vmem:[%s6757_s0 + $0x808] sm:$0xff] }
  0x60   : > { %2545 = vmatmul.mubr.bf16.gmra.mxu1 %v603_v37  ;;  %2668 = vmatpush1.bf16.msra.mxu0 %v4266_v38  ;;  %v4305_v37 = vld [vmem:[%s4632_s6 + $0x3f0] ss:$8 sps:$4 sm:$0xff]   ;;  %v4310_v38 = vld [vmem:[%s4632_s6 + $0x2e4] ss:$8 sps:$4 sm:$0xff]  }
  0x61   : > { %2393 = vmatprep.mubr.bf16.mxu0 %v618_v39  ;;  %2554 = vmatprep.mubr.bf16.mxu1 %v620_v41  ;;  %v345_v39 = vld [vmem:[%s6757_s0 + $0x500] sm:$0xff]  ;;  %v347_v41 = vld [vmem:[%s6757_s0 + $0x510] sm:$0xff]  ;;  %v458_v21 = vld [vmem:[%s6757_s0 + $0x888] sm:$0xff] }
  0x62   : > { %2829 = vmatpush1.bf16.msra.mxu1 %v4269_v40  ;;  %2669 = vmatprep.subr.bf16.mxu0 %v4274_v42  ;;  %v361_v40 = vld [vmem:[%s6757_s0 + $0x580] sm:$0xff]  ;;  %v363_v42 = vld [vmem:[%s6757_s0 + $0x590] sm:$0xff] }
  0x63   : > { %2830 = vmatprep.subr.bf16.mxu1 %v4277_v47  ;;  %v396_v47 = vld [vmem:[%s6757_s0 + $0x698] sm:$0xff]  ;;  %v665_v52 = vpack.c.bf16 %v361_v40, %v345_v39  ;;  %v667_v53 = vpack.c.bf16 %v363_v42, %v347_v41  ;;  %v4349_v39 = vld [vmem:[%s4632_s6 + $0x384] ss:$8 sps:$4 sm:$0xff]  }
  0x64   : > { %2670 = vmatpush1.bf16.msra.mxu0 %v4272_v48  ;;  %v4308_v48 = vld [vmem:[%s4632_s6 + $0x2e0] ss:$8 sps:$4 sm:$0xff]   ;;  %v476_v42 = vld [vmem:[%s6757_s0 + $0x918] sm:$0xff] }
  0x65   : > { %2671 = vmatprep.subr.bf16.mxu0 %v4280_v54  ;;  %v682_v54 = vpack.c.bf16 %v394_v45, %v378_v44  ;;  %v474_v40 = vld [vmem:[%s6757_s0 + $0x908] sm:$0xff] }
  0x66   : > { %2831 = vmatpush1.bf16.msra.mxu1 %v4275_v49  ;;  %v4311_v49 = vld [vmem:[%s4632_s6 + $0x3e0] ss:$8 sps:$4 sm:$0xff]  }
  0x67   : > { %2832 = vmatprep.subr.bf16.mxu1 %v4283_v55  ;;  %2394 = vmatmul.mubr.bf16.gmra.mxu0 %v617_v56  ;;  %v684_v55 = vpack.c.bf16 %v396_v47, %v380_v46  ;;  %v4314_v56 = vld [vmem:[%s4632_s6 + $0x2d0] ss:$8 sps:$4 sm:$0xff]   ;;  %v490_v41 = vld [vmem:[%s6757_s0 + $0x988] sm:$0xff]  ;;  %v4352_v46 = vld [vmem:[%s4632_s6 + $0x474] ss:$8 sps:$4 sm:$0xff]  }
  0x68   : > { %2555 = vmatmul.mubr.bf16.gmra.mxu1 %v619_v57  ;;  %2403 = vmatprep.mubr.bf16.mxu0 %v634_v58  ;;  %v4317_v57 = vld [vmem:[%s4632_s6 + $0x3d0] ss:$8 sps:$4 sm:$0xff]   ;;  %v4322_v58 = vld [vmem:[%s4632_s6 + $0x2c4] ss:$8 sps:$4 sm:$0xff]   ;;  %v4344_v44 = vld [vmem:[%s4632_s6 + $0x280] ss:$8 sps:$4 sm:$0xff]  }
  0x69   : > { %2564 = vmatprep.mubr.bf16.mxu1 %v636_v59  ;;  %2672 = vmatpush1.bf16.msra.mxu0 %v4278_v60  ;;  %v377_v59 = vld [vmem:[%s6757_s0 + $0x600] sm:$0xff]  ;;  %v4355_v47 = vld [vmem:[%s4632_s6 + $0x574] ss:$8 sps:$4 sm:$0xff]  }
  0x6a   : > { %2833 = vmatpush1.bf16.msra.mxu1 %v4281_v61  ;;  %2673 = vmatprep.subr.bf16.mxu0 %v4286_v62  ;;  %v393_v60 = vld [vmem:[%s6757_s0 + $0x680] sm:$0xff]  ;;  %v379_v61 = vld [vmem:[%s6757_s0 + $0x610] sm:$0xff] }
  0x6b   : > { %2834 = vmatprep.subr.bf16.mxu1 %v4289_v2  ;;  %v395_v62 = vld [vmem:[%s6757_s0 + $0x690] sm:$0xff]  ;;  %v412_v2 = vld [vmem:[%s6757_s0 + $0x718] sm:$0xff]  ;;  %v4347_v45 = vld [vmem:[%s4632_s6 + $0x380] ss:$8 sps:$4 sm:$0xff]  }
  0x6d   : > { %2674 = vmatpush1.bf16.msra.mxu0 %v4284_v8  ;;  %v681_v8 = vpack.c.bf16 %v393_v60, %v377_v59  ;;  %v524_v59 = vld [vmem:[%s6757_s0 + $0xa98] sm:$0xff] }
  0x6e   : > { %2835 = vmatpush1.bf16.msra.mxu1 %v4287_v9  ;;  %2675 = vmatprep.subr.bf16.mxu0 %v4292_v10  ;;  %v683_v9 = vpack.c.bf16 %v395_v62, %v379_v61  ;;  %v698_v10 = vpack.c.bf16 %v426_v1, %v410_v0  ;;  %v505_v0 = vld [vmem:[%s6757_s0 + $0xa00] sm:$0xff] }
  0x6f   : > { %2836 = vmatprep.subr.bf16.mxu1 %v4295_v11  ;;  %2404 = vmatmul.mubr.bf16.gmra.mxu0 %v633_v12  ;;  %v700_v11 = vpack.c.bf16 %v428_v3, %v412_v2  ;;  %v4326_v12 = vld [vmem:[%s4632_s6 + $0x2b0] ss:$8 sps:$4 sm:$0xff]   ;;  %v521_v1 = vld [vmem:[%s6757_s0 + $0xa80] sm:$0xff] }
  0x70   : > { %2565 = vmatmul.mubr.bf16.gmra.mxu1 %v635_v13  ;;  %2413 = vmatprep.mubr.bf16.mxu0 %v650_v14  ;;  %v4329_v13 = vld [vmem:[%s4632_s6 + $0x3b0] ss:$8 sps:$4 sm:$0xff]   ;;  %v409_v14 = vld [vmem:[%s6757_s0 + $0x700] sm:$0xff] }
  0x71   : > { %2574 = vmatprep.mubr.bf16.mxu1 %v652_v15  ;;  %2676 = vmatpush1.bf16.msra.mxu0 %v4290_v16  ;;  %v425_v15 = vld [vmem:[%s6757_s0 + $0x780] sm:$0xff]  ;;  %v411_v16 = vld [vmem:[%s6757_s0 + $0x710] sm:$0xff] }
  0x72   : > { %2837 = vmatpush1.bf16.msra.mxu1 %v4293_v17  ;;  %2677 = vmatprep.subr.bf16.mxu0 %v4298_v22  ;;  %v427_v17 = vld [vmem:[%s6757_s0 + $0x790] sm:$0xff]  ;;  %v444_v22 = vld [vmem:[%s6757_s0 + $0x818] sm:$0xff] }
  0x73   : > { %2838 = vmatprep.subr.bf16.mxu1 %v4301_v23  ;;  %v460_v23 = vld [vmem:[%s6757_s0 + $0x898] sm:$0xff]  ;;  %v507_v2 = vld [vmem:[%s6757_s0 + $0xa10] sm:$0xff] }
  0x74   : > { %v523_v3 = vld [vmem:[%s6757_s0 + $0xa90] sm:$0xff] }
  0x75   : > { %2678 = vmatpush1.bf16.msra.mxu0 %v4296_v28  ;;  %v697_v28 = vpack.c.bf16 %v425_v15, %v409_v14  ;;  %v539_v14 = vld [vmem:[%s6757_s0 + $0xb10] sm:$0xff] }
  0x76   : > { %2839 = vmatpush1.bf16.msra.mxu1 %v4299_v29  ;;  %2679 = vmatprep.subr.bf16.mxu0 %v4304_v30  ;;  %v699_v29 = vpack.c.bf16 %v427_v17, %v411_v16  ;;  %v714_v30 = vpack.c.bf16 %v458_v21, %v442_v20  ;;  %v555_v15 = vld [vmem:[%s6757_s0 + $0xb90] sm:$0xff]  ;;  %v570_v16 = vld [vmem:[%s6757_s0 + $0xc08] sm:$0xf]  ;;  %v572_v17 = vld [vmem:[%s6757_s0 + $0xc18] sm:$0xf] }
  0x77   : > { %2840 = vmatprep.subr.bf16.mxu1 %v4307_v31  ;;  %2414 = vmatmul.mubr.bf16.gmra.mxu0 %v649_v32  ;;  %v716_v31 = vpack.c.bf16 %v460_v23, %v444_v22  ;;  %v4338_v32 = vld [vmem:[%s4632_s6 + $0x290] ss:$8 sps:$4 sm:$0xff]   ;;  %v778_v20 = vpack.c.bf16 %v570_v16, %v570_v16  ;;  %v780_v21 = vpack.c.bf16 %v572_v17, %v572_v17  ;;  %v569_v22 = vld [vmem:[%s6757_s0 + $0xc00] sm:$0xf] }
  0x78   : > { %2575 = vmatmul.mubr.bf16.gmra.mxu1 %v651_v33  ;;  %2423 = vmatprep.mubr.bf16.mxu0 %v666_v34  ;;  %v4341_v33 = vld [vmem:[%s4632_s6 + $0x390] ss:$8 sps:$4 sm:$0xff]   ;;  %v4346_v34 = vld [vmem:[%s4632_s6 + $0x284] ss:$8 sps:$4 sm:$0xff]  }
  0x79   : > { %2584 = vmatprep.mubr.bf16.mxu1 %v668_v35  ;;  %2680 = vmatpush2.bf16.msra.mxu0 %v4302_v36  ;;  %v441_v35 = vld [vmem:[%s6757_s0 + $0x800] sm:$0xff]  ;;  %v571_v23 = vld [vmem:[%s6757_s0 + $0xc10] sm:$0xf] }
  0x7a   : > { %2841 = vmatpush2.bf16.msra.mxu1 %v4305_v37  ;;  %2681 = vmatprep.subr.bf16.mxu0 %v4310_v38  ;;  %v457_v36 = vld [vmem:[%s6757_s0 + $0x880] sm:$0xff]  ;;  %v443_v37 = vld [vmem:[%s6757_s0 + $0x810] sm:$0xff] }
  0x7b   : > { %2842 = vmatprep.subr.bf16.mxu1 %v4313_v43  ;;  %v459_v38 = vld [vmem:[%s6757_s0 + $0x890] sm:$0xff]  ;;  %v492_v43 = vld [vmem:[%s6757_s0 + $0x998] sm:$0xff] }
  0x7d   : > { %2682 = vmatpush2.bf16.msra.mxu0 %v4308_v48  ;;  %v713_v48 = vpack.c.bf16 %v457_v36, %v441_v35  ;;  %v207_v35 = vld [vmem:[%s6757_s0 + $0xb0] sm:$0xff]  ;;  %v222_v36 = vld [vmem:[%s6757_s0 + $0x128] sm:$0xff] }
  0x7e   : > { %2843 = vmatpush2.bf16.msra.mxu1 %v4311_v49  ;;  %2683 = vmatprep.subr.bf16.mxu0 %v4316_v50  ;;  %v715_v49 = vpack.c.bf16 %v459_v38, %v443_v37  ;;  %v730_v50 = vpack.c.bf16 %v490_v41, %v474_v40  ;;  %v238_v37 = vld [vmem:[%s6757_s0 + $0x1a8] sm:$0xff]  ;;  %v224_v38 = vld [vmem:[%s6757_s0 + $0x138] sm:$0xff] }
  0x7f   : > { %2844 = vmatprep.subr.bf16.mxu1 %v4319_v51  ;;  %2424 = vmatmul.mubr.bf16.gmra.mxu0 %v665_v52  ;;  %v732_v51 = vpack.c.bf16 %v492_v43, %v476_v42  ;;  %v473_v52 = vld [vmem:[%s6757_s0 + $0x900] sm:$0xff]  ;;  %v4350_v42 = vld [vmem:[%s4632_s6 + $0x470] ss:$8 sps:$4 sm:$0xff]  }
  0x80   : > { %2585 = vmatmul.mubr.bf16.gmra.mxu1 %v667_v53  ;;  %2433 = vmatprep.mubr.bf16.mxu0 %v682_v54  ;;  %v489_v53 = vld [vmem:[%s6757_s0 + $0x980] sm:$0xff]  ;;  %v475_v54 = vld [vmem:[%s6757_s0 + $0x910] sm:$0xff] }
  0x81   : > { %2594 = vmatprep.mubr.bf16.mxu1 %v684_v55  ;;  %2684 = vmatpush2.bf16.msra.mxu0 %v4314_v56  ;;  %v491_v55 = vld [vmem:[%s6757_s0 + $0x990] sm:$0xff]  ;;  %v506_v56 = vld [vmem:[%s6757_s0 + $0xa08] sm:$0xff]  ;;  %v729_v60 = vpack.c.bf16 %v489_v53, %v473_v52 }
  0x82   : > { %2845 = vmatpush2.bf16.msra.mxu1 %v4317_v57  ;;  %2685 = vmatprep.subr.bf16.mxu0 %v4322_v58  ;;  %v522_v57 = vld [vmem:[%s6757_s0 + $0xa88] sm:$0xff]  ;;  %v508_v58 = vld [vmem:[%s6757_s0 + $0xa18] sm:$0xff]  ;;  %v731_v61 = vpack.c.bf16 %v491_v55, %v475_v54  ;;  %v239_v52 = vld [vmem:[%s6757_s0 + $0x1b0] sm:$0xff] }
  0x83   : > { %2846 = vmatprep.subr.bf16.mxu1 %v4325_v63  ;;  %v746_v62 = vpack.c.bf16 %v522_v57, %v506_v56  ;;  %v748_v63 = vpack.c.bf16 %v524_v59, %v508_v58  ;;  %v4353_v43 = vld [vmem:[%s4632_s6 + $0x570] ss:$8 sps:$4 sm:$0xff]   ;;  %v4359_v53 = vld [vmem:[%s4632_s6 + $0x560] ss:$8 sps:$4 sm:$0xff]   ;;  %v4364_v54 = vld [vmem:[%s4632_s6 + $0x454] ss:$8 sps:$4 sm:$0xff]  }
  0x84   : > { %v4367_v55 = vld [vmem:[%s4632_s6 + $0x554] ss:$8 sps:$4 sm:$0xff]   ;;  %v254_v56 = vld [vmem:[%s6757_s0 + $0x228] sm:$0xff] }
  0x85   : > { %2686 = vmatpush2.bf16.msra.mxu0 %v4320_v4  ;;  %v538_v4 = vld [vmem:[%s6757_s0 + $0xb08] sm:$0xff]  ;;  %v256_v58 = vld [vmem:[%s6757_s0 + $0x238] sm:$0xff] }
  0x86   : > { %2847 = vmatpush2.bf16.msra.mxu1 %v4323_v5  ;;  %2687 = vmatprep.subr.bf16.mxu0 %v4328_v6  ;;  %v554_v5 = vld [vmem:[%s6757_s0 + $0xb88] sm:$0xff]  ;;  %v540_v6 = vld [vmem:[%s6757_s0 + $0xb18] sm:$0xff] }
  0x87   : > { %2848 = vmatprep.subr.bf16.mxu1 %v4331_v7  ;;  %2434 = vmatmul.mubr.bf16.gmra.mxu0 %v681_v8  ;;  %v556_v7 = vld [vmem:[%s6757_s0 + $0xb98] sm:$0xff]  ;;  %v745_v8 = vpack.c.bf16 %v521_v1, %v505_v0  ;;  %v270_v57 = vld [vmem:[%s6757_s0 + $0x2a8] sm:$0xff] }
  0x88   : > { %2595 = vmatmul.mubr.bf16.gmra.mxu1 %v683_v9  ;;  %2443 = vmatprep.mubr.bf16.mxu0 %v698_v10  ;;  %v747_v9 = vpack.c.bf16 %v523_v3, %v507_v2  ;;  %v762_v10 = vpack.c.bf16 %v554_v5, %v538_v4  ;;  %v272_v59 = vld [vmem:[%s6757_s0 + $0x2b8] sm:$0xff]  ;;  %v4370_v2 = vld [vmem:[%s4632_s6 + $0x444] ss:$8 sps:$4 sm:$0xff]  }
  0x89   : > { %2604 = vmatprep.mubr.bf16.mxu1 %v700_v11  ;;  %2688 = vmatpush2.bf16.msra.mxu0 %v4326_v12  ;;  %v764_v11 = vpack.c.bf16 %v556_v7, %v540_v6  ;;  %v537_v12 = vld [vmem:[%s6757_s0 + $0xb00] sm:$0xff]  ;;  %v4365_v0 = vld [vmem:[%s4632_s6 + $0x550] ss:$8 sps:$4 sm:$0xff]   ;;  %v624_v1 = vpack.c.bf16 %v272_v59, %v256_v58 }
  0x8a   : > { %2849 = vmatpush2.bf16.msra.mxu1 %v4329_v13  ;;  %2689 = vmatprep.subr.bf16.mxu0 %v4334_v18  ;;  %v553_v13 = vld [vmem:[%s6757_s0 + $0xb80] sm:$0xff]  ;;  %v255_v6 = vld [vmem:[%s6757_s0 + $0x230] sm:$0xff] }
  0x8b   : > { %2850 = vmatprep.subr.bf16.mxu1 %v4337_v19  ;;  %v761_v18 = vpack.c.bf16 %v553_v13, %v537_v12  ;;  %v763_v19 = vpack.c.bf16 %v555_v15, %v539_v14  ;;  %v253_v3 = vld [vmem:[%s6757_s0 + $0x220] sm:$0xff]  ;;  %v271_v7 = vld [vmem:[%s6757_s0 + $0x2b0] sm:$0xff]  ;;  %v288_v12 = vld [vmem:[%s6757_s0 + $0x338] sm:$0xff] }
  0x8c   : > { %v269_v4 = vld [vmem:[%s6757_s0 + $0x2a0] sm:$0xff]  ;;  %v304_v13 = vld [vmem:[%s6757_s0 + $0x3b8] sm:$0xff]  ;;  %v623_v17 = vpack.c.bf16 %v271_v7, %v255_v6 }
  0x8d   : > { %2690 = vmatpush2.bf16.msra.mxu0 %v4332_v24  ;;  %v190_v24 = vld [vmem:[%s6757_s0 + $0x28] sm:$0xff]  ;;  %v4376_v14 = vld [vmem:[%s4632_s6 + $0x434] ss:$8 sps:$4 sm:$0xff]   ;;  %v621_v16 = vpack.c.bf16 %v269_v4, %v253_v3 }
  0x8e   : > { %2851 = vmatpush2.bf16.msra.mxu1 %v4335_v25  ;;  %2691 = vmatprep.subr.bf16.mxu0 %v4340_v26  ;;  %v206_v25 = vld [vmem:[%s6757_s0 + $0xa8] sm:$0xff]  ;;  %v192_v26 = vld [vmem:[%s6757_s0 + $0x38] sm:$0xff] }
  0x8f   : > { %2852 = vmatprep.subr.bf16.mxu1 %v4343_v27  ;;  %2444 = vmatmul.mubr.bf16.gmra.mxu0 %v697_v28  ;;  %v208_v27 = vld [vmem:[%s6757_s0 + $0xb8] sm:$0xff]  ;;  %v777_v28 = vpack.c.bf16 %v569_v22, %v569_v22  ;;  %v4373_v5 = vld [vmem:[%s4632_s6 + $0x544] ss:$8 sps:$4 sm:$0xff]  }
  0x90   : > { %2605 = vmatmul.mubr.bf16.gmra.mxu1 %v699_v29  ;;  %2453 = vmatprep.mubr.bf16.mxu0 %v714_v30  ;;  %v779_v29 = vpack.c.bf16 %v571_v23, %v571_v23  ;;  %v590_v30 = vpack.c.bf16 %v206_v25, %v190_v24  ;;  %v4379_v15 = vld [vmem:[%s4632_s6 + $0x534] ss:$8 sps:$4 sm:$0xff]   ;;  %v4382_v22 = vld [vmem:[%s4632_s6 + $0x424] ss:$8 sps:$4 sm:$0xff]  }
  0x91   : > { %2614 = vmatprep.mubr.bf16.mxu1 %v716_v31  ;;  %2692 = vmatpush2.bf16.msra.mxu0 %v4338_v32  ;;  %v592_v31 = vpack.c.bf16 %v208_v27, %v192_v26  ;;  %v189_v32 = vld [vmem:[%s6757_s0 + $0x20] sm:$0xff]  ;;  %v287_v25 = vld [vmem:[%s6757_s0 + $0x330] sm:$0xff]  ;;  %v382_v4 = vld [vmem:[%s6757_s0 + $0x628] sm:$0xff] }
  0x92   : > { %2853 = vmatpush2.bf16.msra.mxu1 %v4341_v33  ;;  %2693 = vmatprep.subr.bf16.mxu0 %v4346_v34  ;;  %v205_v33 = vld [vmem:[%s6757_s0 + $0xa0] sm:$0xff]  ;;  %v191_v34 = vld [vmem:[%s6757_s0 + $0x30] sm:$0xff]  ;;  %v384_v6 = vld [vmem:[%s6757_s0 + $0x638] sm:$0xff] }
  0x93   : > { %2854 = vmatprep.subr.bf16.mxu1 %v4349_v39  ;;  %v240_v39 = vld [vmem:[%s6757_s0 + $0x1b8] sm:$0xff]  ;;  %v589_v40 = vpack.c.bf16 %v205_v33, %v189_v32  ;;  %v591_v41 = vpack.c.bf16 %v207_v35, %v191_v34  ;;  %v285_v23 = vld [vmem:[%s6757_s0 + $0x320] sm:$0xff]  ;;  %v303_v27 = vld [vmem:[%s6757_s0 + $0x3b0] sm:$0xff] }
  0x94   : > { %v301_v24 = vld [vmem:[%s6757_s0 + $0x3a0] sm:$0xff]  ;;  %v4388_v34 = vld [vmem:[%s4632_s6 + $0x414] ss:$8 sps:$4 sm:$0xff]  }
  0x95   : > { %2694 = vmatpush2.bf16.msra.mxu0 %v4344_v44  ;;  %v606_v44 = vpack.c.bf16 %v238_v37, %v222_v36  ;;  %v4385_v26 = vld [vmem:[%s4632_s6 + $0x524] ss:$8 sps:$4 sm:$0xff]   ;;  %v4380_v32 = vld [vmem:[%s4632_s6 + $0x420] ss:$8 sps:$4 sm:$0xff]   ;;  %v4391_v35 = vld [vmem:[%s4632_s6 + $0x514] ss:$8 sps:$4 sm:$0xff]   ;;  %v637_v36 = vpack.c.bf16 %v301_v24, %v285_v23  ;;  %v639_v37 = vpack.c.bf16 %v303_v27, %v287_v25 }
  0x96   : > { %2855 = vmatpush2.bf16.msra.mxu1 %v4347_v45  ;;  %2985 = vmatprep.subr.bf16.mxu0 %v4352_v46  ;;  %v608_v45 = vpack.c.bf16 %v240_v39, %v224_v38  ;;  %v4358_v46 = vld [vmem:[%s4632_s6 + $0x464] ss:$8 sps:$4 sm:$0xff]   ;;  %v4383_v33 = vld [vmem:[%s4632_s6 + $0x520] ss:$8 sps:$4 sm:$0xff]   ;;  %v400_v7 = vld [vmem:[%s6757_s0 + $0x6b8] sm:$0xff] }
  0x97   : > { %3146 = vmatprep.subr.bf16.mxu1 %v4355_v47  ;;  %2454 = vmatmul.mubr.bf16.gmra.mxu0 %v713_v48  ;;  %v4356_v47 = vld [vmem:[%s4632_s6 + $0x460] ss:$8 sps:$4 sm:$0xff]   ;;  %v4409_v3 = vld [vmem:[%s4632_s6 + $0x5e4] ss:$8 sps:$4 sm:$0xff]   ;;  %v399_v23 = vld [vmem:[%s6757_s0 + $0x6b0] sm:$0xff] }
  0x98   : > { %2615 = vmatmul.mubr.bf16.gmra.mxu1 %v715_v49  ;;  %2463 = vmatprep.mubr.bf16.mxu0 %v730_v50  ;;  %v221_v48 = vld [vmem:[%s6757_s0 + $0x120] sm:$0xff]  ;;  %v223_v50 = vld [vmem:[%s6757_s0 + $0x130] sm:$0xff]  ;;  %v414_v24 = vld [vmem:[%s6757_s0 + $0x728] sm:$0xff] }
  0x99   : > { %2624 = vmatprep.mubr.bf16.mxu1 %v732_v51  ;;  %v237_v49 = vld [vmem:[%s6757_s0 + $0x1a0] sm:$0xff]  ;;  %v430_v25 = vld [vmem:[%s6757_s0 + $0x7a8] sm:$0xff]  ;;  %v432_v27 = vld [vmem:[%s6757_s0 + $0x7b8] sm:$0xff] }
  0x9a   : > { %v4361_v51 = vld [vmem:[%s4632_s6 + $0x564] ss:$8 sps:$4 sm:$0xff]  }
  0x9f   : > { %2464 = vmatmul.mubr.bf16.gmra.mxu0 %v729_v60  ;;  %v605_v60 = vpack.c.bf16 %v237_v49, %v221_v48  ;;  %v350_v48 = vld [vmem:[%s6757_s0 + $0x528] sm:$0xff] }
  0xa0   : > { %2625 = vmatmul.mubr.bf16.gmra.mxu1 %v731_v61  ;;  %2473 = vmatprep.mubr.bf16.mxu0 %v746_v62  ;;  %v607_v61 = vpack.c.bf16 %v239_v52, %v223_v50  ;;  %v4362_v62 = vld [vmem:[%s4632_s6 + $0x450] ss:$8 sps:$4 sm:$0xff]   ;;  %v366_v49 = vld [vmem:[%s6757_s0 + $0x5a8] sm:$0xff] }
  0xa1   : > { %2634 = vmatprep.mubr.bf16.mxu1 %v748_v63  ;;  %v622_v63 = vpack.c.bf16 %v270_v57, %v254_v56  ;;  %v352_v50 = vld [vmem:[%s6757_s0 + $0x538] sm:$0xff]  ;;  %v4392_v52 = vld [vmem:[%s4632_s6 + $0x400] ss:$8 sps:$4 sm:$0xff]   ;;  %v670_v58 = vpack.c.bf16 %v366_v49, %v350_v48 }
  0xa2   : > { %v4428_v48 = vld [vmem:[%s4632_s6 + $0x4a0] ss:$8 sps:$4 sm:$0xff]  }
  0xa3   : > { %v4431_v49 = vld [vmem:[%s4632_s6 + $0x5a0] ss:$8 sps:$4 sm:$0xff]  }
  0xa7   : > { %2474 = vmatmul.mubr.bf16.gmra.mxu0 %v745_v8  ;;  %v4368_v8 = vld [vmem:[%s4632_s6 + $0x440] ss:$8 sps:$4 sm:$0xff]  }
  0xa8   : > { %2635 = vmatmul.mubr.bf16.gmra.mxu1 %v747_v9  ;;  %2483 = vmatprep.mubr.bf16.mxu0 %v762_v10  ;;  %v4371_v9 = vld [vmem:[%s4632_s6 + $0x540] ss:$8 sps:$4 sm:$0xff]  }
  0xa9   : > { %2644 = vmatprep.mubr.bf16.mxu1 %v764_v11  ;;  %v286_v10 = vld [vmem:[%s6757_s0 + $0x328] sm:$0xff] }
  0xaa   : > { %v302_v11 = vld [vmem:[%s6757_s0 + $0x3a8] sm:$0xff] }
  0xaf   : > { %2484 = vmatmul.mubr.bf16.gmra.mxu0 %v761_v18  ;;  %v638_v18 = vpack.c.bf16 %v302_v11, %v286_v10  ;;  %v4412_v10 = vld [vmem:[%s4632_s6 + $0x4d4] ss:$8 sps:$4 sm:$0xff]  }
  0xb0   : > { %2645 = vmatmul.mubr.bf16.gmra.mxu1 %v763_v19  ;;  %2493 = vmatprep.mubr.bf16.mxu0 %v778_v20  ;;  %v640_v19 = vpack.c.bf16 %v304_v13, %v288_v12  ;;  %v4374_v20 = vld [vmem:[%s4632_s6 + $0x430] ss:$8 sps:$4 sm:$0xff]   ;;  %v4415_v11 = vld [vmem:[%s4632_s6 + $0x5d4] ss:$8 sps:$4 sm:$0xff]  }
  0xb1   : > { %2654 = vmatprep.mubr.bf16.mxu1 %v780_v21  ;;  %v4377_v21 = vld [vmem:[%s4632_s6 + $0x530] ss:$8 sps:$4 sm:$0xff]  }
  0xb7   : > { %2494 = vmatmul.mubr.bf16.gmra.mxu0 %v777_v28  ;;  %v318_v28 = vld [vmem:[%s6757_s0 + $0x428] sm:$0xff] }
  0xb8   : > { %2655 = vmatmul.mubr.bf16.gmra.mxu1 %v779_v29  ;;  %2695 = vmatprep.mubr.bf16.mxu0 %v590_v30  ;;  %v334_v29 = vld [vmem:[%s6757_s0 + $0x4a8] sm:$0xff]  ;;  %v320_v30 = vld [vmem:[%s6757_s0 + $0x438] sm:$0xff] }
  0xb9   : > { %2856 = vmatprep.mubr.bf16.mxu1 %v592_v31  ;;  %v336_v31 = vld [vmem:[%s6757_s0 + $0x4b8] sm:$0xff]  ;;  %v654_v38 = vpack.c.bf16 %v334_v29, %v318_v28  ;;  %v4416_v28 = vld [vmem:[%s4632_s6 + $0x4c0] ss:$8 sps:$4 sm:$0xff]  }
  0xba   : > { %v656_v39 = vpack.c.bf16 %v336_v31, %v320_v30  ;;  %v4419_v29 = vld [vmem:[%s4632_s6 + $0x5c0] ss:$8 sps:$4 sm:$0xff]   ;;  %v4424_v30 = vld [vmem:[%s4632_s6 + $0x4b4] ss:$8 sps:$4 sm:$0xff]  }
  0xbb   : > { %v4427_v31 = vld [vmem:[%s4632_s6 + $0x5b4] ss:$8 sps:$4 sm:$0xff]  }
  0xbf   : > { %2696 = vmatmul.mubr.bf16.vlgmr.msra.gmra.mxu0 %v589_v40  ;;  %v4386_v40 = vld [vmem:[%s4632_s6 + $0x410] ss:$8 sps:$4 sm:$0xff]  }
  0xc0   : > { %2857 = vmatmul.mubr.bf16.vlgmr.msra.gmra.mxu1 %v591_v41  ;;  %2986 = vmatpush1.bf16.msra.mxu0 %v4350_v42  ;;  %v4389_v41 = vld [vmem:[%s4632_s6 + $0x510] ss:$8 sps:$4 sm:$0xff]   ;;  %v317_v42 = vld [vmem:[%s6757_s0 + $0x420] sm:$0xff] }
  0xc1   : > { %3147 = vmatpush1.bf16.msra.mxu1 %v4353_v43  ;;  %2705 = vmatprep.mubr.bf16.mxu0 %v606_v44  ;;  %v333_v43 = vld [vmem:[%s6757_s0 + $0x4a0] sm:$0xff]  ;;  %v319_v44 = vld [vmem:[%s6757_s0 + $0x430] sm:$0xff] }
  0xc2   : > { %2866 = vmatprep.mubr.bf16.mxu1 %v608_v45  ;;  %2987 = vmatprep.subr.bf16.mxu0 %v4358_v46  ;;  %v335_v45 = vld [vmem:[%s6757_s0 + $0x4b0] sm:$0xff]  ;;  %v4394_v46 = vld [vmem:[%s4632_s6 + $0x404] ss:$8 sps:$4 sm:$0xff]   ;;  %v653_v56 = vpack.c.bf16 %v333_v43, %v317_v42 }
  0xc3   : > { %3148 = vmatprep.subr.bf16.mxu1 %v4361_v51  ;;  %v368_v51 = vld [vmem:[%s6757_s0 + $0x5b8] sm:$0xff]  ;;  %v655_v57 = vpack.c.bf16 %v335_v45, %v319_v44  ;;  %v4430_v42 = vld [vmem:[%s4632_s6 + $0x4a4] ss:$8 sps:$4 sm:$0xff]  }
  0xc4   : > { %2988 = vmatpush1.bf16.msra.mxu0 %v4356_v47  ;;  %v4397_v47 = vld [vmem:[%s4632_s6 + $0x504] ss:$8 sps:$4 sm:$0xff]   ;;  %v672_v59 = vpack.c.bf16 %v368_v51, %v352_v50  ;;  %v4436_v50 = vld [vmem:[%s4632_s6 + $0x494] ss:$8 sps:$4 sm:$0xff]  }
  0xc5   : > { %3149 = vmatpush1.bf16.msra.mxu1 %v4359_v53  ;;  %2989 = vmatprep.subr.bf16.mxu0 %v4364_v54  ;;  %v4395_v53 = vld [vmem:[%s4632_s6 + $0x500] ss:$8 sps:$4 sm:$0xff]   ;;  %v4400_v54 = vld [vmem:[%s4632_s6 + $0x4f4] ss:$8 sps:$4 sm:$0xff]   ;;  %v4433_v43 = vld [vmem:[%s4632_s6 + $0x5a4] ss:$8 sps:$4 sm:$0xff]  }
  0xc6   : > { %3150 = vmatprep.subr.bf16.mxu1 %v4367_v55  ;;  %v4403_v55 = vld [vmem:[%s4632_s6 + $0x5f4] ss:$8 sps:$4 sm:$0xff]   ;;  %v446_v44 = vld [vmem:[%s6757_s0 + $0x828] sm:$0xff] }
  0xc7   : > { %2706 = vmatmul.mubr.bf16.gmra.mxu0 %v605_v60  ;;  %v4398_v60 = vld [vmem:[%s4632_s6 + $0x4f0] ss:$8 sps:$4 sm:$0xff]   ;;  %v462_v45 = vld [vmem:[%s6757_s0 + $0x8a8] sm:$0xff]  ;;  %v4439_v51 = vld [vmem:[%s4632_s6 + $0x594] ss:$8 sps:$4 sm:$0xff]  }
  0xc8   : > { %2867 = vmatmul.mubr.bf16.gmra.mxu1 %v607_v61  ;;  %2990 = vmatpush1.bf16.msra.mxu0 %v4362_v62  ;;  %v4401_v61 = vld [vmem:[%s4632_s6 + $0x5f0] ss:$8 sps:$4 sm:$0xff]   ;;  %v349_v62 = vld [vmem:[%s6757_s0 + $0x520] sm:$0xff] }
  0xc9   : > { %2715 = vmatprep.mubr.bf16.mxu0 %v622_v63  ;;  %2876 = vmatprep.mubr.bf16.mxu1 %v624_v1  ;;  %v365_v63 = vld [vmem:[%s6757_s0 + $0x5a0] sm:$0xff]  ;;  %v367_v1 = vld [vmem:[%s6757_s0 + $0x5b0] sm:$0xff] }
  0xca   : > { %3151 = vmatpush1.bf16.msra.mxu1 %v4365_v0  ;;  %2991 = vmatprep.subr.bf16.mxu0 %v4370_v2  ;;  %v351_v0 = vld [vmem:[%s6757_s0 + $0x530] sm:$0xff]  ;;  %v4406_v2 = vld [vmem:[%s4632_s6 + $0x4e4] ss:$8 sps:$4 sm:$0xff]   ;;  %v669_v12 = vpack.c.bf16 %v365_v63, %v349_v62 }
  0xcb   : > { %3152 = vmatprep.subr.bf16.mxu1 %v4373_v5  ;;  %v398_v5 = vld [vmem:[%s6757_s0 + $0x6a8] sm:$0xff]  ;;  %v671_v13 = vpack.c.bf16 %v367_v1, %v351_v0  ;;  %v463_v62 = vld [vmem:[%s6757_s0 + $0x8b0] sm:$0xff] }
  0xcc   : > { %2992 = vmatpush1.bf16.msra.mxu0 %v4368_v8  ;;  %v4404_v8 = vld [vmem:[%s4632_s6 + $0x4e0] ss:$8 sps:$4 sm:$0xff]   ;;  %v4445_v63 = vld [vmem:[%s4632_s6 + $0x584] ss:$8 sps:$4 sm:$0xff]  }
  0xcd   : > { %2993 = vmatprep.subr.bf16.mxu0 %v4376_v14  ;;  %v686_v14 = vpack.c.bf16 %v398_v5, %v382_v4  ;;  %v478_v0 = vld [vmem:[%s6757_s0 + $0x928] sm:$0xff] }
  0xce   : > { %3153 = vmatpush1.bf16.msra.mxu1 %v4371_v9  ;;  %v4407_v9 = vld [vmem:[%s4632_s6 + $0x5e0] ss:$8 sps:$4 sm:$0xff]  }
  0xcf   : > { %3154 = vmatprep.subr.bf16.mxu1 %v4379_v15  ;;  %2716 = vmatmul.mubr.bf16.gmra.mxu0 %v621_v16  ;;  %v688_v15 = vpack.c.bf16 %v400_v7, %v384_v6  ;;  %v4410_v16 = vld [vmem:[%s4632_s6 + $0x4d0] ss:$8 sps:$4 sm:$0xff]   ;;  %v494_v1 = vld [vmem:[%s6757_s0 + $0x9a8] sm:$0xff]  ;;  %v4448_v6 = vld [vmem:[%s4632_s6 + $0x674] ss:$8 sps:$4 sm:$0xff]  }
  0xd0   : > { %2877 = vmatmul.mubr.bf16.gmra.mxu1 %v623_v17  ;;  %2725 = vmatprep.mubr.bf16.mxu0 %v638_v18  ;;  %v4413_v17 = vld [vmem:[%s4632_s6 + $0x5d0] ss:$8 sps:$4 sm:$0xff]   ;;  %v4418_v18 = vld [vmem:[%s4632_s6 + $0x4c4] ss:$8 sps:$4 sm:$0xff]   ;;  %v4440_v4 = vld [vmem:[%s4632_s6 + $0x480] ss:$8 sps:$4 sm:$0xff]  }
  0xd1   : > { %2886 = vmatprep.mubr.bf16.mxu1 %v640_v19  ;;  %2994 = vmatpush1.bf16.msra.mxu0 %v4374_v20  ;;  %v381_v19 = vld [vmem:[%s6757_s0 + $0x620] sm:$0xff]  ;;  %v4451_v7 = vld [vmem:[%s4632_s6 + $0x774] ss:$8 sps:$4 sm:$0xff]  }
  0xd2   : > { %3155 = vmatpush1.bf16.msra.mxu1 %v4377_v21  ;;  %2995 = vmatprep.subr.bf16.mxu0 %v4382_v22  ;;  %v397_v20 = vld [vmem:[%s6757_s0 + $0x6a0] sm:$0xff]  ;;  %v383_v21 = vld [vmem:[%s6757_s0 + $0x630] sm:$0xff] }
  0xd3   : > { %3156 = vmatprep.subr.bf16.mxu1 %v4385_v26  ;;  %v4421_v22 = vld [vmem:[%s4632_s6 + $0x5c4] ss:$8 sps:$4 sm:$0xff]   ;;  %v416_v26 = vld [vmem:[%s6757_s0 + $0x738] sm:$0xff]  ;;  %v4443_v5 = vld [vmem:[%s4632_s6 + $0x580] ss:$8 sps:$4 sm:$0xff]  }
  0xd5   : > { %2996 = vmatpush1.bf16.msra.mxu0 %v4380_v32  ;;  %v685_v32 = vpack.c.bf16 %v397_v20, %v381_v19  ;;  %v528_v19 = vld [vmem:[%s6757_s0 + $0xab8] sm:$0xff] }
  0xd6   : > { %3157 = vmatpush1.bf16.msra.mxu1 %v4383_v33  ;;  %2997 = vmatprep.subr.bf16.mxu0 %v4388_v34  ;;  %v687_v33 = vpack.c.bf16 %v399_v23, %v383_v21  ;;  %v702_v34 = vpack.c.bf16 %v430_v25, %v414_v24  ;;  %v509_v24 = vld [vmem:[%s6757_s0 + $0xa20] sm:$0xff] }
  0xd7   : > { %3158 = vmatprep.subr.bf16.mxu1 %v4391_v35  ;;  %2726 = vmatmul.mubr.bf16.gmra.mxu0 %v637_v36  ;;  %v704_v35 = vpack.c.bf16 %v432_v27, %v416_v26  ;;  %v4422_v36 = vld [vmem:[%s4632_s6 + $0x4b0] ss:$8 sps:$4 sm:$0xff]   ;;  %v525_v25 = vld [vmem:[%s6757_s0 + $0xaa0] sm:$0xff] }
  0xd8   : > { %2887 = vmatmul.mubr.bf16.gmra.mxu1 %v639_v37  ;;  %2735 = vmatprep.mubr.bf16.mxu0 %v654_v38  ;;  %v4425_v37 = vld [vmem:[%s4632_s6 + $0x5b0] ss:$8 sps:$4 sm:$0xff]   ;;  %v413_v38 = vld [vmem:[%s6757_s0 + $0x720] sm:$0xff] }
  0xd9   : > { %2896 = vmatprep.mubr.bf16.mxu1 %v656_v39  ;;  %2998 = vmatpush1.bf16.msra.mxu0 %v4386_v40  ;;  %v429_v39 = vld [vmem:[%s6757_s0 + $0x7a0] sm:$0xff]  ;;  %v415_v40 = vld [vmem:[%s6757_s0 + $0x730] sm:$0xff] }
  0xda   : > { %3159 = vmatpush1.bf16.msra.mxu1 %v4389_v41  ;;  %2999 = vmatprep.subr.bf16.mxu0 %v4394_v46  ;;  %v431_v41 = vld [vmem:[%s6757_s0 + $0x7b0] sm:$0xff]  ;;  %v448_v46 = vld [vmem:[%s6757_s0 + $0x838] sm:$0xff] }
  0xdb   : > { %3160 = vmatprep.subr.bf16.mxu1 %v4397_v47  ;;  %v464_v47 = vld [vmem:[%s6757_s0 + $0x8b8] sm:$0xff]  ;;  %v511_v26 = vld [vmem:[%s6757_s0 + $0xa30] sm:$0xff] }
  0xdc   : > { %v527_v27 = vld [vmem:[%s6757_s0 + $0xab0] sm:$0xff] }
  0xdd   : > { %3000 = vmatpush1.bf16.msra.mxu0 %v4392_v52  ;;  %v701_v52 = vpack.c.bf16 %v429_v39, %v413_v38  ;;  %v1049_v38 = vld [vmem:[%s182_s5] sm:$0x3] }
  0xde   : > { %3161 = vmatpush1.bf16.msra.mxu1 %v4395_v53  ;;  %3001 = vmatprep.subr.bf16.mxu0 %v4400_v54  ;;  %v703_v53 = vpack.c.bf16 %v431_v41, %v415_v40  ;;  %v718_v54 = vpack.c.bf16 %v462_v45, %v446_v44  ;;  %v541_v39 = vld [vmem:[%s6757_s0 + $0xb20] sm:$0xff]  ;;  %v574_v44 = vld [vmem:[%s6757_s0 + $0xc28] sm:$0xf]  ;;  %v576_v45 = vld [vmem:[%s6757_s0 + $0xc38] sm:$0xf] }
  0xdf   : > { %3162 = vmatprep.subr.bf16.mxu1 %v4403_v55  ;;  %2736 = vmatmul.mubr.bf16.gmra.mxu0 %v653_v56  ;;  %v720_v55 = vpack.c.bf16 %v464_v47, %v448_v46  ;;  %v4434_v56 = vld [vmem:[%s4632_s6 + $0x490] ss:$8 sps:$4 sm:$0xff]   ;;  %v557_v40 = vld [vmem:[%s6757_s0 + $0xba0] sm:$0xff] }
  0xe0   : > { %2897 = vmatmul.mubr.bf16.gmra.mxu1 %v655_v57  ;;  %2745 = vmatprep.mubr.bf16.mxu0 %v670_v58  ;;  %v4437_v57 = vld [vmem:[%s4632_s6 + $0x590] ss:$8 sps:$4 sm:$0xff]   ;;  %v4442_v58 = vld [vmem:[%s4632_s6 + $0x484] ss:$8 sps:$4 sm:$0xff]   ;;  %v765_v47 = vpack.c.bf16 %v557_v40, %v541_v39 }
  0xe1   : > { %2906 = vmatprep.mubr.bf16.mxu1 %v672_v59  ;;  %3002 = vmatpush2.bf16.msra.mxu0 %v4398_v60  ;;  %v445_v59 = vld [vmem:[%s6757_s0 + $0x820] sm:$0xff] }
  0xe2   : > { %3163 = vmatpush2.bf16.msra.mxu1 %v4401_v61  ;;  %3003 = vmatprep.subr.bf16.mxu0 %v4406_v2  ;;  %v461_v60 = vld [vmem:[%s6757_s0 + $0x8a0] sm:$0xff]  ;;  %v447_v61 = vld [vmem:[%s6757_s0 + $0x830] sm:$0xff]  ;;  %v480_v2 = vld [vmem:[%s6757_s0 + $0x938] sm:$0xff] }
  0xe3   : > { %3164 = vmatprep.subr.bf16.mxu1 %v4409_v3  ;;  %v496_v3 = vld [vmem:[%s6757_s0 + $0x9b8] sm:$0xff] }
  0xe5   : > { %3004 = vmatpush2.bf16.msra.mxu0 %v4404_v8  ;;  %v717_v8 = vpack.c.bf16 %v461_v60, %v445_v59 }
  0xe6   : > { %3165 = vmatpush2.bf16.msra.mxu1 %v4407_v9  ;;  %3005 = vmatprep.subr.bf16.mxu0 %v4412_v10  ;;  %v719_v9 = vpack.c.bf16 %v463_v62, %v447_v61  ;;  %v734_v10 = vpack.c.bf16 %v494_v1, %v478_v0  ;;  %v210_v61 = vld [vmem:[%s6757_s0 + $0xc8] sm:$0xff]  ;;  %v196_v62 = vld [vmem:[%s6757_s0 + $0x58] sm:$0xff] }
  0xe7   : > { %3166 = vmatprep.subr.bf16.mxu1 %v4415_v11  ;;  %2746 = vmatmul.mubr.bf16.gmra.mxu0 %v669_v12  ;;  %v736_v11 = vpack.c.bf16 %v496_v3, %v480_v2  ;;  %v477_v12 = vld [vmem:[%s6757_s0 + $0x920] sm:$0xff] }
  0xe8   : > { %2907 = vmatmul.mubr.bf16.gmra.mxu1 %v671_v13  ;;  %2755 = vmatprep.mubr.bf16.mxu0 %v686_v14  ;;  %v493_v13 = vld [vmem:[%s6757_s0 + $0x9a0] sm:$0xff]  ;;  %v479_v14 = vld [vmem:[%s6757_s0 + $0x930] sm:$0xff] }
  0xe9   : > { %2916 = vmatprep.mubr.bf16.mxu1 %v688_v15  ;;  %3006 = vmatpush2.bf16.msra.mxu0 %v4410_v16  ;;  %v495_v15 = vld [vmem:[%s6757_s0 + $0x9b0] sm:$0xff]  ;;  %v510_v16 = vld [vmem:[%s6757_s0 + $0xa28] sm:$0xff]  ;;  %v733_v20 = vpack.c.bf16 %v493_v13, %v477_v12 }
  0xea   : > { %3167 = vmatpush2.bf16.msra.mxu1 %v4413_v17  ;;  %3007 = vmatprep.subr.bf16.mxu0 %v4418_v18  ;;  %v526_v17 = vld [vmem:[%s6757_s0 + $0xaa8] sm:$0xff]  ;;  %v512_v18 = vld [vmem:[%s6757_s0 + $0xa38] sm:$0xff]  ;;  %v735_v21 = vpack.c.bf16 %v495_v15, %v479_v14 }
  0xeb   : > { %3168 = vmatprep.subr.bf16.mxu1 %v4421_v22  ;;  %v750_v22 = vpack.c.bf16 %v526_v17, %v510_v16  ;;  %v752_v23 = vpack.c.bf16 %v528_v19, %v512_v18  ;;  %v193_v16 = vld [vmem:[%s6757_s0 + $0x40] sm:$0xff] }
  0xec   : > { %v209_v19 = vld [vmem:[%s6757_s0 + $0xc0] sm:$0xff] }
  0xed   : > { %3008 = vmatpush2.bf16.msra.mxu0 %v4416_v28  ;;  %v542_v28 = vld [vmem:[%s6757_s0 + $0xb28] sm:$0xff] }
  0xee   : > { %3169 = vmatpush2.bf16.msra.mxu1 %v4419_v29  ;;  %3009 = vmatprep.subr.bf16.mxu0 %v4424_v30  ;;  %v558_v29 = vld [vmem:[%s6757_s0 + $0xba8] sm:$0xff]  ;;  %v544_v30 = vld [vmem:[%s6757_s0 + $0xb38] sm:$0xff] }
  0xef   : > { %3170 = vmatprep.subr.bf16.mxu1 %v4427_v31  ;;  %2756 = vmatmul.mubr.bf16.gmra.mxu0 %v685_v32  ;;  %v1051_v31 = vlaneseq  ;;  %v560_v32 = vld [vmem:[%s6757_s0 + $0xbb8] sm:$0xff] }
  0xf0   : > { %2917 = vmatmul.mubr.bf16.gmra.mxu1 %v687_v33  ;;  %2765 = vmatprep.mubr.bf16.mxu0 %v702_v34  ;;  %v749_v33 = vpack.c.bf16 %v525_v25, %v509_v24  ;;  %v751_v34 = vpack.c.bf16 %v527_v27, %v511_v26  ;;  %v226_v24 = vld [vmem:[%s6757_s0 + $0x148] sm:$0xff] }
  0xf1   : > { %2926 = vmatprep.mubr.bf16.mxu1 %v704_v35  ;;  %3010 = vmatpush2.bf16.msra.mxu0 %v4422_v36  ;;  %v766_v35 = vpack.c.bf16 %v558_v29, %v542_v28  ;;  %v768_v36 = vpack.c.bf16 %v560_v32, %v544_v30  ;;  %v242_v27 = vld [vmem:[%s6757_s0 + $0x1c8] sm:$0xff]  ;;  %v228_v28 = vld [vmem:[%s6757_s0 + $0x158] sm:$0xff]  ;;  %v593_v32 = vpack.c.bf16 %v209_v19, %v193_v16 }
  0xf2   : > { %3171 = vmatpush2.bf16.msra.mxu1 %v4425_v37  ;;  %3011 = vmatprep.subr.bf16.mxu0 %v4430_v42  ;;  %v1052_v37 = vshrl.u32 %v1051_v31, 7  ;;  %v543_v42 = vld [vmem:[%s6757_s0 + $0xb30] sm:$0xff]  ;;  %v244_v29 = vld [vmem:[%s6757_s0 + $0x1d8] sm:$0xff]  ;;  %v610_v40 = vpack.c.bf16 %v242_v27, %v226_v24  ;;  %v4466_v24 = vld [vmem:[%s4632_s6 + $0x644] ss:$8 sps:$4 sm:$0xff]  }
  0xf3   : > { %3172 = vmatprep.subr.bf16.mxu1 %v4433_v43  ;;  %v559_v43 = vld [vmem:[%s6757_s0 + $0xbb0] sm:$0xff] }
  0xf4   : > { %v1053_v41 = vsub.s32 0, %v1052_v37  ;;  %v1057_v46 = vsub.s32 1, %v1052_v37  ;;  %v4449_v37 = vld [vmem:[%s4632_s6 + $0x770] ss:$8 sps:$4 sm:$0xff]  }
  0xf5   : > { %3012 = vmatpush2.bf16.msra.mxu0 %v4428_v48  ;;  %v767_v48 = vpack.c.bf16 %v559_v43, %v543_v42 }
  0xf6   : > { %3173 = vmatpush2.bf16.msra.mxu1 %v4431_v49  ;;  %3013 = vmatprep.subr.bf16.mxu0 %v4436_v50  ;;  %v5414_v49 = vrot.slane %v1049_v38, %v1053_v41  ;;  %v782_v50 = vpack.c.bf16 %v574_v44, %v574_v44  ;;  %v612_v41 = vpack.c.bf16 %v244_v29, %v228_v28  ;;  %v4452_v44 = vld [vmem:[%s4632_s6 + $0x660] ss:$8 sps:$4 sm:$0xff]   ;;  %v259_v29 = vld [vmem:[%s6757_s0 + $0x250] sm:$0xff] }
  0xf7   : > { %3174 = vmatprep.subr.bf16.mxu1 %v4439_v51  ;;  %2766 = vmatmul.mubr.bf16.gmra.mxu0 %v701_v52  ;;  %v784_v51 = vpack.c.bf16 %v576_v45, %v576_v45  ;;  %v5416_v52 = vrot.slane %v1049_v38, %v1057_v46  ;;  %v4454_v45 = vld [vmem:[%s4632_s6 + $0x664] ss:$8 sps:$4 sm:$0xff]  }
  0xf8   : > { %2927 = vmatmul.mubr.bf16.gmra.mxu1 %v703_v53  ;;  %2775 = vmatprep.mubr.bf16.mxu0 %v718_v54  ;;  %v4457_v46 = vld [vmem:[%s4632_s6 + $0x764] ss:$8 sps:$4 sm:$0xff]  }
  0xf9   : > { %2936 = vmatprep.mubr.bf16.mxu1 %v720_v55  ;;  %3014 = vmatpush2.bf16.msra.mxu0 %v4434_v56  ;;  %v573_v55 = vld [vmem:[%s6757_s0 + $0xc20] sm:$0xf] }
  0xfa   : > { %3175 = vmatpush2.bf16.msra.mxu1 %v4437_v57  ;;  %3015 = vmatprep.subr.bf16.mxu0 %v4442_v58  ;;  %v575_v57 = vld [vmem:[%s6757_s0 + $0xc30] sm:$0xf]  ;;  %v194_v58 = vld [vmem:[%s6757_s0 + $0x48] sm:$0xff] }
  0xfb   : > { %3176 = vmatprep.subr.bf16.mxu1 %v4445_v63  ;;  %v212_v63 = vld [vmem:[%s6757_s0 + $0xd8] sm:$0xff] }
  0xfd   : > { %3016 = vmatpush2.bf16.msra.mxu0 %v4440_v4  ;;  %v781_v4 = vpack.c.bf16 %v573_v55, %v573_v55 }
  0xfe   : > { %3177 = vmatpush2.bf16.msra.mxu1 %v4443_v5  ;;  %3307 = vmatprep.subr.bf16.mxu0 %v4448_v6  ;;  %v783_v5 = vpack.c.bf16 %v575_v57, %v575_v57  ;;  %v4455_v57 = vld [vmem:[%s4632_s6 + $0x760] ss:$8 sps:$4 sm:$0xff]  }
  0xff   : > { %3468 = vmatprep.subr.bf16.mxu1 %v4451_v7  ;;  %2776 = vmatmul.mubr.bf16.gmra.mxu0 %v717_v8  ;;  %v594_v8 = vpack.c.bf16 %v210_v61, %v194_v58  ;;  %v4460_v58 = vld [vmem:[%s4632_s6 + $0x654] ss:$8 sps:$4 sm:$0xff]  }
 0x100   : > { %2937 = vmatmul.mubr.bf16.gmra.mxu1 %v719_v9  ;;  %2785 = vmatprep.mubr.bf16.mxu0 %v734_v10  ;;  %v596_v9 = vpack.c.bf16 %v212_v63, %v196_v62  ;;  %v4463_v61 = vld [vmem:[%s4632_s6 + $0x754] ss:$8 sps:$4 sm:$0xff]   ;;  %v258_v62 = vld [vmem:[%s6757_s0 + $0x248] sm:$0xff] }
 0x101   : > { %2946 = vmatprep.mubr.bf16.mxu1 %v736_v11  ;;  %v274_v63 = vld [vmem:[%s6757_s0 + $0x2c8] sm:$0xff] }
 0x107   : > { %2786 = vmatmul.mubr.bf16.gmra.mxu0 %v733_v20  ;;  %v195_v20 = vld [vmem:[%s6757_s0 + $0x50] sm:$0xff] }
 0x108   : > { %2947 = vmatmul.mubr.bf16.gmra.mxu1 %v735_v21  ;;  %2795 = vmatprep.mubr.bf16.mxu0 %v750_v22  ;;  %v211_v21 = vld [vmem:[%s6757_s0 + $0xd0] sm:$0xff] }
 0x109   : > { %2956 = vmatprep.mubr.bf16.mxu1 %v752_v23 }
 0x10f   : > { %2796 = vmatmul.mubr.bf16.gmra.mxu0 %v749_v33  ;;  %v595_v33 = vpack.c.bf16 %v211_v21, %v195_v20 }
 0x110   : > { %2957 = vmatmul.mubr.bf16.gmra.mxu1 %v751_v34  ;;  %2805 = vmatprep.mubr.bf16.mxu0 %v766_v35 }
 0x111   : > { %2966 = vmatprep.mubr.bf16.mxu1 %v768_v36  ;;  %v4446_v36 = vld [vmem:[%s4632_s6 + $0x670] ss:$8 sps:$4 sm:$0xff]  }
 0x117   : > { %v2375_v53 = vpop.f32.mrf.mxu0  ;;  %2806 = vmatmul.mubr.bf16.gmra.mxu0 %v765_v47 }
 0x118   : > { %v2536_v54 = vpop.f32.mrf.mxu1  ;;  %2967 = vmatmul.mubr.bf16.gmra.mxu1 %v767_v48  ;;  %v2376_v56 = vadd.f32 %v2375_v53, %v5414_v49  ;;  %2815 = vmatprep.mubr.bf16.mxu0 %v782_v50  ;;  %v225_v50 = vld [vmem:[%s6757_s0 + $0x140] sm:$0xff]  ;;  %v227_v53 = vld [vmem:[%s6757_s0 + $0x150] sm:$0xff] }
 0x119   : > { %2976 = vmatprep.mubr.bf16.mxu1 %v784_v51  ;;  %v2377_v59 = vpop.f32.mrf.mxu0  ;;  %v241_v51 = vld [vmem:[%s6757_s0 + $0x1c0] sm:$0xff] }
 0x11a   : > { %v2538_v60 = vpop.f32.mrf.mxu1  ;;  %v5437_v0 = vadd.f32 %v2536_v54, %v2376_v56  ;;  %v2378_v1 = vadd.f32 %v2377_v59, %v5416_v52  ;;  %v243_v56 = vld [vmem:[%s6757_s0 + $0x1d0] sm:$0xff] }
 0x11b   : > { %v2379_v2 = vpop.f32.mrf.mxu0 }
 0x11c   : > { %v2540_v3 = vpop.f32.mrf.mxu1  ;;  %v5440_v6 = vadd.f32 %v2538_v60, %v2378_v1  ;;  %v2380_v7 = vadd.f32 %v2379_v2, %v5414_v49 }
 0x11d   : > { %v2381_v10 = vpop.f32.mrf.mxu0 }
 0x11e   : > { %v2542_v11 = vpop.f32.mrf.mxu1  ;;  %v5443_v12 = vadd.f32 %v2540_v3, %v2380_v7  ;;  %v2382_v13 = vadd.f32 %v2381_v10, %v5416_v52  ;;  %v260_v3 = vld [vmem:[%s6757_s0 + $0x258] sm:$0xff] }
 0x11f   : > { %v2385_v14 = vpop.f32.mrf.mxu0  ;;  %2816 = vmatmul.mubr.bf16.gmra.mxu0 %v781_v4  ;;  %v276_v4 = vld [vmem:[%s6757_s0 + $0x2d8] sm:$0xff] }
 0x120   : > { %v2546_v15 = vpop.f32.mrf.mxu1  ;;  %2977 = vmatmul.mubr.bf16.gmra.mxu1 %v783_v5  ;;  %v5449_v17 = vadd.f32 %v2542_v11, %v2382_v13  ;;  %v2386_v18 = vadd.f32 %v2385_v14, %v5414_v49  ;;  %3017 = vmatprep.mubr.bf16.mxu0 %v594_v8  ;;  %v609_v8 = vpack.c.bf16 %v241_v51, %v225_v50  ;;  %v4458_v13 = vld [vmem:[%s4632_s6 + $0x650] ss:$8 sps:$4 sm:$0xff]  }
 0x121   : > { %3178 = vmatprep.mubr.bf16.mxu1 %v596_v9  ;;  %v2387_v22 = vpop.f32.mrf.mxu0  ;;  %v611_v9 = vpack.c.bf16 %v243_v56, %v227_v53  ;;  %v626_v14 = vpack.c.bf16 %v274_v63, %v258_v62  ;;  %v628_v19 = vpack.c.bf16 %v276_v4, %v260_v3  ;;  %v4478_v3 = vld [vmem:[%s4632_s6 + $0x624] ss:$8 sps:$4 sm:$0xff]  }
 0x122   : > { %v2548_v23 = vpop.f32.mrf.mxu1  ;;  %v5464_v25 = vadd.f32 %v2546_v15, %v2386_v18  ;;  %v2388_v26 = vadd.f32 %v2387_v22, %v5416_v52  ;;  %v4461_v18 = vld [vmem:[%s4632_s6 + $0x750] ss:$8 sps:$4 sm:$0xff]   ;;  %v257_v22 = vld [vmem:[%s6757_s0 + $0x240] sm:$0xff] }
 0x123   : > { %v2389_v30 = vpop.f32.mrf.mxu0  ;;  %v4481_v4 = vld [vmem:[%s4632_s6 + $0x724] ss:$8 sps:$4 sm:$0xff]  }
 0x124   : > { %v2550_v31 = vpop.f32.mrf.mxu1  ;;  %v5476_v34 = vadd.f32 %v2548_v23, %v2388_v26  ;;  %v2390_v35 = vadd.f32 %v2389_v30, %v5414_v49  ;;  %v273_v23 = vld [vmem:[%s6757_s0 + $0x2c0] sm:$0xff]  ;;  %v275_v30 = vld [vmem:[%s6757_s0 + $0x2d0] sm:$0xff] }
 0x125   : > { %v2391_v38 = vpop.f32.mrf.mxu0  ;;  %v4469_v26 = vld [vmem:[%s4632_s6 + $0x744] ss:$8 sps:$4 sm:$0xff]   ;;  %v625_v50 = vpack.c.bf16 %v273_v23, %v257_v22  ;;  %v627_v51 = vpack.c.bf16 %v275_v30, %v259_v29  ;;  %v340_v22 = vld [vmem:[%s6757_s0 + $0x4d8] sm:$0xff]  ;;  %v4476_v23 = vld [vmem:[%s4632_s6 + $0x620] ss:$8 sps:$4 sm:$0xff]  }
 0x126   : > { %v2552_v39 = vpop.f32.mrf.mxu1  ;;  %v5481_v42 = vadd.f32 %v2550_v31, %v2390_v35  ;;  %v2392_v43 = vadd.f32 %v2391_v38, %v5416_v52  ;;  %v4464_v31 = vld [vmem:[%s4632_s6 + $0x640] ss:$8 sps:$4 sm:$0xff]   ;;  %v4487_v29 = vld [vmem:[%s4632_s6 + $0x714] ss:$8 sps:$4 sm:$0xff]  }
 0x127   : > { %v2395_v47 = vpop.f32.mrf.mxu0  ;;  %3018 = vmatmul.mubr.bf16.vlgmr.msra.gmra.mxu0 %v593_v32  ;;  %v4467_v35 = vld [vmem:[%s4632_s6 + $0x740] ss:$8 sps:$4 sm:$0xff]  }
 0x128   : > { %v2556_v48 = vpop.f32.mrf.mxu1  ;;  %3179 = vmatmul.mubr.bf16.vlgmr.msra.gmra.mxu1 %v595_v33  ;;  %v5496_v54 = vadd.f32 %v2552_v39, %v2392_v43  ;;  %v2396_v55 = vadd.f32 %v2395_v47, %v5414_v49  ;;  %3308 = vmatpush1.bf16.msra.mxu0 %v4446_v36  ;;  %v290_v36 = vld [vmem:[%s6757_s0 + $0x348] sm:$0xff]  ;;  %v4472_v43 = vld [vmem:[%s4632_s6 + $0x634] ss:$8 sps:$4 sm:$0xff]  }
 0x129   : > { %3469 = vmatpush1.bf16.msra.mxu1 %v4449_v37  ;;  %v2397_v59 = vpop.f32.mrf.mxu0  ;;  %3027 = vmatprep.mubr.bf16.mxu0 %v610_v40  ;;  %v306_v37 = vld [vmem:[%s6757_s0 + $0x3c8] sm:$0xff]  ;;  %v292_v40 = vld [vmem:[%s6757_s0 + $0x358] sm:$0xff] }
 0x12a   : > { %v2558_v60 = vpop.f32.mrf.mxu1  ;;  %3188 = vmatprep.mubr.bf16.mxu1 %v612_v41  ;;  %v5511_v1 = vadd.f32 %v2556_v48, %v2396_v55  ;;  %v2398_v2 = vadd.f32 %v2397_v59, %v5416_v52  ;;  %3309 = vmatprep.subr.bf16.mxu0 %v4454_v45  ;;  %v308_v41 = vld [vmem:[%s6757_s0 + $0x3d8] sm:$0xff]  ;;  %v642_v56 = vpack.c.bf16 %v306_v37, %v290_v36 }
 0x12b   : > { %3470 = vmatprep.subr.bf16.mxu1 %v4457_v46  ;;  %v2399_v5 = vpop.f32.mrf.mxu0  ;;  %v4475_v46 = vld [vmem:[%s4632_s6 + $0x734] ss:$8 sps:$4 sm:$0xff]  }
 0x12c   : > { %v2560_v7 = vpop.f32.mrf.mxu1  ;;  %v5520_v10 = vadd.f32 %v2558_v60, %v2398_v2  ;;  %v2400_v11 = vadd.f32 %v2399_v5, %v5414_v49  ;;  %3310 = vmatpush1.bf16.msra.mxu0 %v4452_v44  ;;  %v4470_v60 = vld [vmem:[%s4632_s6 + $0x630] ss:$8 sps:$4 sm:$0xff]   ;;  %v289_v2 = vld [vmem:[%s6757_s0 + $0x340] sm:$0xff] }
 0x12d   : > { %3471 = vmatpush1.bf16.msra.mxu1 %v4455_v57  ;;  %v2401_v15 = vpop.f32.mrf.mxu0  ;;  %3311 = vmatprep.subr.bf16.mxu0 %v4460_v58  ;;  %v644_v57 = vpack.c.bf16 %v308_v41, %v292_v40 }
 0x12e   : > { %v2562_v16 = vpop.f32.mrf.mxu1  ;;  %3472 = vmatprep.subr.bf16.mxu1 %v4463_v61  ;;  %v5525_v20 = vadd.f32 %v2560_v7, %v2400_v11  ;;  %v2402_v21 = vadd.f32 %v2401_v15, %v5416_v52  ;;  %v4473_v61 = vld [vmem:[%s4632_s6 + $0x730] ss:$8 sps:$4 sm:$0xff]   ;;  %v322_v15 = vld [vmem:[%s6757_s0 + $0x448] sm:$0xff] }
 0x12f   : > { %v2405_v27 = vpop.f32.mrf.mxu0  ;;  %3028 = vmatmul.mubr.bf16.gmra.mxu0 %v609_v8  ;;  %v305_v8 = vld [vmem:[%s6757_s0 + $0x3c0] sm:$0xff]  ;;  %v307_v11 = vld [vmem:[%s6757_s0 + $0x3d0] sm:$0xff] }
 0x130   : > { %v2566_v28 = vpop.f32.mrf.mxu1  ;;  %3189 = vmatmul.mubr.bf16.gmra.mxu1 %v611_v9  ;;  %v5543_v32 = vadd.f32 %v2562_v16, %v2402_v21  ;;  %v2406_v33 = vadd.f32 %v2405_v27, %v5414_v49  ;;  %3312 = vmatpush1.bf16.msra.mxu0 %v4458_v13  ;;  %v291_v9 = vld [vmem:[%s6757_s0 + $0x350] sm:$0xff]  ;;  %v338_v16 = vld [vmem:[%s6757_s0 + $0x4c8] sm:$0xff] }
 0x131   : > { %3037 = vmatprep.mubr.bf16.mxu0 %v626_v14  ;;  %v2407_v38 = vpop.f32.mrf.mxu0  ;;  %3198 = vmatprep.mubr.bf16.mxu1 %v628_v19 }
 0x132   : > { %v2568_v39 = vpop.f32.mrf.mxu1  ;;  %3473 = vmatpush1.bf16.msra.mxu1 %v4461_v18  ;;  %v5560_v44 = vadd.f32 %v2566_v28, %v2406_v33  ;;  %v2408_v45 = vadd.f32 %v2407_v38, %v5416_v52  ;;  %3313 = vmatprep.subr.bf16.mxu0 %v4466_v24  ;;  %v324_v18 = vld [vmem:[%s6757_s0 + $0x458] sm:$0xff]  ;;  %v4479_v24 = vld [vmem:[%s4632_s6 + $0x720] ss:$8 sps:$4 sm:$0xff]   ;;  %v641_v33 = vpack.c.bf16 %v305_v8, %v289_v2 }
 0x133   : > { %3474 = vmatprep.subr.bf16.mxu1 %v4469_v26  ;;  %v2409_v47 = vpop.f32.mrf.mxu0  ;;  %v4484_v28 = vld [vmem:[%s4632_s6 + $0x614] ss:$8 sps:$4 sm:$0xff]   ;;  %v658_v38 = vpack.c.bf16 %v338_v16, %v322_v15  ;;  %v370_v2 = vld [vmem:[%s6757_s0 + $0x5c8] sm:$0xff] }
 0x134   : > { %v2570_v48 = vpop.f32.mrf.mxu1  ;;  %v5564_v53 = vadd.f32 %v2568_v39, %v2408_v45  ;;  %v2410_v55 = vadd.f32 %v2409_v47, %v5414_v49  ;;  %3314 = vmatpush1.bf16.msra.mxu0 %v4464_v31  ;;  %v660_v39 = vpack.c.bf16 %v340_v22, %v324_v18  ;;  %v4485_v45 = vld [vmem:[%s4632_s6 + $0x710] ss:$8 sps:$4 sm:$0xff]   ;;  %v4488_v8 = vld [vmem:[%s4632_s6 + $0x600] ss:$8 sps:$4 sm:$0xff]   ;;  %v4496_v15 = vld [vmem:[%s4632_s6 + $0x6f4] ss:$8 sps:$4 sm:$0xff]  }
 0x135   : > { %v2411_v58 = vpop.f32.mrf.mxu0  ;;  %3315 = vmatprep.subr.bf16.mxu0 %v4472_v43  ;;  %v4482_v43 = vld [vmem:[%s4632_s6 + $0x610] ss:$8 sps:$4 sm:$0xff]   ;;  %v4499_v16 = vld [vmem:[%s4632_s6 + $0x7f4] ss:$8 sps:$4 sm:$0xff]  }
 0x136   : > { %v2572_v59 = vpop.f32.mrf.mxu1  ;;  %3475 = vmatpush1.bf16.msra.mxu1 %v4467_v35  ;;  %v5569_v62 = vadd.f32 %v2570_v48, %v2410_v55  ;;  %v2412_v63 = vadd.f32 %v2411_v58, %v5416_v52  ;;  %v643_v35 = vpack.c.bf16 %v307_v11, %v291_v9  ;;  %v321_v48 = vld [vmem:[%s6757_s0 + $0x440] sm:$0xff]  ;;  %v323_v58 = vld [vmem:[%s6757_s0 + $0x450] sm:$0xff] }
 0x137   : > { %3476 = vmatprep.subr.bf16.mxu1 %v4475_v46  ;;  %v2415_v5 = vpop.f32.mrf.mxu0  ;;  %3038 = vmatmul.mubr.bf16.gmra.mxu0 %v625_v50  ;;  %v4490_v50 = vld [vmem:[%s4632_s6 + $0x604] ss:$8 sps:$4 sm:$0xff]   ;;  %v4491_v9 = vld [vmem:[%s4632_s6 + $0x700] ss:$8 sps:$4 sm:$0xff]  }
 0x138   : > { %v2576_v7 = vpop.f32.mrf.mxu1  ;;  %3199 = vmatmul.mubr.bf16.gmra.mxu1 %v627_v51  ;;  %v5586_v13 = vadd.f32 %v2572_v59, %v2412_v63  ;;  %v2416_v14 = vadd.f32 %v2415_v5, %v5414_v49  ;;  %3047 = vmatprep.mubr.bf16.mxu0 %v642_v56  ;;  %v4493_v51 = vld [vmem:[%s4632_s6 + $0x704] ss:$8 sps:$4 sm:$0xff]   ;;  %v339_v59 = vld [vmem:[%s6757_s0 + $0x4d0] sm:$0xff] }
 0x139   : > { %3208 = vmatprep.mubr.bf16.mxu1 %v644_v57  ;;  %v2417_v19 = vpop.f32.mrf.mxu0  ;;  %3316 = vmatpush1.bf16.msra.mxu0 %v4470_v60  ;;  %v337_v57 = vld [vmem:[%s6757_s0 + $0x4c0] sm:$0xff]  ;;  %v354_v63 = vld [vmem:[%s6757_s0 + $0x548] sm:$0xff]  ;;  %v659_v22 = vpack.c.bf16 %v339_v59, %v323_v58 }
 0x13a   : > { %v2578_v21 = vpop.f32.mrf.mxu1  ;;  %3477 = vmatpush1.bf16.msra.mxu1 %v4473_v61  ;;  %v5603_v26 = vadd.f32 %v2576_v7, %v2416_v14  ;;  %v2418_v27 = vadd.f32 %v2417_v19, %v5416_v52  ;;  %3317 = vmatprep.subr.bf16.mxu0 %v4478_v3  ;;  %v356_v3 = vld [vmem:[%s6757_s0 + $0x558] sm:$0xff] }
 0x13b   : > { %3478 = vmatprep.subr.bf16.mxu1 %v4481_v4  ;;  %v2419_v30 = vpop.f32.mrf.mxu0  ;;  %v372_v7 = vld [vmem:[%s6757_s0 + $0x5d8] sm:$0xff] }
 0x13c   : > { %v2580_v31 = vpop.f32.mrf.mxu1  ;;  %v5608_v36 = vadd.f32 %v2578_v21, %v2418_v27  ;;  %v2420_v37 = vadd.f32 %v2419_v30, %v5414_v49  ;;  %v657_v21 = vpack.c.bf16 %v337_v57, %v321_v48  ;;  %v674_v27 = vpack.c.bf16 %v370_v2, %v354_v63  ;;  %v371_v48 = vld [vmem:[%s6757_s0 + $0x5d0] sm:$0xff]  ;;  %v388_v57 = vld [vmem:[%s6757_s0 + $0x658] sm:$0xff]  ;;  %v4500_v63 = vld [vmem:[%s4632_s6 + $0x6e0] ss:$8 sps:$4 sm:$0xff]  }
 0x13d   : > { %v2421_v40 = vpop.f32.mrf.mxu0  ;;  %3318 = vmatpush1.bf16.msra.mxu0 %v4476_v23  ;;  %v4503_v2 = vld [vmem:[%s4632_s6 + $0x7e0] ss:$8 sps:$4 sm:$0xff]  }
 0x13e   : > { %v2582_v41 = vpop.f32.mrf.mxu1  ;;  %3479 = vmatpush1.bf16.msra.mxu1 %v4479_v24  ;;  %v5613_v46 = vadd.f32 %v2580_v31, %v2420_v37  ;;  %v2422_v47 = vadd.f32 %v2421_v40, %v5416_v52  ;;  %3319 = vmatprep.subr.bf16.mxu0 %v4484_v28  ;;  %v676_v28 = vpack.c.bf16 %v372_v7, %v356_v3  ;;  %v4494_v31 = vld [vmem:[%s4632_s6 + $0x6f0] ss:$8 sps:$4 sm:$0xff]   ;;  %v4505_v40 = vld [vmem:[%s4632_s6 + $0x7e4] ss:$8 sps:$4 sm:$0xff]   ;;  %v4511_v7 = vld [vmem:[%s4632_s6 + $0x7d4] ss:$8 sps:$4 sm:$0xff]  }
 0x13f   : > { %3480 = vmatprep.subr.bf16.mxu1 %v4487_v29  ;;  %v2425_v55 = vpop.f32.mrf.mxu0  ;;  %3048 = vmatmul.mubr.bf16.gmra.mxu0 %v641_v33  ;;  %v4497_v33 = vld [vmem:[%s4632_s6 + $0x7f0] ss:$8 sps:$4 sm:$0xff]  }
 0x140   : > { %v2586_v56 = vpop.f32.mrf.mxu1  ;;  %3209 = vmatmul.mubr.bf16.gmra.mxu1 %v643_v35  ;;  %v5630_v60 = vadd.f32 %v2582_v41, %v2422_v47  ;;  %v2426_v61 = vadd.f32 %v2425_v55, %v5414_v49  ;;  %3057 = vmatprep.mubr.bf16.mxu0 %v658_v38  ;;  %v353_v38 = vld [vmem:[%s6757_s0 + $0x540] sm:$0xff]  ;;  %v355_v47 = vld [vmem:[%s6757_s0 + $0x550] sm:$0xff]  ;;  %v386_v55 = vld [vmem:[%s6757_s0 + $0x648] sm:$0xff] }
 0x141   : > { %3218 = vmatprep.mubr.bf16.mxu1 %v660_v39  ;;  %v2427_v4 = vpop.f32.mrf.mxu0  ;;  %3320 = vmatpush1.bf16.msra.mxu0 %v4482_v43  ;;  %v4502_v39 = vld [vmem:[%s4632_s6 + $0x6e4] ss:$8 sps:$4 sm:$0xff]  }
 0x142   : > { %v2588_v5 = vpop.f32.mrf.mxu1  ;;  %3481 = vmatpush1.bf16.msra.mxu1 %v4485_v45  ;;  %v5647_v11 = vadd.f32 %v2586_v56, %v2426_v61  ;;  %v2428_v14 = vadd.f32 %v2427_v4, %v5416_v52  ;;  %3321 = vmatprep.subr.bf16.mxu0 %v4490_v50  ;;  %v369_v45 = vld [vmem:[%s6757_s0 + $0x5c0] sm:$0xff]  ;;  %v402_v56 = vld [vmem:[%s6757_s0 + $0x6c8] sm:$0xff]  ;;  %v404_v61 = vld [vmem:[%s6757_s0 + $0x6d8] sm:$0xff] }
 0x143   : > { %3482 = vmatprep.subr.bf16.mxu1 %v4493_v51  ;;  %v2429_v18 = vpop.f32.mrf.mxu0 }
 0x144   : > { %v2590_v19 = vpop.f32.mrf.mxu1  ;;  %v5652_v23 = vadd.f32 %v2588_v5, %v2428_v14  ;;  %v2430_v24 = vadd.f32 %v2429_v18, %v5414_v49  ;;  %v4508_v5 = vld [vmem:[%s4632_s6 + $0x6d4] ss:$8 sps:$4 sm:$0xff]   ;;  %v673_v14 = vpack.c.bf16 %v369_v45, %v353_v38 }
 0x145   : > { %v2431_v29 = vpop.f32.mrf.mxu0  ;;  %3322 = vmatpush1.bf16.msra.mxu0 %v4488_v8 }
 0x146   : > { %v2592_v30 = vpop.f32.mrf.mxu1  ;;  %3483 = vmatpush1.bf16.msra.mxu1 %v4491_v9  ;;  %v5657_v35 = vadd.f32 %v2590_v19, %v2430_v24  ;;  %v2432_v37 = vadd.f32 %v2431_v29, %v5416_v52  ;;  %3323 = vmatprep.subr.bf16.mxu0 %v4496_v15  ;;  %v675_v15 = vpack.c.bf16 %v371_v48, %v355_v47  ;;  %v418_v48 = vld [vmem:[%s6757_s0 + $0x748] sm:$0xff] }
 0x147   : > { %3484 = vmatprep.subr.bf16.mxu1 %v4499_v16  ;;  %v2435_v41 = vpop.f32.mrf.mxu0  ;;  %3058 = vmatmul.mubr.bf16.gmra.mxu0 %v657_v21  ;;  %v690_v19 = vpack.c.bf16 %v402_v56, %v386_v55  ;;  %v692_v21 = vpack.c.bf16 %v404_v61, %v388_v57  ;;  %v420_v55 = vld [vmem:[%s6757_s0 + $0x758] sm:$0xff]  ;;  %v4515_v61 = vld [vmem:[%s4632_s6 + $0x7c0] ss:$8 sps:$4 sm:$0xff]  }
 0x148   : > { %v2596_v43 = vpop.f32.mrf.mxu1  ;;  %3219 = vmatmul.mubr.bf16.gmra.mxu1 %v659_v22  ;;  %v5674_v50 = vadd.f32 %v2592_v30, %v2432_v37  ;;  %v2436_v51 = vadd.f32 %v2435_v41, %v5414_v49  ;;  %3067 = vmatprep.mubr.bf16.mxu0 %v674_v27  ;;  %v4506_v27 = vld [vmem:[%s4632_s6 + $0x6d0] ss:$8 sps:$4 sm:$0xff]   ;;  %v4517_v37 = vld [vmem:[%s4632_s6 + $0x7c4] ss:$8 sps:$4 sm:$0xff]  }
 0x149   : > { %3228 = vmatprep.mubr.bf16.mxu1 %v676_v28  ;;  %v2437_v58 = vpop.f32.mrf.mxu0  ;;  %3324 = vmatpush2.bf16.msra.mxu0 %v4494_v31  ;;  %v4509_v28 = vld [vmem:[%s4632_s6 + $0x7d0] ss:$8 sps:$4 sm:$0xff]   ;;  %v385_v31 = vld [vmem:[%s6757_s0 + $0x640] sm:$0xff] }
 0x14a   : > { %v2598_v59 = vpop.f32.mrf.mxu1  ;;  %3485 = vmatpush2.bf16.msra.mxu1 %v4497_v33  ;;  %v5691_v3 = vadd.f32 %v2596_v43, %v2436_v51  ;;  %v2438_v4 = vadd.f32 %v2437_v58, %v5416_v52  ;;  %3325 = vmatprep.subr.bf16.mxu0 %v4502_v39  ;;  %v4514_v33 = vld [vmem:[%s4632_s6 + $0x6c4] ss:$8 sps:$4 sm:$0xff]   ;;  %v387_v41 = vld [vmem:[%s6757_s0 + $0x650] sm:$0xff]  ;;  %v436_v58 = vld [vmem:[%s6757_s0 + $0x7d8] sm:$0xff] }
 0x14b   : > { %3486 = vmatprep.subr.bf16.mxu1 %v4505_v40  ;;  %v2439_v8 = vpop.f32.mrf.mxu0  ;;  %v401_v40 = vld [vmem:[%s6757_s0 + $0x6c0] sm:$0xff]  ;;  %v403_v43 = vld [vmem:[%s6757_s0 + $0x6d0] sm:$0xff]  ;;  %v434_v51 = vld [vmem:[%s6757_s0 + $0x7c8] sm:$0xff] }
 0x14c   : > { %v2600_v9 = vpop.f32.mrf.mxu1  ;;  %v5696_v16 = vadd.f32 %v2598_v59, %v2438_v4  ;;  %v2440_v18 = vadd.f32 %v2439_v8, %v5414_v49  ;;  %v4512_v59 = vld [vmem:[%s4632_s6 + $0x6c0] ss:$8 sps:$4 sm:$0xff]   ;;  %v4520_v4 = vld [vmem:[%s4632_s6 + $0x6b4] ss:$8 sps:$4 sm:$0xff]  }
 0x14d   : > { %v2441_v22 = vpop.f32.mrf.mxu0  ;;  %3326 = vmatpush2.bf16.msra.mxu0 %v4500_v63 }
 0x14e   : > { %v2602_v24 = vpop.f32.mrf.mxu1  ;;  %3487 = vmatpush2.bf16.msra.mxu1 %v4503_v2  ;;  %v5701_v29 = vadd.f32 %v2600_v9, %v2440_v18  ;;  %v2442_v30 = vadd.f32 %v2441_v22, %v5416_v52  ;;  %3327 = vmatprep.subr.bf16.mxu0 %v4508_v5  ;;  %v4523_v5 = vld [vmem:[%s4632_s6 + $0x7b4] ss:$8 sps:$4 sm:$0xff]   ;;  %v689_v9 = vpack.c.bf16 %v401_v40, %v385_v31  ;;  %v417_v31 = vld [vmem:[%s6757_s0 + $0x740] sm:$0xff] }
 0x14f   : > { %3488 = vmatprep.subr.bf16.mxu1 %v4511_v7  ;;  %v2445_v38 = vpop.f32.mrf.mxu0  ;;  %3068 = vmatmul.mubr.bf16.gmra.mxu0 %v673_v14  ;;  %v691_v14 = vpack.c.bf16 %v403_v43, %v387_v41  ;;  %v433_v41 = vld [vmem:[%s6757_s0 + $0x7c0] sm:$0xff]  ;;  %v419_v43 = vld [vmem:[%s6757_s0 + $0x750] sm:$0xff] }
 0x150   : > { %v2606_v39 = vpop.f32.mrf.mxu1  ;;  %3229 = vmatmul.mubr.bf16.gmra.mxu1 %v675_v15  ;;  %v5718_v45 = vadd.f32 %v2602_v24, %v2442_v30  ;;  %v2446_v47 = vadd.f32 %v2445_v38, %v5414_v49  ;;  %3077 = vmatprep.mubr.bf16.mxu0 %v690_v19  ;;  %v706_v19 = vpack.c.bf16 %v434_v51, %v418_v48  ;;  %v4529_v38 = vld [vmem:[%s4632_s6 + $0x7a4] ss:$8 sps:$4 sm:$0xff]  }
 0x151   : > { %3238 = vmatprep.mubr.bf16.mxu1 %v692_v21  ;;  %v2447_v56 = vpop.f32.mrf.mxu0  ;;  %3328 = vmatpush2.bf16.msra.mxu0 %v4506_v27  ;;  %v708_v21 = vpack.c.bf16 %v436_v58, %v420_v55  ;;  %v4518_v27 = vld [vmem:[%s4632_s6 + $0x6b0] ss:$8 sps:$4 sm:$0xff]   ;;  %v450_v55 = vld [vmem:[%s6757_s0 + $0x848] sm:$0xff] }
 0x152   : > { %v2608_v57 = vpop.f32.mrf.mxu1  ;;  %3489 = vmatpush2.bf16.msra.mxu1 %v4509_v28  ;;  %v5735_v63 = vadd.f32 %v2606_v39, %v2446_v47  ;;  %v2448_v2 = vadd.f32 %v2447_v56, %v5416_v52  ;;  %3329 = vmatprep.subr.bf16.mxu0 %v4514_v33  ;;  %v4521_v28 = vld [vmem:[%s4632_s6 + $0x7b0] ss:$8 sps:$4 sm:$0xff]   ;;  %v466_v56 = vld [vmem:[%s6757_s0 + $0x8c8] sm:$0xff] }
 0x153   : > { %3490 = vmatprep.subr.bf16.mxu1 %v4517_v37  ;;  %v2449_v7 = vpop.f32.mrf.mxu0  ;;  %v4526_v37 = vld [vmem:[%s4632_s6 + $0x6a4] ss:$8 sps:$4 sm:$0xff]   ;;  %v435_v47 = vld [vmem:[%s6757_s0 + $0x7d0] sm:$0xff] }
 0x154   : > { %v2610_v8 = vpop.f32.mrf.mxu1  ;;  %v5740_v15 = vadd.f32 %v2608_v57, %v2448_v2  ;;  %v2450_v18 = vadd.f32 %v2449_v7, %v5414_v49  ;;  %v452_v57 = vld [vmem:[%s6757_s0 + $0x858] sm:$0xff]  ;;  %v4524_v2 = vld [vmem:[%s4632_s6 + $0x6a0] ss:$8 sps:$4 sm:$0xff]  }
 0x155   : > { %v2451_v22 = vpop.f32.mrf.mxu0  ;;  %3330 = vmatpush2.bf16.msra.mxu0 %v4512_v59 }
 0x156   : > { %v2612_v24 = vpop.f32.mrf.mxu1  ;;  %3491 = vmatpush2.bf16.msra.mxu1 %v4515_v61  ;;  %v5745_v30 = vadd.f32 %v2610_v8, %v2450_v18  ;;  %v2452_v33 = vadd.f32 %v2451_v22, %v5416_v52  ;;  %3331 = vmatprep.subr.bf16.mxu0 %v4520_v4  ;;  %v468_v61 = vld [vmem:[%s6757_s0 + $0x8d8] sm:$0xff]  ;;  %v4527_v4 = vld [vmem:[%s4632_s6 + $0x7a0] ss:$8 sps:$4 sm:$0xff]  }
 0x157   : > { %3492 = vmatprep.subr.bf16.mxu1 %v4523_v5  ;;  %v2455_v39 = vpop.f32.mrf.mxu0  ;;  %3078 = vmatmul.mubr.bf16.gmra.mxu0 %v689_v9  ;;  %v4532_v8 = vld [vmem:[%s4632_s6 + $0x694] ss:$8 sps:$4 sm:$0xff]  }
 0x158   : > { %v2616_v40 = vpop.f32.mrf.mxu1  ;;  %3239 = vmatmul.mubr.bf16.gmra.mxu1 %v691_v14  ;;  %v5762_v48 = vadd.f32 %v2612_v24, %v2452_v33  ;;  %v2456_v51 = vadd.f32 %v2455_v39, %v5414_v49  ;;  %3087 = vmatprep.mubr.bf16.mxu0 %v706_v19  ;;  %v4535_v9 = vld [vmem:[%s4632_s6 + $0x794] ss:$8 sps:$4 sm:$0xff]   ;;  %v705_v19 = vpack.c.bf16 %v433_v41, %v417_v31  ;;  %v449_v31 = vld [vmem:[%s6757_s0 + $0x840] sm:$0xff] }
 0x159   : > { %3248 = vmatprep.mubr.bf16.mxu1 %v708_v21  ;;  %v2457_v58 = vpop.f32.mrf.mxu0  ;;  %3332 = vmatpush2.bf16.msra.mxu0 %v4518_v27  ;;  %v707_v21 = vpack.c.bf16 %v435_v47, %v419_v43  ;;  %v722_v27 = vpack.c.bf16 %v466_v56, %v450_v55  ;;  %v4538_v41 = vld [vmem:[%s4632_s6 + $0x684] ss:$8 sps:$4 sm:$0xff]  }
 0x15a   : > { %v2618_v59 = vpop.f32.mrf.mxu1  ;;  %3493 = vmatpush2.bf16.msra.mxu1 %v4521_v28  ;;  %v5779_v5 = vadd.f32 %v2616_v40, %v2456_v51  ;;  %v2458_v7 = vadd.f32 %v2457_v58, %v5416_v52  ;;  %3333 = vmatprep.subr.bf16.mxu0 %v4526_v37  ;;  %v724_v28 = vpack.c.bf16 %v468_v61, %v452_v57  ;;  %v4530_v37 = vld [vmem:[%s4632_s6 + $0x690] ss:$8 sps:$4 sm:$0xff]   ;;  %v4541_v43 = vld [vmem:[%s4632_s6 + $0x784] ss:$8 sps:$4 sm:$0xff]  }
 0x15b   : > { %3494 = vmatprep.subr.bf16.mxu1 %v4529_v38  ;;  %v2459_v14 = vpop.f32.mrf.mxu0  ;;  %v4533_v38 = vld [vmem:[%s4632_s6 + $0x790] ss:$8 sps:$4 sm:$0xff]   ;;  %v465_v56 = vld [vmem:[%s6757_s0 + $0x8c0] sm:$0xff] }
 0x15c   : > { %v2620_v18 = vpop.f32.mrf.mxu1  ;;  %v5784_v22 = vadd.f32 %v2618_v59, %v2458_v7  ;;  %v2460_v24 = vadd.f32 %v2459_v14, %v5414_v49  ;;  %v451_v57 = vld [vmem:[%s6757_s0 + $0x850] sm:$0xff]  ;;  %v484_v7 = vld [vmem:[%s6757_s0 + $0x958] sm:$0xff] }
 0x15d   : > { %v2461_v33 = vpop.f32.mrf.mxu0  ;;  %3334 = vmatpush2.bf16.msra.mxu0 %v4524_v2  ;;  %v467_v58 = vld [vmem:[%s6757_s0 + $0x8d0] sm:$0xff]  ;;  %v482_v2 = vld [vmem:[%s6757_s0 + $0x948] sm:$0xff]  ;;  %v500_v14 = vld [vmem:[%s6757_s0 + $0x9d8] sm:$0xff] }
 0x15e   : > { %v2622_v39 = vpop.f32.mrf.mxu1  ;;  %3495 = vmatpush2.bf16.msra.mxu1 %v4527_v4  ;;  %v5789_v40 = vadd.f32 %v2620_v18, %v2460_v24  ;;  %v2462_v51 = vadd.f32 %v2461_v33, %v5416_v52  ;;  %3335 = vmatprep.subr.bf16.mxu0 %v4532_v8  ;;  %v498_v4 = vld [vmem:[%s6757_s0 + $0x9c8] sm:$0xff]  ;;  %v721_v33 = vpack.c.bf16 %v465_v56, %v449_v31  ;;  %v481_v31 = vld [vmem:[%s6757_s0 + $0x940] sm:$0xff] }
 0x15f   : > { %3496 = vmatprep.subr.bf16.mxu1 %v4535_v9  ;;  %v2465_v47 = vpop.f32.mrf.mxu0  ;;  %3088 = vmatmul.mubr.bf16.gmra.mxu0 %v705_v19  ;;  %v4536_v18 = vld [vmem:[%s4632_s6 + $0x680] ss:$8 sps:$4 sm:$0xff]  }
 0x160   : > { %6762 = vst [vmem:[#allocation3_spill] sm:$0xff] %v5789_v40  ;;  %v2626_v55 = vpop.f32.mrf.mxu1  ;;  %3249 = vmatmul.mubr.bf16.gmra.mxu1 %v707_v21  ;;  %v5806_v59 = vadd.f32 %v2622_v39, %v2462_v51  ;;  %v2466_v61 = vadd.f32 %v2465_v47, %v5414_v49  ;;  %3097 = vmatprep.mubr.bf16.mxu0 %v722_v27  ;;  %v4539_v19 = vld [vmem:[%s4632_s6 + $0x780] ss:$8 sps:$4 sm:$0xff]  }
 0x161   : > { %3258 = vmatprep.mubr.bf16.mxu1 %v724_v28  ;;  %v2467_v8 = vpop.f32.mrf.mxu0  ;;  %3336 = vmatpush2.bf16.msra.mxu0 %v4530_v37  ;;  %v723_v39 = vpack.c.bf16 %v467_v58, %v451_v57  ;;  %v740_v40 = vpack.c.bf16 %v500_v14, %v484_v7  ;;  %v497_v56 = vld [vmem:[%s6757_s0 + $0x9c0] sm:$0xff]  ;;  %v514_v7 = vld [vmem:[%s6757_s0 + $0xa48] sm:$0xff] }
 0x162   : > { %6763 = vst [vmem:[#allocation4_spill] sm:$0xff] %v5806_v59  ;;  %v2628_v9 = vpop.f32.mrf.mxu1  ;;  %3497 = vmatpush2.bf16.msra.mxu1 %v4533_v38  ;;  %v5823_v21 = vadd.f32 %v2626_v55, %v2466_v61  ;;  %v2468_v24 = vadd.f32 %v2467_v8, %v5416_v52  ;;  %3337 = vmatprep.subr.bf16.mxu0 %v4538_v41  ;;  %v530_v14 = vld [vmem:[%s6757_s0 + $0xac8] sm:$0xff] }
 0x163   : > { %3498 = vmatprep.subr.bf16.mxu1 %v4541_v43  ;;  %v2469_v27 = vpop.f32.mrf.mxu0  ;;  %v738_v59 = vpack.c.bf16 %v498_v4, %v482_v2  ;;  %v483_v2 = vld [vmem:[%s6757_s0 + $0x950] sm:$0xff] }
 0x164   : > { %v2630_v28 = vpop.f32.mrf.mxu1  ;;  %v5826_v51 = vadd.f32 %v2628_v9, %v2468_v24  ;;  %v2470_v47 = vadd.f32 %v2469_v27, %v5414_v49  ;;  %v499_v4 = vld [vmem:[%s6757_s0 + $0x9d0] sm:$0xff] }
 0x165   : > { %v2471_v37 = vpop.f32.mrf.mxu0  ;;  %3338 = vmatpush2.bf16.msra.mxu0 %v4536_v18 }
 0x166   : > { %v2632_v38 = vpop.f32.mrf.mxu1  ;;  %3499 = vmatpush2.bf16.msra.mxu1 %v4539_v19  ;;  %v5829_v55 = vadd.f32 %v2630_v28, %v2470_v47  ;;  %v2472_v61 = vadd.f32 %v2471_v37, %v5416_v52  ;;  %v737_v28 = vpack.c.bf16 %v497_v56, %v481_v31  ;;  %v754_v37 = vpack.c.bf16 %v530_v14, %v514_v7  ;;  %v513_v31 = vld [vmem:[%s6757_s0 + $0xa40] sm:$0xff]  ;;  %v515_v7 = vld [vmem:[%s6757_s0 + $0xa50] sm:$0xff] }
 0x167   : > { %v2475_v41 = vpop.f32.mrf.mxu0  ;;  %3098 = vmatmul.mubr.bf16.gmra.mxu0 %v721_v33  ;;  %v739_v33 = vpack.c.bf16 %v499_v4, %v483_v2  ;;  %v529_v56 = vld [vmem:[%s6757_s0 + $0xac0] sm:$0xff] }
 0x168   : > { %6764 = vst [vmem:[#allocation5_spill] sm:$0xff] %v5829_v55  ;;  %v2636_v43 = vpop.f32.mrf.mxu1  ;;  %3259 = vmatmul.mubr.bf16.gmra.mxu1 %v723_v39  ;;  %v5838_v57 = vadd.f32 %v2632_v38, %v2472_v61  ;;  %v2476_v58 = vadd.f32 %v2475_v41, %v5414_v49  ;;  %3107 = vmatprep.mubr.bf16.mxu0 %v738_v59  ;;  %v532_v59 = vld [vmem:[%s6757_s0 + $0xad8] sm:$0xff] }
 0x169   : > { %3268 = vmatprep.mubr.bf16.mxu1 %v740_v40  ;;  %v2477_v8 = vpop.f32.mrf.mxu0  ;;  %v516_v40 = vld [vmem:[%s6757_s0 + $0xa58] sm:$0xff] }
 0x16a   : > { %6765 = vst [vmem:[#allocation6_spill] sm:$0xff] %v5838_v57  ;;  %v2638_v9 = vpop.f32.mrf.mxu1  ;;  %v5859_v18 = vadd.f32 %v2636_v43, %v2476_v58  ;;  %v2478_v19 = vadd.f32 %v2477_v8, %v5416_v52  ;;  %v756_v38 = vpack.c.bf16 %v532_v59, %v516_v40  ;;  %v531_v8 = vld [vmem:[%s6757_s0 + $0xad0] sm:$0xff]  ;;  %v548_v59 = vld [vmem:[%s6757_s0 + $0xb58] sm:$0xff] }
 0x16b   : > { %v2479_v24 = vpop.f32.mrf.mxu0 }
 0x16c   : > { %6766 = vst [vmem:[#allocation7_spill] sm:$0xff] %v5859_v18  ;;  %v2640_v27 = vpop.f32.mrf.mxu1  ;;  %v5862_v39 = vadd.f32 %v2638_v9, %v2478_v19  ;;  %v2480_v47 = vadd.f32 %v2479_v24, %v5414_v49  ;;  %v546_v9 = vld [vmem:[%s6757_s0 + $0xb48] sm:$0xff]  ;;  %v564_v19 = vld [vmem:[%s6757_s0 + $0xbd8] sm:$0xff] }
 0x16d   : > { %v2481_v61 = vpop.f32.mrf.mxu0 }
 0x16e   : > { %6767 = vst [vmem:[#allocation8_spill] sm:$0xff] %v5862_v39  ;;  %v2642_v41 = vpop.f32.mrf.mxu1  ;;  %v5865_v57 = vadd.f32 %v2640_v27, %v2480_v47  ;;  %v2482_v55 = vadd.f32 %v2481_v61, %v5416_v52  ;;  %v753_v47 = vpack.c.bf16 %v529_v56, %v513_v31  ;;  %v545_v31 = vld [vmem:[%s6757_s0 + $0xb40] sm:$0xff] }
 0x16f   : > { %v2485_v43 = vpop.f32.mrf.mxu0  ;;  %3108 = vmatmul.mubr.bf16.gmra.mxu0 %v737_v28 }
 0x170   : > { %6768 = vst [vmem:[#allocation9_spill] sm:$0xff] %v5865_v57  ;;  %v2646_v58 = vpop.f32.mrf.mxu1  ;;  %3269 = vmatmul.mubr.bf16.gmra.mxu1 %v739_v33  ;;  %v5874_v2 = vadd.f32 %v2642_v41, %v2482_v55  ;;  %v2486_v4 = vadd.f32 %v2485_v43, %v5414_v49  ;;  %3117 = vmatprep.mubr.bf16.mxu0 %v754_v37  ;;  %v562_v55 = vld [vmem:[%s6757_s0 + $0xbc8] sm:$0xff] }
 0x171   : > { %3278 = vmatprep.mubr.bf16.mxu1 %v756_v38  ;;  %v2487_v14 = vpop.f32.mrf.mxu0  ;;  %v755_v37 = vpack.c.bf16 %v531_v8, %v515_v7  ;;  %v770_v41 = vpack.c.bf16 %v562_v55, %v546_v9  ;;  %v772_v43 = vpack.c.bf16 %v564_v19, %v548_v59  ;;  %v561_v8 = vld [vmem:[%s6757_s0 + $0xbc0] sm:$0xff]  ;;  %v563_v9 = vld [vmem:[%s6757_s0 + $0xbd0] sm:$0xff] }
 0x172   : > { %6769 = vst [vmem:[#allocation10_spill] sm:$0xff] %v5874_v2  ;;  %v2648_v40 = vpop.f32.mrf.mxu1  ;;  %v5895_v24 = vadd.f32 %v2646_v58, %v2486_v4  ;;  %v2488_v27 = vadd.f32 %v2487_v14, %v5416_v52 }
 0x173   : > { %v2489_v28 = vpop.f32.mrf.mxu0 }
 0x174   : > { %v2650_v33 = vpop.f32.mrf.mxu1  ;;  %v5898_v38 = vadd.f32 %v2648_v40, %v2488_v27  ;;  %v2490_v61 = vadd.f32 %v2489_v28, %v5414_v49  ;;  %v769_v27 = vpack.c.bf16 %v561_v8, %v545_v31  ;;  %v198_v31 = vld [vmem:[%s6757_s0 + $0x68] sm:$0xff] }
 0x175   : > { %v2491_v2 = vpop.f32.mrf.mxu0 }
 0x176   : > { %v2652_v57 = vpop.f32.mrf.mxu1  ;;  %v5901_v39 = vadd.f32 %v2650_v33, %v2490_v61  ;;  %v2492_v18 = vadd.f32 %v2491_v2, %v5416_v52  ;;  %v547_v2 = vld [vmem:[%s6757_s0 + $0xb50] sm:$0xff] }
 0x177   : > { %v2495_v58 = vpop.f32.mrf.mxu0  ;;  %3118 = vmatmul.mubr.bf16.gmra.mxu0 %v753_v47  ;;  %v771_v28 = vpack.c.bf16 %v563_v9, %v547_v2  ;;  %v200_v2 = vld [vmem:[%s6757_s0 + $0x78] sm:$0xff] }
 0x178   : > { %v2656_v4 = vpop.f32.mrf.mxu1  ;;  %3279 = vmatmul.mubr.bf16.gmra.mxu1 %v755_v37  ;;  %v5907_v56 = vadd.f32 %v2652_v57, %v2492_v18  ;;  %v2496_v7 = vadd.f32 %v2495_v58, %v5414_v49  ;;  %3127 = vmatprep.mubr.bf16.mxu0 %v770_v41  ;;  %v578_v49 = vld [vmem:[%s6757_s0 + $0xc48] sm:$0xf]  ;;  %v580_v57 = vld [vmem:[%s6757_s0 + $0xc58] sm:$0xf] }
 0x179   : > { %3288 = vmatprep.mubr.bf16.mxu1 %v772_v43  ;;  %v2497_v14 = vpop.f32.mrf.mxu0  ;;  %v786_v47 = vpack.c.bf16 %v578_v49, %v578_v49  ;;  %v788_v37 = vpack.c.bf16 %v580_v57, %v580_v57  ;;  %v216_v9 = vld [vmem:[%s6757_s0 + $0xf8] sm:$0xff] }
 0x17a   : > { %6770 = vst [vmem:[#allocation11_spill] sm:$0xff] %v5907_v56  ;;  %v2658_v40 = vpop.f32.mrf.mxu1  ;;  %v5925_v18 = vadd.f32 %v2656_v4, %v2496_v7  ;;  %v2498_v55 = vadd.f32 %v2497_v14, %v5416_v52  ;;  %v577_v52 = vld [vmem:[%s6757_s0 + $0xc40] sm:$0xf]  ;;  %v579_v4 = vld [vmem:[%s6757_s0 + $0xc50] sm:$0xf] }
 0x17b   : > { %v2499_v59 = vpop.f32.mrf.mxu0 }
 0x17c   : > { %v2660_v19 = vpop.f32.mrf.mxu1  ;;  %v5928_v33 = vadd.f32 %v2658_v40, %v2498_v55  ;;  %v785_v55 = vpack.c.bf16 %v577_v52, %v577_v52  ;;  %v787_v59 = vpack.c.bf16 %v579_v4, %v579_v4 }
 0x17d   : > { %v2500_v61 = vpop.f32.mrf.mxu0 }
 0x17e   : > { %v2661_v41 = vpop.f32.mrf.mxu1 }
 0x17f   : > { %v2697_v43 = vpop.f32.mrf.mxu0  ;;  %3128 = vmatmul.mubr.bf16.gmra.mxu0 %v769_v27 }
 0x180   : > { %v2858_v58 = vpop.f32.mrf.mxu1  ;;  %3289 = vmatmul.mubr.bf16.gmra.mxu1 %v771_v28  ;;  %v2698_v56 = vadd.f32 %v2697_v43, %v5437_v0  ;;  %3137 = vmatprep.mubr.bf16.mxu0 %v786_v47  ;;  %v214_v0 = vld [vmem:[%s6757_s0 + $0xe8] sm:$0xff]  ;;  %v600_v47 = vpack.c.bf16 %v216_v9, %v200_v2  ;;  %v232_v2 = vld [vmem:[%s6757_s0 + $0x178] sm:$0xff] }
 0x181   : > { %3298 = vmatprep.mubr.bf16.mxu1 %v788_v37  ;;  %v2699_v7 = vpop.f32.mrf.mxu0  ;;  %v598_v28 = vpack.c.bf16 %v214_v0, %v198_v31  ;;  %v215_v31 = vld [vmem:[%s6757_s0 + $0xf0] sm:$0xff]  ;;  %v248_v9 = vld [vmem:[%s6757_s0 + $0x1f8] sm:$0xff] }
 0x182   : > { %v2860_v8 = vpop.f32.mrf.mxu1  ;;  %v5949_v14 = vadd.f32 %v2858_v58, %v2698_v56  ;;  %v2700_v40 = vadd.f32 %v2699_v7, %v5440_v6  ;;  %v197_v6 = vld [vmem:[%s6757_s0 + $0x60] sm:$0xff]  ;;  %v230_v7 = vld [vmem:[%s6757_s0 + $0x168] sm:$0xff] }
 0x183   : > { %v2701_v49 = vpop.f32.mrf.mxu0 }
 0x184   : > { %v2862_v57 = vpop.f32.mrf.mxu1  ;;  %v5952_v19 = vadd.f32 %v2860_v8, %v2700_v40  ;;  %v2702_v27 = vadd.f32 %v2701_v49, %v5443_v12  ;;  %v213_v12 = vld [vmem:[%s6757_s0 + $0xe0] sm:$0xff] }
 0x185   : > { %v2703_v37 = vpop.f32.mrf.mxu0 }
 0x186   : > { %v2864_v61 = vpop.f32.mrf.mxu1  ;;  %v5955_v41 = vadd.f32 %v2862_v57, %v2702_v27  ;;  %v2704_v43 = vadd.f32 %v2703_v37, %v5449_v17  ;;  %v199_v17 = vld [vmem:[%s6757_s0 + $0x70] sm:$0xff] }
 0x187   : > { %v2707_v56 = vpop.f32.mrf.mxu0  ;;  %3138 = vmatmul.mubr.bf16.gmra.mxu0 %v785_v55  ;;  %v599_v27 = vpack.c.bf16 %v215_v31, %v199_v17  ;;  %v247_v17 = vld [vmem:[%s6757_s0 + $0x1f0] sm:$0xff]  ;;  %v262_v31 = vld [vmem:[%s6757_s0 + $0x268] sm:$0xff] }
 0x188   : > { %6771 = vst [vmem:[#allocation12_spill] sm:$0xff] %v5955_v41  ;;  %v2868_v58 = vpop.f32.mrf.mxu1  ;;  %3299 = vmatmul.mubr.bf16.gmra.mxu1 %v787_v59  ;;  %v5964_v52 = vadd.f32 %v2864_v61, %v2704_v43  ;;  %v2708_v4 = vadd.f32 %v2707_v56, %v5464_v25  ;;  %3339 = vmatprep.mubr.bf16.mxu0 %v598_v28  ;;  %v246_v25 = vld [vmem:[%s6757_s0 + $0x1e8] sm:$0xff] }
 0x189   : > { %3500 = vmatprep.mubr.bf16.mxu1 %v600_v47  ;;  %v2709_v8 = vpop.f32.mrf.mxu0  ;;  %v597_v59 = vpack.c.bf16 %v213_v12, %v197_v6  ;;  %v614_v37 = vpack.c.bf16 %v246_v25, %v230_v7  ;;  %v616_v61 = vpack.c.bf16 %v248_v9, %v232_v2 }
 0x18a   : > { %6772 = vst [vmem:[#allocation13_spill] sm:$0xff] %v5964_v52  ;;  %v2870_v0 = vpop.f32.mrf.mxu1  ;;  %v5985_v40 = vadd.f32 %v2868_v58, %v2708_v4  ;;  %v2710_v49 = vadd.f32 %v2709_v8, %v5476_v34  ;;  %v229_v34 = vld [vmem:[%s6757_s0 + $0x160] sm:$0xff] }
 0x18b   : > { %v2711_v57 = vpop.f32.mrf.mxu0 }
 0x18c   : > { %v2872_v55 = vpop.f32.mrf.mxu1  ;;  %v5988_v28 = vadd.f32 %v2870_v0, %v2710_v49  ;;  %v2712_v47 = vadd.f32 %v2711_v57, %v5481_v42  ;;  %v245_v42 = vld [vmem:[%s6757_s0 + $0x1e0] sm:$0xff]  ;;  %v280_v0 = vld [vmem:[%s6757_s0 + $0x2f8] sm:$0xff] }
 0x18d   : > { %v2713_v43 = vpop.f32.mrf.mxu0  ;;  %v613_v57 = vpack.c.bf16 %v245_v42, %v229_v34 }
 0x18e   : > { %v2874_v56 = vpop.f32.mrf.mxu1  ;;  %v5991_v52 = vadd.f32 %v2872_v55, %v2712_v47  ;;  %v2714_v41 = vadd.f32 %v2713_v43, %v5496_v54  ;;  %v231_v54 = vld [vmem:[%s6757_s0 + $0x170] sm:$0xff] }
 0x18f   : > { %v2717_v58 = vpop.f32.mrf.mxu0  ;;  %3340 = vmatmul.mubr.bf16.vlgmr.msra.gmra.mxu0 %v597_v59  ;;  %v615_v55 = vpack.c.bf16 %v247_v17, %v231_v54  ;;  %v279_v54 = vld [vmem:[%s6757_s0 + $0x2f0] sm:$0xff]  ;;  %v294_v17 = vld [vmem:[%s6757_s0 + $0x368] sm:$0xff] }
 0x190   : > { %v2878_v4 = vpop.f32.mrf.mxu1  ;;  %3501 = vmatmul.mubr.bf16.vlgmr.msra.gmra.mxu1 %v599_v27  ;;  %v6000_v6 = vadd.f32 %v2874_v56, %v2714_v41  ;;  %v2718_v12 = vadd.f32 %v2717_v58, %v5511_v1  ;;  %3349 = vmatprep.mubr.bf16.mxu0 %v614_v37  ;;  %v278_v1 = vld [vmem:[%s6757_s0 + $0x2e8] sm:$0xff]  ;;  %v264_v41 = vld [vmem:[%s6757_s0 + $0x278] sm:$0xff] }
 0x191   : > { %3510 = vmatprep.mubr.bf16.mxu1 %v616_v61  ;;  %v2719_v7 = vpop.f32.mrf.mxu0  ;;  %v630_v47 = vpack.c.bf16 %v278_v1, %v262_v31  ;;  %v632_v37 = vpack.c.bf16 %v280_v0, %v264_v41  ;;  %v312_v1 = vld [vmem:[%s6757_s0 + $0x3f8] sm:$0xff] }
 0x192   : > { %v2880_v8 = vpop.f32.mrf.mxu1  ;;  %v6021_v25 = vadd.f32 %v2878_v4, %v2718_v12  ;;  %v2720_v2 = vadd.f32 %v2719_v7, %v5520_v10  ;;  %v261_v10 = vld [vmem:[%s6757_s0 + $0x260] sm:$0xff] }
 0x193   : > { %v2721_v9 = vpop.f32.mrf.mxu0 }
 0x194   : > { %v2882_v49 = vpop.f32.mrf.mxu1  ;;  %v6024_v59 = vadd.f32 %v2880_v8, %v2720_v2  ;;  %v2722_v27 = vadd.f32 %v2721_v9, %v5525_v20  ;;  %v277_v20 = vld [vmem:[%s6757_s0 + $0x2e0] sm:$0xff]  ;;  %v296_v8 = vld [vmem:[%s6757_s0 + $0x378] sm:$0xff] }
 0x195   : > { %v2723_v61 = vpop.f32.mrf.mxu0 }
 0x196   : > { %v2884_v43 = vpop.f32.mrf.mxu1  ;;  %v6027_v56 = vadd.f32 %v2882_v49, %v2722_v27  ;;  %v2724_v58 = vadd.f32 %v2723_v61, %v5543_v32  ;;  %v263_v32 = vld [vmem:[%s6757_s0 + $0x270] sm:$0xff]  ;;  %v629_v49 = vpack.c.bf16 %v277_v20, %v261_v10 }
 0x197   : > { %v2727_v4 = vpop.f32.mrf.mxu0  ;;  %3350 = vmatmul.mubr.bf16.gmra.mxu0 %v613_v57  ;;  %v631_v57 = vpack.c.bf16 %v279_v54, %v263_v32  ;;  %v311_v32 = vld [vmem:[%s6757_s0 + $0x3f0] sm:$0xff]  ;;  %v326_v54 = vld [vmem:[%s6757_s0 + $0x468] sm:$0xff] }
 0x198   : > { %v2888_v12 = vpop.f32.mrf.mxu1  ;;  %3511 = vmatmul.mubr.bf16.gmra.mxu1 %v615_v55  ;;  %v6036_v34 = vadd.f32 %v2884_v43, %v2724_v58  ;;  %v2728_v42 = vadd.f32 %v2727_v4, %v5560_v44  ;;  %3359 = vmatprep.mubr.bf16.mxu0 %v630_v47  ;;  %v310_v44 = vld [vmem:[%s6757_s0 + $0x3e8] sm:$0xff] }
 0x199   : > { %3520 = vmatprep.mubr.bf16.mxu1 %v632_v37  ;;  %v2729_v31 = vpop.f32.mrf.mxu0  ;;  %v646_v47 = vpack.c.bf16 %v310_v44, %v294_v17  ;;  %v648_v37 = vpack.c.bf16 %v312_v1, %v296_v8  ;;  %v344_v44 = vld [vmem:[%s6757_s0 + $0x4f8] sm:$0xff] }
 0x19a   : > { %v2890_v7 = vpop.f32.mrf.mxu1  ;;  %v6057_v41 = vadd.f32 %v2888_v12, %v2728_v42  ;;  %v2730_v0 = vadd.f32 %v2729_v31, %v5564_v53  ;;  %v293_v53 = vld [vmem:[%s6757_s0 + $0x360] sm:$0xff] }
 0x19b   : > { %v2731_v2 = vpop.f32.mrf.mxu0 }
 0x19c   : > { %v2892_v9 = vpop.f32.mrf.mxu1  ;;  %v6060_v55 = vadd.f32 %v2890_v7, %v2730_v0  ;;  %v2732_v27 = vadd.f32 %v2731_v2, %v5569_v62  ;;  %v309_v62 = vld [vmem:[%s6757_s0 + $0x3e0] sm:$0xff]  ;;  %v328_v7 = vld [vmem:[%s6757_s0 + $0x478] sm:$0xff] }
 0x19d   : > { %v2733_v61 = vpop.f32.mrf.mxu0 }
 0x19e   : > { %v2894_v43 = vpop.f32.mrf.mxu1  ;;  %v6063_v58 = vadd.f32 %v2892_v9, %v2732_v27  ;;  %v2734_v4 = vadd.f32 %v2733_v61, %v5586_v13  ;;  %v295_v13 = vld [vmem:[%s6757_s0 + $0x370] sm:$0xff]  ;;  %v645_v9 = vpack.c.bf16 %v309_v62, %v293_v53 }
 0x19f   : > { %v2737_v12 = vpop.f32.mrf.mxu0  ;;  %3360 = vmatmul.mubr.bf16.gmra.mxu0 %v629_v49  ;;  %v647_v49 = vpack.c.bf16 %v311_v32, %v295_v13  ;;  %v343_v13 = vld [vmem:[%s6757_s0 + $0x4f0] sm:$0xff]  ;;  %v358_v32 = vld [vmem:[%s6757_s0 + $0x568] sm:$0xff] }
 0x1a0   : > { %v2898_v42 = vpop.f32.mrf.mxu1  ;;  %3521 = vmatmul.mubr.bf16.gmra.mxu1 %v631_v57  ;;  %v6072_v10 = vadd.f32 %v2894_v43, %v2734_v4  ;;  %v2738_v20 = vadd.f32 %v2737_v12, %v5603_v26  ;;  %3369 = vmatprep.mubr.bf16.mxu0 %v646_v47  ;;  %v342_v26 = vld [vmem:[%s6757_s0 + $0x4e8] sm:$0xff] }
 0x1a1   : > { %3530 = vmatprep.mubr.bf16.mxu1 %v648_v37  ;;  %v2739_v17 = vpop.f32.mrf.mxu0  ;;  %v662_v47 = vpack.c.bf16 %v342_v26, %v326_v54  ;;  %v664_v37 = vpack.c.bf16 %v344_v44, %v328_v7  ;;  %v376_v26 = vld [vmem:[%s6757_s0 + $0x5f8] sm:$0xff] }
 0x1a2   : > { %v2900_v31 = vpop.f32.mrf.mxu1  ;;  %v6093_v8 = vadd.f32 %v2898_v42, %v2738_v20  ;;  %v2740_v1 = vadd.f32 %v2739_v17, %v5608_v36  ;;  %v325_v36 = vld [vmem:[%s6757_s0 + $0x460] sm:$0xff] }
 0x1a3   : > { %v2741_v0 = vpop.f32.mrf.mxu0 }
 0x1a4   : > { %v2902_v2 = vpop.f32.mrf.mxu1  ;;  %v6096_v57 = vadd.f32 %v2900_v31, %v2740_v1  ;;  %v2742_v27 = vadd.f32 %v2741_v0, %v5613_v46  ;;  %v341_v46 = vld [vmem:[%s6757_s0 + $0x4e0] sm:$0xff]  ;;  %v360_v31 = vld [vmem:[%s6757_s0 + $0x578] sm:$0xff] }
 0x1a5   : > { %v2743_v61 = vpop.f32.mrf.mxu0 }
 0x1a6   : > { %v2904_v43 = vpop.f32.mrf.mxu1  ;;  %v6099_v4 = vadd.f32 %v2902_v2, %v2742_v27  ;;  %v2744_v12 = vadd.f32 %v2743_v61, %v5630_v60  ;;  %v327_v60 = vld [vmem:[%s6757_s0 + $0x470] sm:$0xff]  ;;  %v661_v2 = vpack.c.bf16 %v341_v46, %v325_v36 }
 0x1a7   : > { %v2747_v42 = vpop.f32.mrf.mxu0  ;;  %3370 = vmatmul.mubr.bf16.gmra.mxu0 %v645_v9  ;;  %v663_v9 = vpack.c.bf16 %v343_v13, %v327_v60  ;;  %v375_v60 = vld [vmem:[%s6757_s0 + $0x5f0] sm:$0xff]  ;;  %v390_v13 = vld [vmem:[%s6757_s0 + $0x668] sm:$0xff] }
 0x1a8   : > { %v2908_v20 = vpop.f32.mrf.mxu1  ;;  %3531 = vmatmul.mubr.bf16.gmra.mxu1 %v647_v49  ;;  %v6108_v53 = vadd.f32 %v2904_v43, %v2744_v12  ;;  %v2748_v62 = vadd.f32 %v2747_v42, %v5647_v11  ;;  %3379 = vmatprep.mubr.bf16.mxu0 %v662_v47  ;;  %v374_v11 = vld [vmem:[%s6757_s0 + $0x5e8] sm:$0xff] }
 0x1a9   : > { %3540 = vmatprep.mubr.bf16.mxu1 %v664_v37  ;;  %v2749_v54 = vpop.f32.mrf.mxu0  ;;  %v678_v47 = vpack.c.bf16 %v374_v11, %v358_v32  ;;  %v680_v37 = vpack.c.bf16 %v376_v26, %v360_v31  ;;  %v408_v11 = vld [vmem:[%s6757_s0 + $0x6f8] sm:$0xff] }
 0x1aa   : > { %v2910_v17 = vpop.f32.mrf.mxu1  ;;  %v6129_v7 = vadd.f32 %v2908_v20, %v2748_v62  ;;  %v2750_v44 = vadd.f32 %v2749_v54, %v5652_v23  ;;  %v357_v23 = vld [vmem:[%s6757_s0 + $0x560] sm:$0xff] }
 0x1ab   : > { %v2751_v1 = vpop.f32.mrf.mxu0 }
 0x1ac   : > { %v2912_v0 = vpop.f32.mrf.mxu1  ;;  %v6132_v49 = vadd.f32 %v2910_v17, %v2750_v44  ;;  %v2752_v27 = vadd.f32 %v2751_v1, %v5657_v35  ;;  %v373_v35 = vld [vmem:[%s6757_s0 + $0x5e0] sm:$0xff]  ;;  %v392_v17 = vld [vmem:[%s6757_s0 + $0x678] sm:$0xff] }
 0x1ad   : > { %v2753_v61 = vpop.f32.mrf.mxu0 }
 0x1ae   : > { %v2914_v43 = vpop.f32.mrf.mxu1  ;;  %v6135_v12 = vadd.f32 %v2912_v0, %v2752_v27  ;;  %v2754_v42 = vadd.f32 %v2753_v61, %v5674_v50  ;;  %v359_v50 = vld [vmem:[%s6757_s0 + $0x570] sm:$0xff]  ;;  %v677_v0 = vpack.c.bf16 %v373_v35, %v357_v23 }
 0x1af   : > { %v2757_v20 = vpop.f32.mrf.mxu0  ;;  %3380 = vmatmul.mubr.bf16.gmra.mxu0 %v661_v2  ;;  %v679_v2 = vpack.c.bf16 %v375_v60, %v359_v50  ;;  %v407_v50 = vld [vmem:[%s6757_s0 + $0x6f0] sm:$0xff]  ;;  %v422_v60 = vld [vmem:[%s6757_s0 + $0x768] sm:$0xff] }
 0x1b0   : > { %v2918_v62 = vpop.f32.mrf.mxu1  ;;  %3541 = vmatmul.mubr.bf16.gmra.mxu1 %v663_v9  ;;  %v6144_v36 = vadd.f32 %v2914_v43, %v2754_v42  ;;  %v2758_v46 = vadd.f32 %v2757_v20, %v5691_v3  ;;  %3389 = vmatprep.mubr.bf16.mxu0 %v678_v47  ;;  %v406_v3 = vld [vmem:[%s6757_s0 + $0x6e8] sm:$0xff] }
 0x1b1   : > { %3550 = vmatprep.mubr.bf16.mxu1 %v680_v37  ;;  %v2759_v32 = vpop.f32.mrf.mxu0  ;;  %v694_v47 = vpack.c.bf16 %v406_v3, %v390_v13  ;;  %v696_v37 = vpack.c.bf16 %v408_v11, %v392_v17  ;;  %v440_v3 = vld [vmem:[%s6757_s0 + $0x7f8] sm:$0xff] }
 0x1b2   : > { %v2920_v54 = vpop.f32.mrf.mxu1  ;;  %v6165_v31 = vadd.f32 %v2918_v62, %v2758_v46  ;;  %v2760_v26 = vadd.f32 %v2759_v32, %v5696_v16  ;;  %v389_v16 = vld [vmem:[%s6757_s0 + $0x660] sm:$0xff] }
 0x1b3   : > { %v2761_v44 = vpop.f32.mrf.mxu0 }
 0x1b4   : > { %v2922_v1 = vpop.f32.mrf.mxu1  ;;  %v6168_v9 = vadd.f32 %v2920_v54, %v2760_v26  ;;  %v2762_v27 = vadd.f32 %v2761_v44, %v5701_v29  ;;  %v405_v29 = vld [vmem:[%s6757_s0 + $0x6e0] sm:$0xff]  ;;  %v424_v54 = vld [vmem:[%s6757_s0 + $0x778] sm:$0xff] }
 0x1b5   : > { %v2763_v61 = vpop.f32.mrf.mxu0 }
 0x1b6   : > { %v2924_v43 = vpop.f32.mrf.mxu1  ;;  %v6171_v42 = vadd.f32 %v2922_v1, %v2762_v27  ;;  %v2764_v20 = vadd.f32 %v2763_v61, %v5718_v45  ;;  %v391_v45 = vld [vmem:[%s6757_s0 + $0x670] sm:$0xff]  ;;  %v693_v1 = vpack.c.bf16 %v405_v29, %v389_v16 }
 0x1b7   : > { %v2767_v62 = vpop.f32.mrf.mxu0  ;;  %3390 = vmatmul.mubr.bf16.gmra.mxu0 %v677_v0  ;;  %v695_v0 = vpack.c.bf16 %v407_v50, %v391_v45  ;;  %v439_v45 = vld [vmem:[%s6757_s0 + $0x7f0] sm:$0xff]  ;;  %v454_v50 = vld [vmem:[%s6757_s0 + $0x868] sm:$0xff] }
 0x1b8   : > { %v2928_v46 = vpop.f32.mrf.mxu1  ;;  %3551 = vmatmul.mubr.bf16.gmra.mxu1 %v679_v2  ;;  %v6180_v23 = vadd.f32 %v2924_v43, %v2764_v20  ;;  %v2768_v35 = vadd.f32 %v2767_v62, %v5735_v63  ;;  %3399 = vmatprep.mubr.bf16.mxu0 %v694_v47  ;;  %v438_v63 = vld [vmem:[%s6757_s0 + $0x7e8] sm:$0xff] }
 0x1b9   : > { %3560 = vmatprep.mubr.bf16.mxu1 %v696_v37  ;;  %v2769_v13 = vpop.f32.mrf.mxu0  ;;  %v710_v47 = vpack.c.bf16 %v438_v63, %v422_v60  ;;  %v712_v37 = vpack.c.bf16 %v440_v3, %v424_v54  ;;  %v472_v63 = vld [vmem:[%s6757_s0 + $0x8f8] sm:$0xff] }
 0x1ba   : > { %v2930_v32 = vpop.f32.mrf.mxu1  ;;  %v6201_v17 = vadd.f32 %v2928_v46, %v2768_v35  ;;  %v2770_v11 = vadd.f32 %v2769_v13, %v5740_v15  ;;  %v421_v15 = vld [vmem:[%s6757_s0 + $0x760] sm:$0xff] }
 0x1bb   : > { %v2771_v26 = vpop.f32.mrf.mxu0 }
 0x1bc   : > { %v2932_v44 = vpop.f32.mrf.mxu1  ;;  %v6204_v2 = vadd.f32 %v2930_v32, %v2770_v11  ;;  %v2772_v27 = vadd.f32 %v2771_v26, %v5745_v30  ;;  %v437_v30 = vld [vmem:[%s6757_s0 + $0x7e0] sm:$0xff]  ;;  %v456_v32 = vld [vmem:[%s6757_s0 + $0x878] sm:$0xff] }
 0x1bd   : > { %v2773_v61 = vpop.f32.mrf.mxu0 }
 0x1be   : > { %v2934_v43 = vpop.f32.mrf.mxu1  ;;  %v6207_v20 = vadd.f32 %v2932_v44, %v2772_v27  ;;  %v2774_v62 = vadd.f32 %v2773_v61, %v5762_v48  ;;  %v423_v48 = vld [vmem:[%s6757_s0 + $0x770] sm:$0xff]  ;;  %v709_v44 = vpack.c.bf16 %v437_v30, %v421_v15  ;;  %v6775_v27 = vld [vmem:[#allocation3_spill] sm:$0xff]  ;;  %v728_v61 = vpack.c.bf16 %v472_v63, %v456_v32 }
 0x1bf   : > { %v2777_v46 = vpop.f32.mrf.mxu0  ;;  %3400 = vmatmul.mubr.bf16.gmra.mxu0 %v693_v1  ;;  %v711_v1 = vpack.c.bf16 %v439_v45, %v423_v48  ;;  %v469_v15 = vld [vmem:[%s6757_s0 + $0x8e0] sm:$0xff]  ;;  %v471_v45 = vld [vmem:[%s6757_s0 + $0x8f0] sm:$0xff] }
 0x1c0   : > { %6773 = vst [vmem:[#allocation14_spill] sm:$0xff] %v6207_v20  ;;  %v2938_v35 = vpop.f32.mrf.mxu1  ;;  %3561 = vmatmul.mubr.bf16.gmra.mxu1 %v695_v0  ;;  %v6216_v16 = vadd.f32 %v2934_v43, %v2774_v62  ;;  %v2778_v29 = vadd.f32 %v2777_v46, %v5779_v5  ;;  %3409 = vmatprep.mubr.bf16.mxu0 %v710_v47  ;;  %v470_v5 = vld [vmem:[%s6757_s0 + $0x8e8] sm:$0xff] }
 0x1c1   : > { %3570 = vmatprep.mubr.bf16.mxu1 %v712_v37  ;;  %v2779_v60 = vpop.f32.mrf.mxu0  ;;  %v726_v37 = vpack.c.bf16 %v470_v5, %v454_v50  ;;  %v486_v50 = vld [vmem:[%s6757_s0 + $0x968] sm:$0xff]  ;;  %v504_v5 = vld [vmem:[%s6757_s0 + $0x9f8] sm:$0xff] }
 0x1c2   : > { %6774 = vst [vmem:[#allocation15_spill] sm:$0xff] %v6216_v16  ;;  %v2940_v13 = vpop.f32.mrf.mxu1  ;;  %v6237_v54 = vadd.f32 %v2938_v35, %v2778_v29  ;;  %v2780_v3 = vadd.f32 %v2779_v60, %v5784_v22  ;;  %v6777_v16 = vld [vmem:[#allocation4_spill] sm:$0xff]  ;;  %v453_v22 = vld [vmem:[%s6757_s0 + $0x860] sm:$0xff] }
 0x1c3   : > { %v2781_v11 = vpop.f32.mrf.mxu0 }
 0x1c4   : > { %v2942_v26 = vpop.f32.mrf.mxu1  ;;  %v6240_v0 = vadd.f32 %v2940_v13, %v2780_v3  ;;  %v2782_v47 = vadd.f32 %v2781_v11, %v6775_v27  ;;  %v6781_v27 = vld [vmem:[#allocation5_spill] sm:$0xff] }
 0x1c5   : > { %v2783_v43 = vpop.f32.mrf.mxu0 }
 0x1c6   : > { %v2944_v62 = vpop.f32.mrf.mxu1  ;;  %v6243_v46 = vadd.f32 %v2942_v26, %v2782_v47  ;;  %v2784_v20 = vadd.f32 %v2783_v43, %v6777_v16  ;;  %v455_v16 = vld [vmem:[%s6757_s0 + $0x870] sm:$0xff]  ;;  %v725_v26 = vpack.c.bf16 %v469_v15, %v453_v22  ;;  %v501_v22 = vld [vmem:[%s6757_s0 + $0x9e0] sm:$0xff] }
 0x1c7   : > { %v2787_v35 = vpop.f32.mrf.mxu0  ;;  %3410 = vmatmul.mubr.bf16.gmra.mxu0 %v709_v44  ;;  %v727_v44 = vpack.c.bf16 %v471_v45, %v455_v16  ;;  %v6785_v16 = vld [vmem:[#allocation7_spill] sm:$0xff] }
 0x1c8   : > { %6776 = vst [vmem:[#allocation3_spill] sm:$0xff] %v6243_v46  ;;  %v2948_v29 = vpop.f32.mrf.mxu1  ;;  %3571 = vmatmul.mubr.bf16.gmra.mxu1 %v711_v1  ;;  %v6252_v30 = vadd.f32 %v2944_v62, %v2784_v20  ;;  %v2788_v48 = vadd.f32 %v2787_v35, %v5823_v21  ;;  %3419 = vmatprep.mubr.bf16.mxu0 %v726_v37  ;;  %v502_v21 = vld [vmem:[%s6757_s0 + $0x9e8] sm:$0xff]  ;;  %v488_v20 = vld [vmem:[%s6757_s0 + $0x978] sm:$0xff] }
 0x1c9   : > { %3580 = vmatprep.mubr.bf16.mxu1 %v728_v61  ;;  %v2789_v60 = vpop.f32.mrf.mxu0  ;;  %v742_v37 = vpack.c.bf16 %v502_v21, %v486_v50  ;;  %v744_v61 = vpack.c.bf16 %v504_v5, %v488_v20  ;;  %v503_v50 = vld [vmem:[%s6757_s0 + $0x9f0] sm:$0xff]  ;;  %v520_v20 = vld [vmem:[%s6757_s0 + $0xa78] sm:$0xff] }
 0x1ca   : > { %6778 = vst [vmem:[#allocation4_spill] sm:$0xff] %v6252_v30  ;;  %v2950_v13 = vpop.f32.mrf.mxu1  ;;  %v6273_v32 = vadd.f32 %v2948_v29, %v2788_v48  ;;  %v2790_v63 = vadd.f32 %v2789_v60, %v5826_v51  ;;  %v6783_v30 = vld [vmem:[#allocation6_spill] sm:$0xff]  ;;  %v485_v51 = vld [vmem:[%s6757_s0 + $0x960] sm:$0xff]  ;;  %v518_v60 = vld [vmem:[%s6757_s0 + $0xa68] sm:$0xff] }
 0x1cb   : > { %v2791_v3 = vpop.f32.mrf.mxu0  ;;  %v536_v5 = vld [vmem:[%s6757_s0 + $0xaf8] sm:$0xff] }
 0x1cc   : > { %6779 = vst [vmem:[#allocation16_spill] sm:$0xff] %v6273_v32  ;;  %v2952_v11 = vpop.f32.mrf.mxu1  ;;  %v6276_v1 = vadd.f32 %v2950_v13, %v2790_v63  ;;  %v2792_v47 = vadd.f32 %v2791_v3, %v6781_v27  ;;  %v6786_v3 = vld [vmem:[#allocation8_spill] sm:$0xff]  ;;  %v741_v27 = vpack.c.bf16 %v501_v22, %v485_v51  ;;  %v517_v51 = vld [vmem:[%s6757_s0 + $0xa60] sm:$0xff] }
 0x1cd   : > { %v2793_v43 = vpop.f32.mrf.mxu0  ;;  %v533_v22 = vld [vmem:[%s6757_s0 + $0xae0] sm:$0xff] }
 0x1ce   : > { %6780 = vst [vmem:[#allocation17_spill] sm:$0xff] %v6276_v1  ;;  %v2954_v62 = vpop.f32.mrf.mxu1  ;;  %v6279_v35 = vadd.f32 %v2952_v11, %v2792_v47  ;;  %v2794_v46 = vadd.f32 %v2793_v43, %v6783_v30  ;;  %v487_v30 = vld [vmem:[%s6757_s0 + $0x970] sm:$0xff]  ;;  %v6788_v1 = vld [vmem:[#allocation10_spill] sm:$0xff] }
 0x1cf   : > { %v2797_v29 = vpop.f32.mrf.mxu0  ;;  %3420 = vmatmul.mubr.bf16.gmra.mxu0 %v725_v26  ;;  %v743_v47 = vpack.c.bf16 %v503_v50, %v487_v30 }
 0x1d0   : > { %6782 = vst [vmem:[#allocation5_spill] sm:$0xff] %v6279_v35  ;;  %v2958_v48 = vpop.f32.mrf.mxu1  ;;  %3581 = vmatmul.mubr.bf16.gmra.mxu1 %v727_v44  ;;  %v6288_v15 = vadd.f32 %v2954_v62, %v2794_v46  ;;  %v2798_v45 = vadd.f32 %v2797_v29, %v6785_v16  ;;  %3429 = vmatprep.mubr.bf16.mxu0 %v742_v37  ;;  %v534_v46 = vld [vmem:[%s6757_s0 + $0xae8] sm:$0xff] }
 0x1d1   : > { %3590 = vmatprep.mubr.bf16.mxu1 %v744_v61  ;;  %v2799_v13 = vpop.f32.mrf.mxu0  ;;  %v6787_v61 = vld [vmem:[#allocation9_spill] sm:$0xff]  ;;  %v758_v62 = vpack.c.bf16 %v534_v46, %v518_v60  ;;  %v760_v29 = vpack.c.bf16 %v536_v5, %v520_v20 }
 0x1d2   : > { %6784 = vst [vmem:[#allocation6_spill] sm:$0xff] %v6288_v15  ;;  %v2960_v21 = vpop.f32.mrf.mxu1  ;;  %v6309_v63 = vadd.f32 %v2958_v48, %v2798_v45  ;;  %v2800_v11 = vadd.f32 %v2799_v13, %v6786_v3  ;;  %v535_v60 = vld [vmem:[%s6757_s0 + $0xaf0] sm:$0xff]  ;;  %v550_v13 = vld [vmem:[%s6757_s0 + $0xb68] sm:$0xff] }
 0x1d3   : > { %v2801_v26 = vpop.f32.mrf.mxu0 }
 0x1d4   : > { %v2962_v44 = vpop.f32.mrf.mxu1  ;;  %v6312_v37 = vadd.f32 %v2960_v21, %v2800_v11  ;;  %v2802_v43 = vadd.f32 %v2801_v26, %v6787_v61  ;;  %v757_v26 = vpack.c.bf16 %v533_v22, %v517_v51  ;;  %v565_v22 = vld [vmem:[%s6757_s0 + $0xbe0] sm:$0xff] }
 0x1d5   : > { %v2803_v16 = vpop.f32.mrf.mxu0 }
 0x1d6   : > { %v2964_v15 = vpop.f32.mrf.mxu1  ;;  %v6315_v35 = vadd.f32 %v2962_v44, %v2802_v43  ;;  %v2804_v32 = vadd.f32 %v2803_v16, %v6788_v1  ;;  %v519_v1 = vld [vmem:[%s6757_s0 + $0xa70] sm:$0xff] }
 0x1d7   : > { %v2807_v48 = vpop.f32.mrf.mxu0  ;;  %3430 = vmatmul.mubr.bf16.gmra.mxu0 %v741_v27  ;;  %v759_v44 = vpack.c.bf16 %v535_v60, %v519_v1  ;;  %v551_v1 = vld [vmem:[%s6757_s0 + $0xb70] sm:$0xff] }
 0x1d8   : > { %v2968_v45 = vpop.f32.mrf.mxu1  ;;  %3591 = vmatmul.mubr.bf16.gmra.mxu1 %v743_v47  ;;  %v6324_v30 = vadd.f32 %v2964_v15, %v2804_v32  ;;  %v2808_v50 = vadd.f32 %v2807_v48, %v5895_v24  ;;  %3439 = vmatprep.mubr.bf16.mxu0 %v758_v62  ;;  %v566_v24 = vld [vmem:[%s6757_s0 + $0xbe8] sm:$0xff]  ;;  %v552_v32 = vld [vmem:[%s6757_s0 + $0xb78] sm:$0xff]  ;;  %v6790_v48 = vld [vmem:[#allocation11_spill] sm:$0xff] }
 0x1d9   : > { %3600 = vmatprep.mubr.bf16.mxu1 %v760_v29  ;;  %v2809_v21 = vpop.f32.mrf.mxu0  ;;  %v568_v15 = vld [vmem:[%s6757_s0 + $0xbf8] sm:$0xff]  ;;  %v774_v61 = vpack.c.bf16 %v566_v24, %v550_v13  ;;  %v567_v60 = vld [vmem:[%s6757_s0 + $0xbf0] sm:$0xff] }
 0x1da   : > { %6789 = vst [vmem:[#allocation7_spill] sm:$0xff] %v6324_v30  ;;  %v2970_v46 = vpop.f32.mrf.mxu1  ;;  %v6345_v20 = vadd.f32 %v2968_v45, %v2808_v50  ;;  %v2810_v5 = vadd.f32 %v2809_v21, %v5898_v38  ;;  %v776_v43 = vpack.c.bf16 %v568_v15, %v552_v32  ;;  %v549_v38 = vld [vmem:[%s6757_s0 + $0xb60] sm:$0xff] }
 0x1db   : > { %v2811_v3 = vpop.f32.mrf.mxu0 }
 0x1dc   : > { %v2972_v11 = vpop.f32.mrf.mxu1  ;;  %v6348_v27 = vadd.f32 %v2970_v46, %v2810_v5  ;;  %v2812_v47 = vadd.f32 %v2811_v3, %v5901_v39  ;;  %v773_v5 = vpack.c.bf16 %v565_v22, %v549_v38  ;;  %v775_v3 = vpack.c.bf16 %v567_v60, %v551_v1 }
 0x1dd   : > { %v2813_v62 = vpop.f32.mrf.mxu0 }
 0x1de   : > { %v2974_v29 = vpop.f32.mrf.mxu1  ;;  %v6351_v16 = vadd.f32 %v2972_v11, %v2812_v47  ;;  %v2814_v30 = vadd.f32 %v2813_v62, %v6790_v48  ;;  %v583_v48 = vld [vmem:[%s6757_s0 + $0xc70] sm:$0xf] }
 0x1df   : > { %v2817_v45 = vpop.f32.mrf.mxu0  ;;  %3440 = vmatmul.mubr.bf16.gmra.mxu0 %v757_v26 }
 0x1e0   : > { %v2978_v50 = vpop.f32.mrf.mxu1  ;;  %3601 = vmatmul.mubr.bf16.gmra.mxu1 %v759_v44  ;;  %v6357_v51 = vadd.f32 %v2974_v29, %v2814_v30  ;;  %v2818_v39 = vadd.f32 %v2817_v45, %v5925_v18  ;;  %3449 = vmatprep.mubr.bf16.mxu0 %v774_v61  ;;  %v582_v18 = vld [vmem:[%s6757_s0 + $0xc68] sm:$0xf]  ;;  %v584_v30 = vld [vmem:[%s6757_s0 + $0xc78] sm:$0xf] }
 0x1e1   : > { %3610 = vmatprep.mubr.bf16.mxu1 %v776_v43  ;;  %v2819_v13 = vpop.f32.mrf.mxu0  ;;  %v790_v26 = vpack.c.bf16 %v582_v18, %v582_v18  ;;  %v792_v44 = vpack.c.bf16 %v584_v30, %v584_v30 }
 0x1e2   : > { %v2980_v21 = vpop.f32.mrf.mxu1  ;;  %v6375_v46 = vadd.f32 %v2978_v50, %v2818_v39  ;;  %v2820_v24 = vadd.f32 %v2819_v13, %v5928_v33  ;;  %v581_v33 = vld [vmem:[%s6757_s0 + $0xc60] sm:$0xf] }
 0x1e3   : > { %v2821_v32 = vpop.f32.mrf.mxu0  ;;  %v789_v60 = vpack.c.bf16 %v581_v33, %v581_v33 }
 0x1e4   : > { %v2982_v15 = vpop.f32.mrf.mxu1  ;;  %v6378_v11 = vadd.f32 %v2980_v21, %v2820_v24  ;;  %v6791_v21 = vld [vmem:[#allocation12_spill] sm:$0xff] }
 0x1e5   : > { %v2822_v47 = vpop.f32.mrf.mxu0  ;;  %v6792_v15 = vld [vmem:[#allocation13_spill] sm:$0xff] }
 0x1e6   : > { %v2983_v61 = vpop.f32.mrf.mxu1 }
 0x1e7   : > { %v3019_v43 = vpop.f32.mrf.mxu0  ;;  %3450 = vmatmul.mubr.bf16.gmra.mxu0 %v773_v5 }
 0x1e8   : > { %v3180_v62 = vpop.f32.mrf.mxu1  ;;  %3611 = vmatmul.mubr.bf16.gmra.mxu1 %v775_v3  ;;  %v3020_v29 = vadd.f32 %v3019_v43, %v5949_v14  ;;  %3459 = vmatprep.mubr.bf16.mxu0 %v790_v26  ;;  %v791_v14 = vpack.c.bf16 %v583_v48, %v583_v48 }
 0x1e9   : > { %3620 = vmatprep.mubr.bf16.mxu1 %v792_v44  ;;  %v3021_v45 = vpop.f32.mrf.mxu0 }
 0x1ea   : > { %v3182_v50 = vpop.f32.mrf.mxu1  ;;  %v6387_v38 = vadd.f32 %v3180_v62, %v3020_v29  ;;  %v3022_v39 = vadd.f32 %v3021_v45, %v5952_v19 }
 0x1eb   : > { %v3023_v22 = vpop.f32.mrf.mxu0 }
 0x1ec   : > { %v3184_v1 = vpop.f32.mrf.mxu1  ;;  %v6390_v13 = vadd.f32 %v3182_v50, %v3022_v39  ;;  %v3024_v18 = vadd.f32 %v3023_v22, %v6791_v21 }
 0x1ed   : > { %v3025_v30 = vpop.f32.mrf.mxu0 }
 0x1ee   : > { %v3186_v24 = vpop.f32.mrf.mxu1  ;;  %v6393_v32 = vadd.f32 %v3184_v1, %v3024_v18  ;;  %v3026_v5 = vadd.f32 %v3025_v30, %v6792_v15 }
 0x1ef   : > { %v3029_v3 = vpop.f32.mrf.mxu0  ;;  %3460 = vmatmul.mubr.bf16.gmra.mxu0 %v789_v60 }
 0x1f0   : > { %v3190_v26 = vpop.f32.mrf.mxu1  ;;  %3621 = vmatmul.mubr.bf16.gmra.mxu1 %v791_v14  ;;  %v6396_v44 = vadd.f32 %v3186_v24, %v3026_v5  ;;  %v3030_v19 = vadd.f32 %v3029_v3, %v5985_v40 }
 0x1f1   : > { %v3031_v47 = vpop.f32.mrf.mxu0 }
 0x1f2   : > { %v3192_v61 = vpop.f32.mrf.mxu1  ;;  %v6399_v43 = vadd.f32 %v3190_v26, %v3030_v19  ;;  %v3032_v62 = vadd.f32 %v3031_v47, %v5988_v28 }
 0x1f3   : > { %v3033_v29 = vpop.f32.mrf.mxu0 }
 0x1f4   : > { %v3194_v33 = vpop.f32.mrf.mxu1  ;;  %v6402_v48 = vadd.f32 %v3192_v61, %v3032_v62  ;;  %v3034_v45 = vadd.f32 %v3033_v29, %v5991_v52 }
 0x1f5   : > { %v3035_v50 = vpop.f32.mrf.mxu0 }
 0x1f6   : > { %v3196_v39 = vpop.f32.mrf.mxu1  ;;  %v6405_v22 = vadd.f32 %v3194_v33, %v3034_v45  ;;  %v3036_v1 = vadd.f32 %v3035_v50, %v6000_v6 }
 0x1f7   : > { %v3039_v60 = vpop.f32.mrf.mxu0 }
 0x1f8   : > { %v3200_v40 = vpop.f32.mrf.mxu1  ;;  %v6408_v14 = vadd.f32 %v3196_v39, %v3036_v1  ;;  %v3040_v21 = vadd.f32 %v3039_v60, %v6021_v25 }
 0x1f9   : > { %v3041_v18 = vpop.f32.mrf.mxu0 }
 0x1fa   : > { %v3202_v28 = vpop.f32.mrf.mxu1  ;;  %v6411_v30 = vadd.f32 %v3200_v40, %v3040_v21  ;;  %v3042_v24 = vadd.f32 %v3041_v18, %v6024_v59 }
 0x1fb   : > { %v3043_v15 = vpop.f32.mrf.mxu0 }
 0x1fc   : > { %v3204_v52 = vpop.f32.mrf.mxu1  ;;  %v6414_v5 = vadd.f32 %v3202_v28, %v3042_v24  ;;  %v3044_v3 = vadd.f32 %v3043_v15, %v6027_v56 }
 0x1fd   : > { %v3045_v26 = vpop.f32.mrf.mxu0 }
 0x1fe   : > { %v3206_v6 = vpop.f32.mrf.mxu1  ;;  %v6417_v19 = vadd.f32 %v3204_v52, %v3044_v3  ;;  %v3046_v47 = vadd.f32 %v3045_v26, %v6036_v34 }
 0x1ff   : > { %v3049_v61 = vpop.f32.mrf.mxu0 }
 0x200   : > { %v3210_v25 = vpop.f32.mrf.mxu1  ;;  %v6420_v62 = vadd.f32 %v3206_v6, %v3046_v47  ;;  %v3050_v29 = vadd.f32 %v3049_v61, %v6057_v41 }
 0x201   : > { %v3051_v33 = vpop.f32.mrf.mxu0 }
 0x202   : > { %v3212_v59 = vpop.f32.mrf.mxu1  ;;  %v6423_v45 = vadd.f32 %v3210_v25, %v3050_v29  ;;  %v3052_v50 = vadd.f32 %v3051_v33, %v6060_v55 }
 0x203   : > { %v3053_v39 = vpop.f32.mrf.mxu0 }
 0x204   : > { %v3214_v56 = vpop.f32.mrf.mxu1  ;;  %v6426_v1 = vadd.f32 %v3212_v59, %v3052_v50  ;;  %v3054_v60 = vadd.f32 %v3053_v39, %v6063_v58 }
 0x205   : > { %v3055_v40 = vpop.f32.mrf.mxu0 }
 0x206   : > { %v3216_v34 = vpop.f32.mrf.mxu1  ;;  %v6429_v21 = vadd.f32 %v3214_v56, %v3054_v60  ;;  %v3056_v18 = vadd.f32 %v3055_v40, %v6072_v10 }
 0x207   : > { %v3059_v28 = vpop.f32.mrf.mxu0 }
 0x208   : > { %v3220_v41 = vpop.f32.mrf.mxu1  ;;  %v6432_v24 = vadd.f32 %v3216_v34, %v3056_v18  ;;  %v3060_v15 = vadd.f32 %v3059_v28, %v6093_v8 }
 0x209   : > { %v3061_v52 = vpop.f32.mrf.mxu0 }
 0x20a   : > { %v3222_v55 = vpop.f32.mrf.mxu1  ;;  %v6435_v3 = vadd.f32 %v3220_v41, %v3060_v15  ;;  %v3062_v26 = vadd.f32 %v3061_v52, %v6096_v57 }
 0x20b   : > { %v3063_v6 = vpop.f32.mrf.mxu0 }
 0x20c   : > { %v3224_v58 = vpop.f32.mrf.mxu1  ;;  %v6438_v47 = vadd.f32 %v3222_v55, %v3062_v26  ;;  %v3064_v61 = vadd.f32 %v3063_v6, %v6099_v4 }
 0x20d   : > { %v3065_v25 = vpop.f32.mrf.mxu0 }
 0x20e   : > { %v3226_v10 = vpop.f32.mrf.mxu1  ;;  %v6441_v29 = vadd.f32 %v3224_v58, %v3064_v61  ;;  %v3066_v33 = vadd.f32 %v3065_v25, %v6108_v53 }
 0x20f   : > { %v3069_v59 = vpop.f32.mrf.mxu0 }
 0x210   : > { %v3230_v8 = vpop.f32.mrf.mxu1  ;;  %v6444_v50 = vadd.f32 %v3226_v10, %v3066_v33  ;;  %v3070_v39 = vadd.f32 %v3069_v59, %v6129_v7 }
 0x211   : > { %v3071_v56 = vpop.f32.mrf.mxu0 }
 0x212   : > { %v3232_v57 = vpop.f32.mrf.mxu1  ;;  %v6447_v60 = vadd.f32 %v3230_v8, %v3070_v39  ;;  %v3072_v40 = vadd.f32 %v3071_v56, %v6132_v49 }
 0x213   : > { %v3073_v34 = vpop.f32.mrf.mxu0 }
 0x214   : > { %v3234_v4 = vpop.f32.mrf.mxu1  ;;  %v6450_v18 = vadd.f32 %v3232_v57, %v3072_v40  ;;  %v3074_v28 = vadd.f32 %v3073_v34, %v6135_v12 }
 0x215   : > { %v3075_v41 = vpop.f32.mrf.mxu0 }
 0x216   : > { %v3236_v53 = vpop.f32.mrf.mxu1  ;;  %v6453_v15 = vadd.f32 %v3234_v4, %v3074_v28  ;;  %v3076_v52 = vadd.f32 %v3075_v41, %v6144_v36 }
 0x217   : > { %v3079_v55 = vpop.f32.mrf.mxu0 }
 0x218   : > { %v3240_v7 = vpop.f32.mrf.mxu1  ;;  %v6456_v26 = vadd.f32 %v3236_v53, %v3076_v52  ;;  %v3080_v6 = vadd.f32 %v3079_v55, %v6165_v31  ;;  %v6793_v55 = vld [vmem:[#allocation14_spill] sm:$0xff] }
 0x219   : > { %v3081_v58 = vpop.f32.mrf.mxu0 }
 0x21a   : > { %v3242_v49 = vpop.f32.mrf.mxu1  ;;  %v6459_v61 = vadd.f32 %v3240_v7, %v3080_v6  ;;  %v3082_v25 = vadd.f32 %v3081_v58, %v6168_v9 }
 0x21b   : > { %v3083_v10 = vpop.f32.mrf.mxu0 }
 0x21c   : > { %v3244_v12 = vpop.f32.mrf.mxu1  ;;  %v6462_v33 = vadd.f32 %v3242_v49, %v3082_v25  ;;  %v3084_v59 = vadd.f32 %v3083_v10, %v6171_v42  ;;  %v6794_v49 = vld [vmem:[#allocation15_spill] sm:$0xff] }
 0x21d   : > { %v3085_v8 = vpop.f32.mrf.mxu0 }
 0x21e   : > { %v3246_v36 = vpop.f32.mrf.mxu1  ;;  %v6465_v39 = vadd.f32 %v3244_v12, %v3084_v59  ;;  %v3086_v56 = vadd.f32 %v3085_v8, %v6180_v23 }
 0x21f   : > { %v3089_v57 = vpop.f32.mrf.mxu0 }
 0x220   : > { %v3250_v31 = vpop.f32.mrf.mxu1  ;;  %v6468_v40 = vadd.f32 %v3246_v36, %v3086_v56  ;;  %v3090_v34 = vadd.f32 %v3089_v57, %v6201_v17 }
 0x221   : > { %v3091_v4 = vpop.f32.mrf.mxu0 }
 0x222   : > { %v3252_v9 = vpop.f32.mrf.mxu1  ;;  %v6471_v28 = vadd.f32 %v3250_v31, %v3090_v34  ;;  %v3092_v41 = vadd.f32 %v3091_v4, %v6204_v2  ;;  %v6795_v4 = vld [vmem:[#allocation3_spill] sm:$0xff] }
 0x223   : > { %v3093_v53 = vpop.f32.mrf.mxu0 }
 0x224   : > { %v3254_v42 = vpop.f32.mrf.mxu1  ;;  %v6474_v52 = vadd.f32 %v3252_v9, %v3092_v41  ;;  %v3094_v7 = vadd.f32 %v3093_v53, %v6793_v55  ;;  %v6796_v55 = vld [vmem:[#allocation4_spill] sm:$0xff] }
 0x225   : > { %v3095_v6 = vpop.f32.mrf.mxu0 }
 0x226   : > { %v3256_v23 = vpop.f32.mrf.mxu1  ;;  %v6477_v58 = vadd.f32 %v3254_v42, %v3094_v7  ;;  %v3096_v25 = vadd.f32 %v3095_v6, %v6794_v49  ;;  %v6798_v49 = vld [vmem:[#allocation16_spill] sm:$0xff] }
 0x227   : > { %v3099_v10 = vpop.f32.mrf.mxu0 }
 0x228   : > { %v3260_v17 = vpop.f32.mrf.mxu1  ;;  %v6480_v12 = vadd.f32 %v3256_v23, %v3096_v25  ;;  %v3100_v59 = vadd.f32 %v3099_v10, %v6237_v54 }
 0x229   : > { %v3101_v8 = vpop.f32.mrf.mxu0 }
 0x22a   : > { %v3262_v2 = vpop.f32.mrf.mxu1  ;;  %v6483_v36 = vadd.f32 %v3260_v17, %v3100_v59  ;;  %v3102_v56 = vadd.f32 %v3101_v8, %v6240_v0  ;;  %v6799_v59 = vld [vmem:[#allocation17_spill] sm:$0xff] }
 0x22b   : > { %v3103_v57 = vpop.f32.mrf.mxu0 }
 0x22c   : > { %v3264_v31 = vpop.f32.mrf.mxu1  ;;  %v6486_v34 = vadd.f32 %v3262_v2, %v3102_v56  ;;  %v3104_v9 = vadd.f32 %v3103_v57, %v6795_v4 }
 0x22d   : > { %v3105_v41 = vpop.f32.mrf.mxu0 }
 0x22e   : > { %v3266_v53 = vpop.f32.mrf.mxu1  ;;  %v6489_v42 = vadd.f32 %v3264_v31, %v3104_v9  ;;  %v3106_v7 = vadd.f32 %v3105_v41, %v6796_v55  ;;  %v6800_v31 = vld [vmem:[#allocation5_spill] sm:$0xff] }
 0x22f   : > { %v3109_v6 = vpop.f32.mrf.mxu0 }
 0x230   : > { %v3270_v54 = vpop.f32.mrf.mxu1  ;;  %v6492_v23 = vadd.f32 %v3266_v53, %v3106_v7  ;;  %v3110_v25 = vadd.f32 %v3109_v6, %v6798_v49  ;;  %v6801_v53 = vld [vmem:[#allocation6_spill] sm:$0xff] }
 0x231   : > { %v3111_v10 = vpop.f32.mrf.mxu0 }
 0x232   : > { %6797 = vst [vmem:[#allocation8_spill] sm:$0xff] %v6492_v23  ;;  %v3272_v0 = vpop.f32.mrf.mxu1  ;;  %v6495_v17 = vadd.f32 %v3270_v54, %v3110_v25  ;;  %v3112_v8 = vadd.f32 %v3111_v10, %v6799_v59 }
 0x233   : > { %v3113_v2 = vpop.f32.mrf.mxu0 }
 0x234   : > { %v3274_v56 = vpop.f32.mrf.mxu1  ;;  %v6498_v57 = vadd.f32 %v3272_v0, %v3112_v8  ;;  %v3114_v4 = vadd.f32 %v3113_v2, %v6800_v31 }
 0x235   : > { %v3115_v9 = vpop.f32.mrf.mxu0 }
 0x236   : > { %v3276_v41 = vpop.f32.mrf.mxu1  ;;  %v6501_v55 = vadd.f32 %v3274_v56, %v3114_v4  ;;  %v3116_v7 = vadd.f32 %v3115_v9, %v6801_v53 }
 0x237   : > { %v3119_v23 = vpop.f32.mrf.mxu0 }
 0x238   : > { %v3280_v6 = vpop.f32.mrf.mxu1  ;;  %v6504_v49 = vadd.f32 %v3276_v41, %v3116_v7  ;;  %v3120_v54 = vadd.f32 %v3119_v23, %v6309_v63  ;;  %v6803_v41 = vld [vmem:[#allocation7_spill] sm:$0xff] }
 0x239   : > { %v3121_v25 = vpop.f32.mrf.mxu0 }
 0x23a   : > { %6802 = vst [vmem:[#allocation9_spill] sm:$0xff] %v6504_v49  ;;  %v3282_v10 = vpop.f32.mrf.mxu1  ;;  %v6507_v59 = vadd.f32 %v3280_v6, %v3120_v54  ;;  %v3122_v0 = vadd.f32 %v3121_v25, %v6312_v37 }
 0x23b   : > { %v3123_v8 = vpop.f32.mrf.mxu0 }
 0x23c   : > { %v3284_v2 = vpop.f32.mrf.mxu1  ;;  %v6510_v31 = vadd.f32 %v3282_v10, %v3122_v0  ;;  %v3124_v56 = vadd.f32 %v3123_v8, %v6315_v35 }
 0x23d   : > { %v3125_v4 = vpop.f32.mrf.mxu0 }
 0x23e   : > { %v3286_v9 = vpop.f32.mrf.mxu1  ;;  %v6513_v53 = vadd.f32 %v3284_v2, %v3124_v56  ;;  %v3126_v7 = vadd.f32 %v3125_v4, %v6803_v41 }
 0x23f   : > { %v3129_v49 = vpop.f32.mrf.mxu0 }
 0x240   : > { %v3290_v63 = vpop.f32.mrf.mxu1  ;;  %v6516_v23 = vadd.f32 %v3286_v9, %v3126_v7  ;;  %v3130_v6 = vadd.f32 %v3129_v49, %v6345_v20 }
 0x241   : > { %v3131_v54 = vpop.f32.mrf.mxu0 }
 0x242   : > { %v3292_v37 = vpop.f32.mrf.mxu1  ;;  %v6519_v25 = vadd.f32 %v3290_v63, %v3130_v6  ;;  %v3132_v10 = vadd.f32 %v3131_v54, %v6348_v27 }
 0x243   : > { %v3133_v0 = vpop.f32.mrf.mxu0 }
 0x244   : > { %v3294_v35 = vpop.f32.mrf.mxu1  ;;  %v6522_v8 = vadd.f32 %v3292_v37, %v3132_v10  ;;  %v3134_v2 = vadd.f32 %v3133_v0, %v6351_v16 }
 0x245   : > { %v3135_v56 = vpop.f32.mrf.mxu0 }
 0x246   : > { %v3296_v4 = vpop.f32.mrf.mxu1  ;;  %v6525_v41 = vadd.f32 %v3294_v35, %v3134_v2  ;;  %v3136_v9 = vadd.f32 %v3135_v56, %v6357_v51 }
 0x247   : > { %v3139_v20 = vpop.f32.mrf.mxu0 }
 0x248   : > { %v3300_v49 = vpop.f32.mrf.mxu1  ;;  %v6528_v7 = vadd.f32 %v3296_v4, %v3136_v9  ;;  %v3140_v63 = vadd.f32 %v3139_v20, %v6375_v46 }
 0x249   : > { %v3141_v27 = vpop.f32.mrf.mxu0 }
 0x24a   : > { %v3302_v6 = vpop.f32.mrf.mxu1  ;;  %v6531_v54 = vadd.f32 %v3300_v49, %v3140_v63  ;;  %v3142_v37 = vadd.f32 %v3141_v27, %v6378_v11 }
 0x24b   : > { %v3143_v16 = vpop.f32.mrf.mxu0 }
 0x24c   : > { %6804 = vst [vmem:[#allocation10_spill] sm:$0xff] %v6531_v54  ;;  %v3304_v10 = vpop.f32.mrf.mxu1  ;;  %v6535_v0 = vadd.f32 %v3302_v6, %v3142_v37 }
 0x24d   : > { %v3144_v35 = vpop.f32.mrf.mxu0 }
 0x24e   : > { %v3305_v2 = vpop.f32.mrf.mxu1 }
 0x24f   : > { %v3341_v51 = vpop.f32.mrf.mxu0 }
 0x250   : > { %v3502_v56 = vpop.f32.mrf.mxu1  ;;  %v3342_v4 = vadd.f32 %v3341_v51, %v6387_v38 }
 0x251   : > { %v3343_v9 = vpop.f32.mrf.mxu0 }
 0x252   : > { %v3504_v46 = vpop.f32.mrf.mxu1  ;;  %v3503_v20 = vadd.f32 %v3502_v56, %v3342_v4  ;;  %v3344_v49 = vadd.f32 %v3343_v9, %v6390_v13 }
 0x253   : > { %v3345_v63 = vpop.f32.mrf.mxu0 }
 0x254   : > { %v3506_v54 = vpop.f32.mrf.mxu1  ;;  %3629 = vst [vmem:[%s6539_s7] sm:$0xff] %v3503_v20  ;;  %v3505_v11 = vadd.f32 %v3504_v46, %v3344_v49  ;;  %v3346_v27 = vadd.f32 %v3345_v63, %v6393_v32 }
 0x255   : > { %v3347_v6 = vpop.f32.mrf.mxu0 }
 0x256   : > { %v3508_v37 = vpop.f32.mrf.mxu1  ;;  %3630 = vst [vmem:[%s6539_s7 + $0x8] sm:$0xff] %v3505_v11  ;;  %v3507_v38 = vadd.f32 %v3506_v54, %v3346_v27  ;;  %v3348_v16 = vadd.f32 %v3347_v6, %v6396_v44 }
 0x257   : > { %v3351_v13 = vpop.f32.mrf.mxu0 }
 0x258   : > { %v3512_v10 = vpop.f32.mrf.mxu1  ;;  %3631 = vst [vmem:[%s6539_s7 + $0x10] sm:$0xff] %v3507_v38  ;;  %v3509_v35 = vadd.f32 %v3508_v37, %v3348_v16  ;;  %v3352_v2 = vadd.f32 %v3351_v13, %v6399_v43 }
 0x259   : > { %v3353_v51 = vpop.f32.mrf.mxu0 }
 0x25a   : > { %v3514_v56 = vpop.f32.mrf.mxu1  ;;  %3632 = vst [vmem:[%s6539_s7 + $0x18] sm:$0xff] %v3509_v35  ;;  %v3513_v4 = vadd.f32 %v3512_v10, %v3352_v2  ;;  %v3354_v32 = vadd.f32 %v3353_v51, %v6402_v48 }
 0x25b   : > { %v3355_v9 = vpop.f32.mrf.mxu0 }
 0x25c   : > { %v3516_v46 = vpop.f32.mrf.mxu1  ;;  %3633 = vst [vmem:[%s6539_s7 + $0x20] sm:$0xff] %v3513_v4  ;;  %v3515_v54 = vadd.f32 %v3514_v56, %v3354_v32  ;;  %v3356_v44 = vadd.f32 %v3355_v9, %v6405_v22 }
 0x25d   : > { %v3357_v20 = vpop.f32.mrf.mxu0 }
 0x25e   : > { %v3518_v49 = vpop.f32.mrf.mxu1  ;;  %3634 = vst [vmem:[%s6539_s7 + $0x28] sm:$0xff] %v3515_v54  ;;  %v3517_v63 = vadd.f32 %v3516_v46, %v3356_v44  ;;  %v3358_v43 = vadd.f32 %v3357_v20, %v6408_v14 }
 0x25f   : > { %v3361_v11 = vpop.f32.mrf.mxu0 }
 0x260   : > { %v3522_v27 = vpop.f32.mrf.mxu1  ;;  %3635 = vst [vmem:[%s6539_s7 + $0x30] sm:$0xff] %v3517_v63  ;;  %v3519_v6 = vadd.f32 %v3518_v49, %v3358_v43  ;;  %v3362_v48 = vadd.f32 %v3361_v11, %v6411_v30 }
 0x261   : > { %v3363_v37 = vpop.f32.mrf.mxu0 }
 0x262   : > { %v3524_v38 = vpop.f32.mrf.mxu1  ;;  %3636 = vst [vmem:[%s6539_s7 + $0x38] sm:$0xff] %v3519_v6  ;;  %v3523_v16 = vadd.f32 %v3522_v27, %v3362_v48  ;;  %v3364_v22 = vadd.f32 %v3363_v37, %v6414_v5 }
 0x263   : > { %v3365_v13 = vpop.f32.mrf.mxu0 }
 0x264   : > { %v3526_v10 = vpop.f32.mrf.mxu1  ;;  %3637 = vst [vmem:[%s6539_s7 + $0x40] sm:$0xff] %v3523_v16  ;;  %v3525_v35 = vadd.f32 %v3524_v38, %v3364_v22  ;;  %v3366_v14 = vadd.f32 %v3365_v13, %v6417_v19 }
 0x265   : > { %v3367_v2 = vpop.f32.mrf.mxu0 }
 0x266   : > { %v3528_v51 = vpop.f32.mrf.mxu1  ;;  %3638 = vst [vmem:[%s6539_s7 + $0x48] sm:$0xff] %v3525_v35  ;;  %v3527_v56 = vadd.f32 %v3526_v10, %v3366_v14  ;;  %v3368_v30 = vadd.f32 %v3367_v2, %v6420_v62 }
 0x267   : > { %v3371_v4 = vpop.f32.mrf.mxu0 }
 0x268   : > { %v3532_v32 = vpop.f32.mrf.mxu1  ;;  %3639 = vst [vmem:[%s6539_s7 + $0x50] sm:$0xff] %v3527_v56  ;;  %v3529_v9 = vadd.f32 %v3528_v51, %v3368_v30  ;;  %v3372_v5 = vadd.f32 %v3371_v4, %v6423_v45 }
 0x269   : > { %v3373_v46 = vpop.f32.mrf.mxu0 }
 0x26a   : > { %v3534_v54 = vpop.f32.mrf.mxu1  ;;  %3640 = vst [vmem:[%s6539_s7 + $0x58] sm:$0xff] %v3529_v9  ;;  %v3533_v44 = vadd.f32 %v3532_v32, %v3372_v5  ;;  %v3374_v19 = vadd.f32 %v3373_v46, %v6426_v1 }
 0x26b   : > { %v3375_v20 = vpop.f32.mrf.mxu0 }
 0x26c   : > { %v3536_v49 = vpop.f32.mrf.mxu1  ;;  %3641 = vst [vmem:[%s6539_s7 + $0x60] sm:$0xff] %v3533_v44  ;;  %v3535_v63 = vadd.f32 %v3534_v54, %v3374_v19  ;;  %v3376_v62 = vadd.f32 %v3375_v20, %v6429_v21 }
 0x26d   : > { %v3377_v43 = vpop.f32.mrf.mxu0 }
 0x26e   : > { %v3538_v11 = vpop.f32.mrf.mxu1  ;;  %3642 = vst [vmem:[%s6539_s7 + $0x68] sm:$0xff] %v3535_v63  ;;  %v3537_v27 = vadd.f32 %v3536_v49, %v3376_v62  ;;  %v3378_v45 = vadd.f32 %v3377_v43, %v6432_v24 }
 0x26f   : > { %v3381_v6 = vpop.f32.mrf.mxu0 }
 0x270   : > { %v3542_v48 = vpop.f32.mrf.mxu1  ;;  %3643 = vst [vmem:[%s6539_s7 + $0x70] sm:$0xff] %v3537_v27  ;;  %v3539_v37 = vadd.f32 %v3538_v11, %v3378_v45  ;;  %v3382_v1 = vadd.f32 %v3381_v6, %v6435_v3 }
 0x271   : > { %v3383_v38 = vpop.f32.mrf.mxu0 }
 0x272   : > { %v3544_v16 = vpop.f32.mrf.mxu1  ;;  %3644 = vst [vmem:[%s6539_s7 + $0x78] sm:$0xff] %v3539_v37  ;;  %v3543_v22 = vadd.f32 %v3542_v48, %v3382_v1  ;;  %v3384_v21 = vadd.f32 %v3383_v38, %v6438_v47 }
 0x273   : > { %v3385_v13 = vpop.f32.mrf.mxu0 }
 0x274   : > { %v3546_v10 = vpop.f32.mrf.mxu1  ;;  %3645 = vst [vmem:[%s6539_s7 + $0x80] sm:$0xff] %v3543_v22  ;;  %v3545_v35 = vadd.f32 %v3544_v16, %v3384_v21  ;;  %v3386_v24 = vadd.f32 %v3385_v13, %v6441_v29 }
 0x275   : > { %v3387_v14 = vpop.f32.mrf.mxu0 }
 0x276   : > { %v3548_v2 = vpop.f32.mrf.mxu1  ;;  %3646 = vst [vmem:[%s6539_s7 + $0x88] sm:$0xff] %v3545_v35  ;;  %v3547_v51 = vadd.f32 %v3546_v10, %v3386_v24  ;;  %v3388_v3 = vadd.f32 %v3387_v14, %v6444_v50 }
 0x277   : > { %v3391_v56 = vpop.f32.mrf.mxu0 }
 0x278   : > { %v3552_v30 = vpop.f32.mrf.mxu1  ;;  %3647 = vst [vmem:[%s6539_s7 + $0x90] sm:$0xff] %v3547_v51  ;;  %v3549_v4 = vadd.f32 %v3548_v2, %v3388_v3  ;;  %v3392_v47 = vadd.f32 %v3391_v56, %v6447_v60 }
 0x279   : > { %v3393_v32 = vpop.f32.mrf.mxu0 }
 0x27a   : > { %v3554_v9 = vpop.f32.mrf.mxu1  ;;  %3648 = vst [vmem:[%s6539_s7 + $0x98] sm:$0xff] %v3549_v4  ;;  %v3553_v5 = vadd.f32 %v3552_v30, %v3392_v47  ;;  %v3394_v29 = vadd.f32 %v3393_v32, %v6450_v18 }
 0x27b   : > { %v3395_v46 = vpop.f32.mrf.mxu0 }
 0x27c   : > { %v3556_v54 = vpop.f32.mrf.mxu1  ;;  %3649 = vst [vmem:[%s6539_s7 + $0xa0] sm:$0xff] %v3553_v5  ;;  %v3555_v44 = vadd.f32 %v3554_v9, %v3394_v29  ;;  %v3396_v50 = vadd.f32 %v3395_v46, %v6453_v15 }
 0x27d   : > { %v3397_v19 = vpop.f32.mrf.mxu0 }
 0x27e   : > { %v3558_v20 = vpop.f32.mrf.mxu1  ;;  %3650 = vst [vmem:[%s6539_s7 + $0xa8] sm:$0xff] %v3555_v44  ;;  %v3557_v49 = vadd.f32 %v3556_v54, %v3396_v50  ;;  %v3398_v60 = vadd.f32 %v3397_v19, %v6456_v26 }
 0x27f   : > { %v3401_v63 = vpop.f32.mrf.mxu0 }
 0x280   : > { %v3562_v62 = vpop.f32.mrf.mxu1  ;;  %3651 = vst [vmem:[%s6539_s7 + $0xb0] sm:$0xff] %v3557_v49  ;;  %v3559_v43 = vadd.f32 %v3558_v20, %v3398_v60  ;;  %v3402_v18 = vadd.f32 %v3401_v63, %v6459_v61 }
 0x281   : > { %v3403_v11 = vpop.f32.mrf.mxu0 }
 0x282   : > { %v3564_v27 = vpop.f32.mrf.mxu1  ;;  %3652 = vst [vmem:[%s6539_s7 + $0xb8] sm:$0xff] %v3559_v43  ;;  %v3563_v45 = vadd.f32 %v3562_v62, %v3402_v18  ;;  %v3404_v15 = vadd.f32 %v3403_v11, %v6462_v33 }
 0x283   : > { %v3405_v6 = vpop.f32.mrf.mxu0 }
 0x284   : > { %v3566_v48 = vpop.f32.mrf.mxu1  ;;  %3653 = vst [vmem:[%s6539_s7 + $0xc0] sm:$0xff] %v3563_v45  ;;  %v3565_v37 = vadd.f32 %v3564_v27, %v3404_v15  ;;  %v3406_v26 = vadd.f32 %v3405_v6, %v6465_v39 }
 0x285   : > { %v3407_v1 = vpop.f32.mrf.mxu0 }
 0x286   : > { %v3568_v38 = vpop.f32.mrf.mxu1  ;;  %3654 = vst [vmem:[%s6539_s7 + $0xc8] sm:$0xff] %v3565_v37  ;;  %v3567_v16 = vadd.f32 %v3566_v48, %v3406_v26  ;;  %v3408_v61 = vadd.f32 %v3407_v1, %v6468_v40 }
 0x287   : > { %v3411_v22 = vpop.f32.mrf.mxu0 }
 0x288   : > { %v3572_v21 = vpop.f32.mrf.mxu1  ;;  %3655 = vst [vmem:[%s6539_s7 + $0xd0] sm:$0xff] %v3567_v16  ;;  %v3569_v13 = vadd.f32 %v3568_v38, %v3408_v61  ;;  %v3412_v33 = vadd.f32 %v3411_v22, %v6471_v28 }
 0x289   : > { %v3413_v10 = vpop.f32.mrf.mxu0 }
 0x28a   : > { %v3574_v35 = vpop.f32.mrf.mxu1  ;;  %3656 = vst [vmem:[%s6539_s7 + $0xd8] sm:$0xff] %v3569_v13  ;;  %v3573_v24 = vadd.f32 %v3572_v21, %v3412_v33  ;;  %v3414_v39 = vadd.f32 %v3413_v10, %v6474_v52 }
 0x28b   : > { %v3415_v14 = vpop.f32.mrf.mxu0 }
 0x28c   : > { %v3576_v2 = vpop.f32.mrf.mxu1  ;;  %3657 = vst [vmem:[%s6539_s7 + $0xe0] sm:$0xff] %v3573_v24  ;;  %v3575_v51 = vadd.f32 %v3574_v35, %v3414_v39  ;;  %v3416_v40 = vadd.f32 %v3415_v14, %v6477_v58 }
 0x28d   : > { %v3417_v3 = vpop.f32.mrf.mxu0 }
 0x28e   : > { %v3578_v56 = vpop.f32.mrf.mxu1  ;;  %3658 = vst [vmem:[%s6539_s7 + $0xe8] sm:$0xff] %v3575_v51  ;;  %v3577_v30 = vadd.f32 %v3576_v2, %v3416_v40  ;;  %v3418_v28 = vadd.f32 %v3417_v3, %v6480_v12 }
 0x28f   : > { %v3421_v4 = vpop.f32.mrf.mxu0 }
 0x290   : > { %v3582_v47 = vpop.f32.mrf.mxu1  ;;  %3659 = vst [vmem:[%s6539_s7 + $0xf0] sm:$0xff] %v3577_v30  ;;  %v3579_v32 = vadd.f32 %v3578_v56, %v3418_v28  ;;  %v3422_v52 = vadd.f32 %v3421_v4, %v6483_v36  ;;  %v6805_v36 = vld [vmem:[#allocation8_spill] sm:$0xff] }
 0x291   : > { %v3423_v9 = vpop.f32.mrf.mxu0 }
 0x292   : > { %v3584_v5 = vpop.f32.mrf.mxu1  ;;  %3660 = vst [vmem:[%s6539_s7 + $0xf8] sm:$0xff] %v3579_v32  ;;  %v3583_v29 = vadd.f32 %v3582_v47, %v3422_v52  ;;  %v3424_v58 = vadd.f32 %v3423_v9, %v6486_v34 }
 0x293   : > { %v3425_v46 = vpop.f32.mrf.mxu0 }
 0x294   : > { %v3586_v54 = vpop.f32.mrf.mxu1  ;;  %3661 = vst [vmem:[%s6539_s7 + $0x100] sm:$0xff] %v3583_v29  ;;  %v3585_v44 = vadd.f32 %v3584_v5, %v3424_v58  ;;  %v3426_v12 = vadd.f32 %v3425_v46, %v6489_v42 }
 0x295   : > { %v3427_v50 = vpop.f32.mrf.mxu0 }
 0x296   : > { %v3588_v19 = vpop.f32.mrf.mxu1  ;;  %3662 = vst [vmem:[%s6539_s7 + $0x108] sm:$0xff] %v3585_v44  ;;  %v3587_v20 = vadd.f32 %v3586_v54, %v3426_v12  ;;  %v3428_v49 = vadd.f32 %v3427_v50, %v6805_v36 }
 0x297   : > { %v3431_v60 = vpop.f32.mrf.mxu0 }
 0x298   : > { %v3592_v63 = vpop.f32.mrf.mxu1  ;;  %3663 = vst [vmem:[%s6539_s7 + $0x110] sm:$0xff] %v3587_v20  ;;  %v3589_v62 = vadd.f32 %v3588_v19, %v3428_v49  ;;  %v3432_v34 = vadd.f32 %v3431_v60, %v6495_v17  ;;  %v6806_v17 = vld [vmem:[#allocation9_spill] sm:$0xff] }
 0x299   : > { %v3433_v43 = vpop.f32.mrf.mxu0 }
 0x29a   : > { %v3594_v18 = vpop.f32.mrf.mxu1  ;;  %3664 = vst [vmem:[%s6539_s7 + $0x118] sm:$0xff] %v3589_v62  ;;  %v3593_v11 = vadd.f32 %v3592_v63, %v3432_v34  ;;  %v3434_v42 = vadd.f32 %v3433_v43, %v6498_v57  ;;  %v3705_v63 = vld [vmem:[%s6539_s7 + $0x10] sm:$0xff] (%p4611_p4)  ;;  %v3707_v62 = vld [vmem:[%s6539_s7 + $0x18] sm:$0xff] (%p4611_p4)  ;;  %v3709_v34 = vld [vmem:[%s6539_s7 + $0x20] sm:$0xff] (%p4611_p4) }
 0x29b   : > { %v3435_v27 = vpop.f32.mrf.mxu0  ;;  %v3711_v43 = vld [vmem:[%s6539_s7 + $0x28] sm:$0xff] (%p4611_p4)  ;;  %3706 = vst [vmem:[%s6648_s21 + $0x20] sm:$0xff] (%p4611_p4), %v3705_v63  ;;  %3708 = vst [vmem:[%s6648_s21 + $0x28] sm:$0xff] (%p4611_p4), %v3707_v62 }
 0x29c   : > { %v3596_v45 = vpop.f32.mrf.mxu1  ;;  %3665 = vst [vmem:[%s6539_s7 + $0x120] sm:$0xff] %v3593_v11  ;;  %v3595_v15 = vadd.f32 %v3594_v18, %v3434_v42  ;;  %v3436_v6 = vadd.f32 %v3435_v27, %v6501_v55  ;;  %3710 = vst [vmem:[%s6648_s21 + $0x40] sm:$0xff] (%p4611_p4), %v3709_v34  ;;  %v3713_v18 = vld [vmem:[%s6539_s7 + $0x30] sm:$0xff] (%p4611_p4)  ;;  %v3715_v11 = vld [vmem:[%s6539_s7 + $0x38] sm:$0xff] (%p4611_p4) }
 0x29d   : > { %v3437_v48 = vpop.f32.mrf.mxu0  ;;  %3712 = vst [vmem:[%s6648_s21 + $0x48] sm:$0xff] (%p4611_p4), %v3711_v43  ;;  %v3717_v42 = vld [vmem:[%s6539_s7 + $0x40] sm:$0xff] (%p4611_p4)  ;;  %3714 = vst [vmem:[%s6648_s21 + $0x60] sm:$0xff] (%p4611_p4), %v3713_v18  ;;  %v3719_v27 = vld [vmem:[%s6539_s7 + $0x48] sm:$0xff] (%p4611_p4) }
 0x29e   : > { %v3598_v37 = vpop.f32.mrf.mxu1  ;;  %3666 = vst [vmem:[%s6539_s7 + $0x128] sm:$0xff] %v3595_v15  ;;  %v3597_v26 = vadd.f32 %v3596_v45, %v3436_v6  ;;  %v3438_v1 = vadd.f32 %v3437_v48, %v6806_v17  ;;  %3716 = vst [vmem:[%s6648_s21 + $0x68] sm:$0xff] (%p4611_p4), %v3715_v11  ;;  %v3721_v45 = vld [vmem:[%s6539_s7 + $0x50] sm:$0xff] (%p4611_p4)  ;;  %v3723_v15 = vld [vmem:[%s6539_s7 + $0x58] sm:$0xff] (%p4611_p4) }
 0x29f   : > { %v3441_v38 = vpop.f32.mrf.mxu0  ;;  %3718 = vst [vmem:[%s6648_s21 + $0x80] sm:$0xff] (%p4611_p4), %v3717_v42  ;;  %3720 = vst [vmem:[%s6648_s21 + $0x88] sm:$0xff] (%p4611_p4), %v3719_v27  ;;  %v3725_v6 = vld [vmem:[%s6539_s7 + $0x60] sm:$0xff] (%p4611_p4)  ;;  %v3727_v48 = vld [vmem:[%s6539_s7 + $0x68] sm:$0xff] (%p4611_p4) }
 0x2a0   : > { %v3602_v16 = vpop.f32.mrf.mxu1  ;;  %3667 = vst [vmem:[%s6539_s7 + $0x130] sm:$0xff] %v3597_v26  ;;  %v3599_v61 = vadd.f32 %v3598_v37, %v3438_v1  ;;  %v3442_v57 = vadd.f32 %v3441_v38, %v6507_v59  ;;  %3722 = vst [vmem:[%s6648_s21 + $0xa0] sm:$0xff] (%p4611_p4), %v3721_v45  ;;  %v3729_v37 = vld [vmem:[%s6539_s7 + $0x70] sm:$0xff] (%p4611_p4)  ;;  %v3731_v26 = vld [vmem:[%s6539_s7 + $0x78] sm:$0xff] (%p4611_p4) }
 0x2a1   : > { %v3443_v22 = vpop.f32.mrf.mxu0  ;;  %3724 = vst [vmem:[%s6648_s21 + $0xa8] sm:$0xff] (%p4611_p4), %v3723_v15  ;;  %3726 = vst [vmem:[%s6648_s21 + $0xc0] sm:$0xff] (%p4611_p4), %v3725_v6  ;;  %v3733_v17 = vld [vmem:[%s6539_s7 + $0x80] sm:$0xff] (%p4611_p4)  ;;  %v3735_v1 = vld [vmem:[%s6539_s7 + $0x88] sm:$0xff] (%p4611_p4) }
 0x2a2   : > { %v3604_v21 = vpop.f32.mrf.mxu1  ;;  %3668 = vst [vmem:[%s6539_s7 + $0x138] sm:$0xff] %v3599_v61  ;;  %v3603_v13 = vadd.f32 %v3602_v16, %v3442_v57  ;;  %v3444_v55 = vadd.f32 %v3443_v22, %v6510_v31  ;;  %3728 = vst [vmem:[%s6648_s21 + $0xc8] sm:$0xff] (%p4611_p4), %v3727_v48  ;;  %v3737_v38 = vld [vmem:[%s6539_s7 + $0x90] sm:$0xff] (%p4611_p4)  ;;  %v3739_v16 = vld [vmem:[%s6539_s7 + $0x98] sm:$0xff] (%p4611_p4) }
 0x2a3   : > { %v3445_v33 = vpop.f32.mrf.mxu0  ;;  %3730 = vst [vmem:[%s6648_s21 + $0xe0] sm:$0xff] (%p4611_p4), %v3729_v37  ;;  %3732 = vst [vmem:[%s6648_s21 + $0xe8] sm:$0xff] (%p4611_p4), %v3731_v26  ;;  %v3741_v61 = vld [vmem:[%s6539_s7 + $0xa0] sm:$0xff] (%p4611_p4)  ;;  %v3743_v57 = vld [vmem:[%s6539_s7 + $0xa8] sm:$0xff] (%p4611_p4) }
 0x2a4   : > { %v3606_v10 = vpop.f32.mrf.mxu1  ;;  %3669 = vst [vmem:[%s6539_s7 + $0x140] sm:$0xff] %v3603_v13  ;;  %v3605_v35 = vadd.f32 %v3604_v21, %v3444_v55  ;;  %v3446_v24 = vadd.f32 %v3445_v33, %v6513_v53  ;;  %3734 = vst [vmem:[%s6648_s21 + $0x100] sm:$0xff] (%p4611_p4), %v3733_v17  ;;  %v3745_v22 = vld [vmem:[%s6539_s7 + $0xb0] sm:$0xff] (%p4611_p4)  ;;  %v3747_v21 = vld [vmem:[%s6539_s7 + $0xb8] sm:$0xff] (%p4611_p4) }
 0x2a5   : > { %v3447_v39 = vpop.f32.mrf.mxu0  ;;  %3736 = vst [vmem:[%s6648_s21 + $0x108] sm:$0xff] (%p4611_p4), %v3735_v1  ;;  %3738 = vst [vmem:[%s6648_s21 + $0x120] sm:$0xff] (%p4611_p4), %v3737_v38  ;;  %v3749_v13 = vld [vmem:[%s6539_s7 + $0xc0] sm:$0xff] (%p4611_p4)  ;;  %v3751_v55 = vld [vmem:[%s6539_s7 + $0xc8] sm:$0xff] (%p4611_p4) }
 0x2a6   : > { %v3608_v14 = vpop.f32.mrf.mxu1  ;;  %3670 = vst [vmem:[%s6539_s7 + $0x148] sm:$0xff] %v3605_v35  ;;  %v3607_v2 = vadd.f32 %v3606_v10, %v3446_v24  ;;  %v3448_v59 = vadd.f32 %v3447_v39, %v6516_v23  ;;  %3740 = vst [vmem:[%s6648_s21 + $0x128] sm:$0xff] (%p4611_p4), %v3739_v16  ;;  %v3753_v33 = vld [vmem:[%s6539_s7 + $0xd0] sm:$0xff] (%p4611_p4)  ;;  %v3755_v10 = vld [vmem:[%s6539_s7 + $0xd8] sm:$0xff] (%p4611_p4) }
 0x2a7   : > { %v3451_v51 = vpop.f32.mrf.mxu0  ;;  %3742 = vst [vmem:[%s6648_s21 + $0x140] sm:$0xff] (%p4611_p4), %v3741_v61  ;;  %3744 = vst [vmem:[%s6648_s21 + $0x148] sm:$0xff] (%p4611_p4), %v3743_v57  ;;  %v3757_v35 = vld [vmem:[%s6539_s7 + $0xe0] sm:$0xff] (%p4611_p4)  ;;  %v3759_v24 = vld [vmem:[%s6539_s7 + $0xe8] sm:$0xff] (%p4611_p4) }
 0x2a8   : > { %v3612_v40 = vpop.f32.mrf.mxu1  ;;  %3671 = vst [vmem:[%s6539_s7 + $0x150] sm:$0xff] %v3607_v2  ;;  %v3609_v3 = vadd.f32 %v3608_v14, %v3448_v59  ;;  %v3452_v31 = vadd.f32 %v3451_v51, %v6519_v25  ;;  %3746 = vst [vmem:[%s6648_s21 + $0x160] sm:$0xff] (%p4611_p4), %v3745_v22  ;;  %v3761_v39 = vld [vmem:[%s6539_s7 + $0xf0] sm:$0xff] (%p4611_p4)  ;;  %v3763_v14 = vld [vmem:[%s6539_s7 + $0xf8] sm:$0xff] (%p4611_p4) }
 0x2a9   : > { %v3453_v56 = vpop.f32.mrf.mxu0  ;;  %3748 = vst [vmem:[%s6648_s21 + $0x168] sm:$0xff] (%p4611_p4), %v3747_v21  ;;  %3750 = vst [vmem:[%s6648_s21 + $0x180] sm:$0xff] (%p4611_p4), %v3749_v13  ;;  %v3765_v2 = vld [vmem:[%s6539_s7 + $0x100] sm:$0xff] (%p4611_p4)  ;;  %v3767_v59 = vld [vmem:[%s6539_s7 + $0x108] sm:$0xff] (%p4611_p4) }
 0x2aa   : > { %v3614_v30 = vpop.f32.mrf.mxu1  ;;  %3672 = vst [vmem:[%s6539_s7 + $0x158] sm:$0xff] %v3609_v3  ;;  %v3613_v28 = vadd.f32 %v3612_v40, %v3452_v31  ;;  %v3454_v53 = vadd.f32 %v3453_v56, %v6522_v8  ;;  %v6807_v8 = vld [vmem:[#allocation10_spill] sm:$0xff]  ;;  %3752 = vst [vmem:[%s6648_s21 + $0x188] sm:$0xff] (%p4611_p4), %v3751_v55  ;;  %v3769_v51 = vld [vmem:[%s6539_s7 + $0x110] sm:$0xff] (%p4611_p4) }
 0x2ab   : > { %v3455_v4 = vpop.f32.mrf.mxu0  ;;  %3754 = vst [vmem:[%s6648_s21 + $0x1a0] sm:$0xff] (%p4611_p4), %v3753_v33  ;;  %3756 = vst [vmem:[%s6648_s21 + $0x1a8] sm:$0xff] (%p4611_p4), %v3755_v10  ;;  %v3771_v40 = vld [vmem:[%s6539_s7 + $0x118] sm:$0xff] (%p4611_p4)  ;;  %v3773_v3 = vld [vmem:[%s6539_s7 + $0x120] sm:$0xff] (%p4611_p4) }
 0x2ac   : > { %v3616_v47 = vpop.f32.mrf.mxu1  ;;  %3673 = vst [vmem:[%s6539_s7 + $0x160] sm:$0xff] %v3613_v28  ;;  %v3615_v32 = vadd.f32 %v3614_v30, %v3454_v53  ;;  %v3456_v23 = vadd.f32 %v3455_v4, %v6525_v41  ;;  %3758 = vst [vmem:[%s6648_s21 + $0x1c0] sm:$0xff] (%p4611_p4), %v3757_v35  ;;  %v3775_v31 = vld [vmem:[%s6539_s7 + $0x128] sm:$0xff] (%p4611_p4)  ;;  %v3777_v56 = vld [vmem:[%s6539_s7 + $0x130] sm:$0xff] (%p4611_p4) }
 0x2ad   : > { %v3457_v52 = vpop.f32.mrf.mxu0  ;;  %3760 = vst [vmem:[%s6648_s21 + $0x1c8] sm:$0xff] (%p4611_p4), %v3759_v24  ;;  %3762 = vst [vmem:[%s6648_s21 + $0x1e0] sm:$0xff] (%p4611_p4), %v3761_v39  ;;  %v3779_v30 = vld [vmem:[%s6539_s7 + $0x138] sm:$0xff] (%p4611_p4)  ;;  %v3781_v28 = vld [vmem:[%s6539_s7 + $0x140] sm:$0xff] (%p4611_p4) }
 0x2ae   : > { %v3618_v9 = vpop.f32.mrf.mxu1  ;;  %3674 = vst [vmem:[%s6539_s7 + $0x168] sm:$0xff] %v3615_v32  ;;  %v3617_v5 = vadd.f32 %v3616_v47, %v3456_v23  ;;  %v3458_v25 = vadd.f32 %v3457_v52, %v6528_v7  ;;  %v3701_v7 = vld [vmem:[%s6539_s7] sm:$0xff] (%p4611_p4)  ;;  %3764 = vst [vmem:[%s6648_s21 + $0x1e8] sm:$0xff] (%p4611_p4), %v3763_v14  ;;  %v3783_v53 = vld [vmem:[%s6539_s7 + $0x148] sm:$0xff] (%p4611_p4) }
 0x2af   : > { %v3461_v29 = vpop.f32.mrf.mxu0  ;;  %3702 = vst [vmem:[%s6648_s21] sm:$0xff] (%p4611_p4), %v3701_v7  ;;  %3766 = vst [vmem:[%s6648_s21 + $0x200] sm:$0xff] (%p4611_p4), %v3765_v2  ;;  %v3785_v4 = vld [vmem:[%s6539_s7 + $0x150] sm:$0xff] (%p4611_p4) }
 0x2b0   : > { %v3622_v58 = vpop.f32.mrf.mxu1  ;;  %3675 = vst [vmem:[%s6539_s7 + $0x170] sm:$0xff] %v3617_v5  ;;  %v3619_v46 = vadd.f32 %v3618_v9, %v3458_v25  ;;  %v3462_v54 = vadd.f32 %v3461_v29, %v6807_v8  ;;  %3768 = vst [vmem:[%s6648_s21 + $0x208] sm:$0xff] (%p4611_p4), %v3767_v59 }
 0x2b1   : > { %v3463_v44 = vpop.f32.mrf.mxu0  ;;  %3770 = vst [vmem:[%s6648_s21 + $0x220] sm:$0xff] (%p4611_p4), %v3769_v51  ;;  %3772 = vst [vmem:[%s6648_s21 + $0x228] sm:$0xff] (%p4611_p4), %v3771_v40  ;;  %v3787_v47 = vld [vmem:[%s6539_s7 + $0x158] sm:$0xff] (%p4611_p4) }
 0x2b2   : > { %v3624_v12 = vpop.f32.mrf.mxu1  ;;  %3676 = vst [vmem:[%s6539_s7 + $0x178] sm:$0xff] %v3619_v46  ;;  %v3623_v50 = vadd.f32 %v3622_v58, %v3462_v54  ;;  %v3464_v41 = vadd.f32 %v3463_v44, %v6535_v0  ;;  %3685 = sbr.rel (!%p4611_p4) target bundleno = 703 (0x2bf), region = 36  ;;  %v3703_v0 = vld [vmem:[%s6539_s7 + $0x8] sm:$0xff] (%p4611_p4)  ;;  %3774 = vst [vmem:[%s6648_s21 + $0x240] sm:$0xff] (%p4611_p4), %v3773_v3 }
 0x2b3   : > { %v3465_v19 = vpop.f32.mrf.mxu0  ;;  %3704 = vst [vmem:[%s6648_s21 + $0x8] sm:$0xff] (%p4611_p4), %v3703_v0  ;;  %3776 = vst [vmem:[%s6648_s21 + $0x248] sm:$0xff] (%p4611_p4), %v3775_v31  ;;  %v3789_v32 = vld [vmem:[%s6539_s7 + $0x160] sm:$0xff] (%p4611_p4) }
 0x2b4   : > { %v3626_v20 = vpop.f32.mrf.mxu1  ;;  %3677 = vst [vmem:[%s6539_s7 + $0x180] sm:$0xf] %v3623_v50  ;;  %v3625_v36 = vadd.f32 %v3624_v12, %v3464_v41  ;;  %3778 = vst [vmem:[%s6648_s21 + $0x260] sm:$0xff] (%p4611_p4), %v3777_v56 }
 0x2b5   : > { %v3466_v49 = vpop.f32.mrf.mxu0  ;;  %3780 = vst [vmem:[%s6648_s21 + $0x268] sm:$0xff] (%p4611_p4), %v3779_v30  ;;  %3782 = vst [vmem:[%s6648_s21 + $0x280] sm:$0xff] (%p4611_p4), %v3781_v28  ;;  %v3791_v23 = vld [vmem:[%s6539_s7 + $0x168] sm:$0xff] (%p4611_p4) }
 0x2b6   : > { %v3627_v60 = vpop.f32.mrf.mxu1  ;;  %3678 = vst [vmem:[%s6539_s7 + $0x188] sm:$0xf] %v3625_v36  ;;  %3784 = vst [vmem:[%s6648_s21 + $0x288] sm:$0xff] (%p4611_p4), %v3783_v53 }
 0x2b7   : > { %3786 = vst [vmem:[%s6648_s21 + $0x2a0] sm:$0xff] %v3785_v4  ;;  %3788 = vst [vmem:[%s6648_s21 + $0x2a8] sm:$0xff] %v3787_v47  ;;  %v3793_v52 = vld [vmem:[%s6539_s7 + $0x170] sm:$0xff] }
 0x2b8   : > { %3790 = vst [vmem:[%s6648_s21 + $0x2c0] sm:$0xff] %v3789_v32  ;;  %3792 = vst [vmem:[%s6648_s21 + $0x2c8] sm:$0xff] %v3791_v23 }
 0x2b9   : > { %v3795_v9 = vld [vmem:[%s6539_s7 + $0x178] sm:$0xff]  ;;  %3794 = vst [vmem:[%s6648_s21 + $0x2e0] sm:$0xff] %v3793_v52 }
 0x2ba   : > { %3796 = vst [vmem:[%s6648_s21 + $0x2e8] sm:$0xff] %v3795_v9 }
 0x2bb   : > { %v3797_v5 = vld [vmem:[%s6539_s7 + $0x180] sm:$0xff] }
 0x2bc   : > { %3798 = vst [vmem:[%s6648_s21 + $0x300] sm:$0xff] %v3797_v5 }
 0x2bd   : > { %v3799_v25 = vld [vmem:[%s6539_s7 + $0x188] sm:$0xff] }
 0x2be   : > { %3800 = vst [vmem:[%s6648_s21 + $0x308] sm:$0xff] %v3799_v25 }
 0x2bf PF: > { %p10_p9 = scmp.ge.s32.totalorder %s4601_s16, 4   ;;  %s6808_s12 = smov %s4560_s13 }
 0x2c0   : > { %s6809_s13 = smov %s4609_s19  ;;  %s6810_s14 = smov %s4601_s16 }
 0x2c1   :  { %12 = sbr.rel (!%p10_p9) target bundleno = 2 (0x2), region = 88 }

</bundles_post_ra>
